<compile_context>
chip_gen: v5e
topology: v5e:2x2
jax: 0.10.0
libtpu: 0.0.40
codegen_flags: <defaults>
</compile_context>

<pallas_src>
import functools

import jax
import jax.numpy as jnp
from jax.experimental import pallas as pl
from jax.experimental.pallas import tpu as pltpu

_LANE = 128  # TPU lane width; channel dim is padded to this for dense vregs.


def _resblock_kernel(x_ref, w1_ref, b1_ref, w2_ref, b2_ref, o_ref, y_ref):
    """One (batch, row-tile) grid step of conv3x3 -> ReLU -> conv3x3 -> +x.

    x_ref : (TH + 4p, W + 2p, Cp)  bf16 input slab (conv1+conv2 row halo,
                                   p-wide zero column halo, lane-padded C)
    w*_ref: (K, K, Cp, Cp)         bf16 weights (ky, kx, Cin, Cout);
                                   res_scale already folded into w2 / b2
    b*_ref: (1, Cp)                f32 bias
    o_ref : (TH, W, Cp)            f32 output tile = res_scale*body(x) + x
    y_ref : (TH + 2p, W + 2p, Cp)  bf16 scratch: ReLU output + zero halo
    """
    TH, W, Cp = o_ref.shape
    K = w1_ref.shape[0]
    p = K // 2
    R1 = TH + 2 * p          # rows of y1 needed by conv2 (incl. halo rows)
    Ws = W + 2 * p           # padded width of the x slab / y1 scratch
    t = pl.program_id(1)

    # ---- conv1 + bias + ReLU over the extended row range -------------------
    # K*K shifted bf16 matmuls on the MXU (128-deep contraction), f32 accum.
    acc1 = jnp.zeros((R1 * W, Cp), jnp.float32)
    for dy in range(K):
        for dx in range(K):
            patch = x_ref[dy:dy + R1, dx:dx + W, :].reshape(R1 * W, Cp)
            acc1 += jnp.dot(patch, w1_ref[dy, dx],
                            preferred_element_type=jnp.float32)
    y1 = jnp.maximum(acc1 + b1_ref[...], 0.0)          # bias + ReLU in f32

    # ---- stage y1 (bf16 MXU operand) in the scratch -------------------------
    # Interior is fully overwritten every step; only the p-wide zero frame is
    # written -- never the whole buffer.
    y_ref[:, p:p + W, :] = y1.reshape(R1, W, Cp).astype(y_ref.dtype)
    zcol = jnp.zeros((R1, p, Cp), y_ref.dtype)
    y_ref[:, 0:p, :] = zcol                             # left zero border
    y_ref[:, W + p:Ws, :] = zcol                        # right zero border
    zrow = jnp.zeros((p, Ws, Cp), y_ref.dtype)

    @pl.when(t == 0)                                    # rows above the image
    def _():
        y_ref[0:p, :, :] = zrow

    @pl.when(t == pl.num_programs(1) - 1)               # rows below the image
    def _():
        y_ref[R1 - p:R1, :, :] = zrow

    # ---- conv2 (res_scale pre-folded) + residual ----------------------------
    acc2 = jnp.zeros((TH * W, Cp), jnp.float32)
    for dy in range(K):
        for dx in range(K):
            patch = y_ref[dy:dy + TH, dx:dx + W, :].reshape(TH * W, Cp)
            acc2 += jnp.dot(patch, w2_ref[dy, dx],
                            preferred_element_type=jnp.float32)
    x_res = x_ref[2 * p:2 * p + TH, p:p + W, :].reshape(TH * W, Cp)
    out = acc2 + b2_ref[...] + x_res.astype(jnp.float32)
    o_ref[...] = out.reshape(TH, W, Cp).astype(o_ref.dtype)  # lane-dense store


def resblock_forward_nhwc(x_nhwc, w1, b1, w2, b2, *, res_scale=1.0,
                          tile_h=None):
    """NHWC-native entry point. w*: (Cout, Cin, K, K) PyTorch layout."""
    B, H, W, C = x_nhwc.shape
    K = w1.shape[-1]
    p = K // 2
    Cp = max(_LANE, ((C + _LANE - 1) // _LANE) * _LANE)

    if tile_h is None:
        # Largest divisor of H whose f32 conv1 accumulator stays around 2 MiB
        # (keeps the per-step working set small even on v7x's 64 MiB VMEM).
        budget_rows = max(8, (2 * 1024 * 1024) // max(1, W * Cp * 4))
        divs = [d for d in range(1, H + 1) if H % d == 0 and d <= budget_rows]
        tile_h = max(divs) if divs else H
    assert H % tile_h == 0, "tile_h must divide H"
    n_t = H // tile_h

    Hs = tile_h + 4 * p            # slab rows per tile (conv1 + conv2 halo)
    Ws = W + 2 * p                 # slab / scratch width (conv halo columns)

    # Layout glue (one fused XLA producer): lane-pad channels, zero halo pad,
    # bf16 cast for the MXU operands, and extraction of overlapping row slabs
    # so every grid block is a plain non-overlapping BlockSpec block.
    x_l = jnp.pad(x_nhwc, ((0, 0), (2 * p, 2 * p), (p, p), (0, Cp - C)))
    x_l = x_l.astype(jnp.bfloat16)
    slabs = jnp.stack(
        [jax.lax.slice_in_dim(x_l, t * tile_h, t * tile_h + Hs, axis=1)
         for t in range(n_t)], axis=1)                 # (B, n_t, Hs, Ws, Cp)

    def relayout_w(w, scale):
        wk = jnp.transpose(w, (2, 3, 1, 0)).astype(jnp.float32) * scale
        wk = jnp.pad(wk, ((0, 0), (0, 0), (0, Cp - C), (0, Cp - C)))
        return wk.astype(jnp.bfloat16)                 # (K, K, Cin_p, Cout_p)

    w1_k = relayout_w(w1, 1.0)
    w2_k = relayout_w(w2, res_scale)                   # fold res_scale in
    b1_k = jnp.pad(b1.astype(jnp.float32), (0, Cp - C)).reshape(1, Cp)
    b2_k = (jnp.pad(b2.astype(jnp.float32), (0, Cp - C))
            * res_scale).reshape(1, Cp)

    out = pl.pallas_call(
        _resblock_kernel,
        out_shape=jax.ShapeDtypeStruct((B, H, W, Cp), jnp.float32),
        grid_spec=pltpu.PrefetchScalarGridSpec(
            num_scalar_prefetch=0,
            grid=(B, n_t),
            in_specs=[
                pl.BlockSpec((pl.Squeezed(), pl.Squeezed(), Hs, Ws, Cp),
                             lambda b, t: (b, t, 0, 0, 0)),
                pl.BlockSpec((K, K, Cp, Cp), lambda b, t: (0, 0, 0, 0)),
                pl.BlockSpec((1, Cp), lambda b, t: (0, 0)),
                pl.BlockSpec((K, K, Cp, Cp), lambda b, t: (0, 0, 0, 0)),
                pl.BlockSpec((1, Cp), lambda b, t: (0, 0)),
            ],
            out_specs=pl.BlockSpec((pl.Squeezed(), tile_h, W, Cp),
                                   lambda b, t: (b, t, 0, 0)),
            scratch_shapes=[
                pltpu.VMEM((tile_h + 2 * p, Ws, Cp), jnp.bfloat16)],
        ),
        compiler_params=pltpu.CompilerParams(
            dimension_semantics=("parallel", "parallel")),
    )(slabs, w1_k, b1_k, w2_k, b2_k)

    return out[..., :C]                                # drop lane padding


@functools.partial(jax.jit, static_argnames=("res_scale", "tile_h"))
def resblock_forward(x_nchw, w1, b1, w2, b2, *, res_scale=1.0, tile_h=None):
    """NCHW public API matching the PyTorch module."""
    x_nhwc = jnp.transpose(x_nchw, (0, 2, 3, 1))
    out = resblock_forward_nhwc(x_nhwc, w1, b1, w2, b2,
                                res_scale=res_scale, tile_h=tile_h)
    return jnp.transpose(out, (0, 3, 1, 2))


def _reference_forward(x_nchw, w1, b1, w2, b2, *, res_scale=1.0):
    """Pure-JAX reference mirroring the kernel's bf16 rounding of MXU operands."""
    q = lambda a: a.astype(jnp.bfloat16).astype(jnp.float32)
    dn = jax.lax.conv_dimension_numbers(x_nchw.shape, w1.shape,
                                        ("NCHW", "OIHW", "NCHW"))
    conv = functools.partial(jax.lax.conv_general_dilated,
                             window_strides=(1, 1), padding="SAME",
                             dimension_numbers=dn,
                             precision=jax.lax.Precision.HIGHEST)
    xq = q(x_nchw)
    y = conv(xq, q(w1)) + b1.reshape(1, -1, 1, 1)
    y = q(jnp.maximum(y, 0.0))
    y = conv(y, q(w2 * res_scale)) + (b2 * res_scale).reshape(1, -1, 1, 1)
    return y + xq


if __name__ == "__main__":
    # Small shapes consistent with the module: n_feats=4, kernel_size=3.
    B, C, H, W = 2, 4, 16, 16
    K = 3
    res_scale = 0.5

    key = jax.random.PRNGKey(0)
    kx, kw1, kb1, kw2, kb2 = jax.random.split(key, 5)
    x = jax.random.normal(kx, (B, C, H, W), dtype=jnp.float32)
    # Deterministic "conv" parameters (PyTorch layout: Cout, Cin, K, K).
    w1 = jax.random.normal(kw1, (C, C, K, K), dtype=jnp.float32) * 0.1
    b1 = jax.random.normal(kb1, (C,), dtype=jnp.float32) * 0.1
    w2 = jax.random.normal(kw2, (C, C, K, K), dtype=jnp.float32) * 0.1
    b2 = jax.random.normal(kb2, (C,), dtype=jnp.float32) * 0.1

    ref = _reference_forward(x, w1, b1, w2, b2, res_scale=res_scale)

    # Multi-tile path (2 row tiles per image -> exercises the halo logic).
    out = resblock_forward(x, w1, b1, w2, b2, res_scale=res_scale, tile_h=8)
    out = jax.block_until_ready(out)
    assert out.shape == (B, C, H, W) and out.dtype == jnp.float32
    assert jnp.allclose(out, ref, atol=1e-3, rtol=1e-3), \
        float(jnp.max(jnp.abs(out - ref)))

    # Default (single-tile per image) path.
    out2 = jax.block_until_ready(
        resblock_forward(x, w1, b1, w2, b2, res_scale=res_scale))
    assert jnp.allclose(out2, ref, atol=1e-3, rtol=1e-3)

    print("KERNEL_OK")
</pallas_src>

<mosaic_0001>
module attributes {stable_mosaic.version = 11 : i64} {
  func.func @_resblock_kernel(%arg0: i32, %arg1: i32, %arg2: memref<1x1x12x18x128xbf16, #tpu.memory_space<vmem>>, %arg3: memref<3x3x128x128xbf16, #tpu.memory_space<vmem>>, %arg4: memref<1x128xf32, #tpu.memory_space<vmem>>, %arg5: memref<3x3x128x128xbf16, #tpu.memory_space<vmem>>, %arg6: memref<1x128xf32, #tpu.memory_space<vmem>>, %arg7: memref<1x8x16x128xf32, #tpu.memory_space<vmem>>, %arg8: memref<10x18x128xbf16, #tpu.memory_space<vmem>>) attributes {dimension_semantics = [#tpu.dimension_semantics<parallel>, #tpu.dimension_semantics<parallel>], iteration_bounds = array<i64: 2, 2>, scalar_prefetch = 0 : i64, scratch_operands = 1 : i64, tpu.core_type = #tpu.core_type<tc>, window_params = [{transform_indices = @transform_0, window_bounds = array<i64: 1, 1, 12, 18, 128>}, {pipeline_mode = #tpu.pipeline_mode<synchronous>, transform_indices = @transform_1, window_bounds = array<i64: 3, 3, 128, 128>}, {pipeline_mode = #tpu.pipeline_mode<synchronous>, transform_indices = @transform_2, window_bounds = array<i64: 1, 128>}, {pipeline_mode = #tpu.pipeline_mode<synchronous>, transform_indices = @transform_3, window_bounds = array<i64: 3, 3, 128, 128>}, {pipeline_mode = #tpu.pipeline_mode<synchronous>, transform_indices = @transform_4, window_bounds = array<i64: 1, 128>}, {transform_indices = @transform_5, window_bounds = array<i64: 1, 8, 16, 128>}]} {
    %cst = arith.constant 0.000000e+00 : f32
    %0 = vector.broadcast %cst : f32 to vector<160x128xf32>
    %c0 = arith.constant 0 : index
    %c0_0 = arith.constant 0 : index
    %c0_1 = arith.constant 0 : index
    %c0_2 = arith.constant 0 : index
    %c0_3 = arith.constant 0 : index
    %1 = vector.load %arg2[%c0, %c0_0, %c0_1, %c0_2, %c0_3] : memref<1x1x12x18x128xbf16, #tpu.memory_space<vmem>>, vector<1x1x10x16x128xbf16>
    %2 = vector.shape_cast %1 : vector<1x1x10x16x128xbf16> to vector<10x16x128xbf16>
    %3 = vector.shape_cast %2 : vector<10x16x128xbf16> to vector<160x128xbf16>
    %c0_4 = arith.constant 0 : index
    %c0_5 = arith.constant 0 : index
    %c0_6 = arith.constant 0 : index
    %c0_7 = arith.constant 0 : index
    %4 = vector.load %arg3[%c0_4, %c0_5, %c0_6, %c0_7] : memref<3x3x128x128xbf16, #tpu.memory_space<vmem>>, vector<1x1x128x128xbf16>
    %5 = vector.shape_cast %4 : vector<1x1x128x128xbf16> to vector<128x128xbf16>
    %cst_8 = arith.constant dense<0.000000e+00> : vector<160x128xf32>
    %6 = tpu.matmul %3, %5, %cst_8 {dimension_numbers = #tpu.dot_dimension_numbers<[1], [0], [0], [1], [0, 0, 1, 1], [], []>} : vector<160x128xbf16>, vector<128x128xbf16>, vector<160x128xf32> -> vector<160x128xf32>
    %7 = arith.addf %0, %6 : vector<160x128xf32>
    %c0_9 = arith.constant 0 : index
    %c0_10 = arith.constant 0 : index
    %c0_11 = arith.constant 0 : index
    %c1 = arith.constant 1 : index
    %c0_12 = arith.constant 0 : index
    %8 = vector.load %arg2[%c0_9, %c0_10, %c0_11, %c1, %c0_12] : memref<1x1x12x18x128xbf16, #tpu.memory_space<vmem>>, vector<1x1x10x16x128xbf16>
    %9 = vector.shape_cast %8 : vector<1x1x10x16x128xbf16> to vector<10x16x128xbf16>
    %10 = vector.shape_cast %9 : vector<10x16x128xbf16> to vector<160x128xbf16>
    %c0_13 = arith.constant 0 : index
    %c1_14 = arith.constant 1 : index
    %c0_15 = arith.constant 0 : index
    %c0_16 = arith.constant 0 : index
    %11 = vector.load %arg3[%c0_13, %c1_14, %c0_15, %c0_16] : memref<3x3x128x128xbf16, #tpu.memory_space<vmem>>, vector<1x1x128x128xbf16>
    %12 = vector.shape_cast %11 : vector<1x1x128x128xbf16> to vector<128x128xbf16>
    %cst_17 = arith.constant dense<0.000000e+00> : vector<160x128xf32>
    %13 = tpu.matmul %10, %12, %cst_17 {dimension_numbers = #tpu.dot_dimension_numbers<[1], [0], [0], [1], [0, 0, 1, 1], [], []>} : vector<160x128xbf16>, vector<128x128xbf16>, vector<160x128xf32> -> vector<160x128xf32>
    %14 = arith.addf %7, %13 : vector<160x128xf32>
    %c0_18 = arith.constant 0 : index
    %c0_19 = arith.constant 0 : index
    %c0_20 = arith.constant 0 : index
    %c2 = arith.constant 2 : index
    %c0_21 = arith.constant 0 : index
    %15 = vector.load %arg2[%c0_18, %c0_19, %c0_20, %c2, %c0_21] : memref<1x1x12x18x128xbf16, #tpu.memory_space<vmem>>, vector<1x1x10x16x128xbf16>
    %16 = vector.shape_cast %15 : vector<1x1x10x16x128xbf16> to vector<10x16x128xbf16>
    %17 = vector.shape_cast %16 : vector<10x16x128xbf16> to vector<160x128xbf16>
    %c0_22 = arith.constant 0 : index
    %c2_23 = arith.constant 2 : index
    %c0_24 = arith.constant 0 : index
    %c0_25 = arith.constant 0 : index
    %18 = vector.load %arg3[%c0_22, %c2_23, %c0_24, %c0_25] : memref<3x3x128x128xbf16, #tpu.memory_space<vmem>>, vector<1x1x128x128xbf16>
    %19 = vector.shape_cast %18 : vector<1x1x128x128xbf16> to vector<128x128xbf16>
    %cst_26 = arith.constant dense<0.000000e+00> : vector<160x128xf32>
    %20 = tpu.matmul %17, %19, %cst_26 {dimension_numbers = #tpu.dot_dimension_numbers<[1], [0], [0], [1], [0, 0, 1, 1], [], []>} : vector<160x128xbf16>, vector<128x128xbf16>, vector<160x128xf32> -> vector<160x128xf32>
    %21 = arith.addf %14, %20 : vector<160x128xf32>
    %c0_27 = arith.constant 0 : index
    %c0_28 = arith.constant 0 : index
    %c1_29 = arith.constant 1 : index
    %c0_30 = arith.constant 0 : index
    %c0_31 = arith.constant 0 : index
    %22 = vector.load %arg2[%c0_27, %c0_28, %c1_29, %c0_30, %c0_31] : memref<1x1x12x18x128xbf16, #tpu.memory_space<vmem>>, vector<1x1x10x16x128xbf16>
    %23 = vector.shape_cast %22 : vector<1x1x10x16x128xbf16> to vector<10x16x128xbf16>
    %24 = vector.shape_cast %23 : vector<10x16x128xbf16> to vector<160x128xbf16>
    %c1_32 = arith.constant 1 : index
    %c0_33 = arith.constant 0 : index
    %c0_34 = arith.constant 0 : index
    %c0_35 = arith.constant 0 : index
    %25 = vector.load %arg3[%c1_32, %c0_33, %c0_34, %c0_35] : memref<3x3x128x128xbf16, #tpu.memory_space<vmem>>, vector<1x1x128x128xbf16>
    %26 = vector.shape_cast %25 : vector<1x1x128x128xbf16> to vector<128x128xbf16>
    %cst_36 = arith.constant dense<0.000000e+00> : vector<160x128xf32>
    %27 = tpu.matmul %24, %26, %cst_36 {dimension_numbers = #tpu.dot_dimension_numbers<[1], [0], [0], [1], [0, 0, 1, 1], [], []>} : vector<160x128xbf16>, vector<128x128xbf16>, vector<160x128xf32> -> vector<160x128xf32>
    %28 = arith.addf %21, %27 : vector<160x128xf32>
    %c0_37 = arith.constant 0 : index
    %c0_38 = arith.constant 0 : index
    %c1_39 = arith.constant 1 : index
    %c1_40 = arith.constant 1 : index
    %c0_41 = arith.constant 0 : index
    %29 = vector.load %arg2[%c0_37, %c0_38, %c1_39, %c1_40, %c0_41] : memref<1x1x12x18x128xbf16, #tpu.memory_space<vmem>>, vector<1x1x10x16x128xbf16>
    %30 = vector.shape_cast %29 : vector<1x1x10x16x128xbf16> to vector<10x16x128xbf16>
    %31 = vector.shape_cast %30 : vector<10x16x128xbf16> to vector<160x128xbf16>
    %c1_42 = arith.constant 1 : index
    %c1_43 = arith.constant 1 : index
    %c0_44 = arith.constant 0 : index
    %c0_45 = arith.constant 0 : index
    %32 = vector.load %arg3[%c1_42, %c1_43, %c0_44, %c0_45] : memref<3x3x128x128xbf16, #tpu.memory_space<vmem>>, vector<1x1x128x128xbf16>
    %33 = vector.shape_cast %32 : vector<1x1x128x128xbf16> to vector<128x128xbf16>
    %cst_46 = arith.constant dense<0.000000e+00> : vector<160x128xf32>
    %34 = tpu.matmul %31, %33, %cst_46 {dimension_numbers = #tpu.dot_dimension_numbers<[1], [0], [0], [1], [0, 0, 1, 1], [], []>} : vector<160x128xbf16>, vector<128x128xbf16>, vector<160x128xf32> -> vector<160x128xf32>
    %35 = arith.addf %28, %34 : vector<160x128xf32>
    %c0_47 = arith.constant 0 : index
    %c0_48 = arith.constant 0 : index
    %c1_49 = arith.constant 1 : index
    %c2_50 = arith.constant 2 : index
    %c0_51 = arith.constant 0 : index
    %36 = vector.load %arg2[%c0_47, %c0_48, %c1_49, %c2_50, %c0_51] : memref<1x1x12x18x128xbf16, #tpu.memory_space<vmem>>, vector<1x1x10x16x128xbf16>
    %37 = vector.shape_cast %36 : vector<1x1x10x16x128xbf16> to vector<10x16x128xbf16>
    %38 = vector.shape_cast %37 : vector<10x16x128xbf16> to vector<160x128xbf16>
    %c1_52 = arith.constant 1 : index
    %c2_53 = arith.constant 2 : index
    %c0_54 = arith.constant 0 : index
    %c0_55 = arith.constant 0 : index
    %39 = vector.load %arg3[%c1_52, %c2_53, %c0_54, %c0_55] : memref<3x3x128x128xbf16, #tpu.memory_space<vmem>>, vector<1x1x128x128xbf16>
    %40 = vector.shape_cast %39 : vector<1x1x128x128xbf16> to vector<128x128xbf16>
    %cst_56 = arith.constant dense<0.000000e+00> : vector<160x128xf32>
    %41 = tpu.matmul %38, %40, %cst_56 {dimension_numbers = #tpu.dot_dimension_numbers<[1], [0], [0], [1], [0, 0, 1, 1], [], []>} : vector<160x128xbf16>, vector<128x128xbf16>, vector<160x128xf32> -> vector<160x128xf32>
    %42 = arith.addf %35, %41 : vector<160x128xf32>
    %c0_57 = arith.constant 0 : index
    %c0_58 = arith.constant 0 : index
    %c2_59 = arith.constant 2 : index
    %c0_60 = arith.constant 0 : index
    %c0_61 = arith.constant 0 : index
    %43 = vector.load %arg2[%c0_57, %c0_58, %c2_59, %c0_60, %c0_61] : memref<1x1x12x18x128xbf16, #tpu.memory_space<vmem>>, vector<1x1x10x16x128xbf16>
    %44 = vector.shape_cast %43 : vector<1x1x10x16x128xbf16> to vector<10x16x128xbf16>
    %45 = vector.shape_cast %44 : vector<10x16x128xbf16> to vector<160x128xbf16>
    %c2_62 = arith.constant 2 : index
    %c0_63 = arith.constant 0 : index
    %c0_64 = arith.constant 0 : index
    %c0_65 = arith.constant 0 : index
    %46 = vector.load %arg3[%c2_62, %c0_63, %c0_64, %c0_65] : memref<3x3x128x128xbf16, #tpu.memory_space<vmem>>, vector<1x1x128x128xbf16>
    %47 = vector.shape_cast %46 : vector<1x1x128x128xbf16> to vector<128x128xbf16>
    %cst_66 = arith.constant dense<0.000000e+00> : vector<160x128xf32>
    %48 = tpu.matmul %45, %47, %cst_66 {dimension_numbers = #tpu.dot_dimension_numbers<[1], [0], [0], [1], [0, 0, 1, 1], [], []>} : vector<160x128xbf16>, vector<128x128xbf16>, vector<160x128xf32> -> vector<160x128xf32>
    %49 = arith.addf %42, %48 : vector<160x128xf32>
    %c0_67 = arith.constant 0 : index
    %c0_68 = arith.constant 0 : index
    %c2_69 = arith.constant 2 : index
    %c1_70 = arith.constant 1 : index
    %c0_71 = arith.constant 0 : index
    %50 = vector.load %arg2[%c0_67, %c0_68, %c2_69, %c1_70, %c0_71] : memref<1x1x12x18x128xbf16, #tpu.memory_space<vmem>>, vector<1x1x10x16x128xbf16>
    %51 = vector.shape_cast %50 : vector<1x1x10x16x128xbf16> to vector<10x16x128xbf16>
    %52 = vector.shape_cast %51 : vector<10x16x128xbf16> to vector<160x128xbf16>
    %c2_72 = arith.constant 2 : index
    %c1_73 = arith.constant 1 : index
    %c0_74 = arith.constant 0 : index
    %c0_75 = arith.constant 0 : index
    %53 = vector.load %arg3[%c2_72, %c1_73, %c0_74, %c0_75] : memref<3x3x128x128xbf16, #tpu.memory_space<vmem>>, vector<1x1x128x128xbf16>
    %54 = vector.shape_cast %53 : vector<1x1x128x128xbf16> to vector<128x128xbf16>
    %cst_76 = arith.constant dense<0.000000e+00> : vector<160x128xf32>
    %55 = tpu.matmul %52, %54, %cst_76 {dimension_numbers = #tpu.dot_dimension_numbers<[1], [0], [0], [1], [0, 0, 1, 1], [], []>} : vector<160x128xbf16>, vector<128x128xbf16>, vector<160x128xf32> -> vector<160x128xf32>
    %56 = arith.addf %49, %55 : vector<160x128xf32>
    %c0_77 = arith.constant 0 : index
    %c0_78 = arith.constant 0 : index
    %c2_79 = arith.constant 2 : index
    %c2_80 = arith.constant 2 : index
    %c0_81 = arith.constant 0 : index
    %57 = vector.load %arg2[%c0_77, %c0_78, %c2_79, %c2_80, %c0_81] : memref<1x1x12x18x128xbf16, #tpu.memory_space<vmem>>, vector<1x1x10x16x128xbf16>
    %58 = vector.shape_cast %57 : vector<1x1x10x16x128xbf16> to vector<10x16x128xbf16>
    %59 = vector.shape_cast %58 : vector<10x16x128xbf16> to vector<160x128xbf16>
    %c2_82 = arith.constant 2 : index
    %c2_83 = arith.constant 2 : index
    %c0_84 = arith.constant 0 : index
    %c0_85 = arith.constant 0 : index
    %60 = vector.load %arg3[%c2_82, %c2_83, %c0_84, %c0_85] : memref<3x3x128x128xbf16, #tpu.memory_space<vmem>>, vector<1x1x128x128xbf16>
    %61 = vector.shape_cast %60 : vector<1x1x128x128xbf16> to vector<128x128xbf16>
    %cst_86 = arith.constant dense<0.000000e+00> : vector<160x128xf32>
    %62 = tpu.matmul %59, %61, %cst_86 {dimension_numbers = #tpu.dot_dimension_numbers<[1], [0], [0], [1], [0, 0, 1, 1], [], []>} : vector<160x128xbf16>, vector<128x128xbf16>, vector<160x128xf32> -> vector<160x128xf32>
    %63 = arith.addf %56, %62 : vector<160x128xf32>
    %c0_87 = arith.constant 0 : index
    %c0_88 = arith.constant 0 : index
    %64 = vector.load %arg4[%c0_87, %c0_88] : memref<1x128xf32, #tpu.memory_space<vmem>>, vector<1x128xf32>
    %65 = vector.broadcast %64 : vector<1x128xf32> to vector<160x128xf32>
    %66 = arith.addf %63, %65 : vector<160x128xf32>
    %cst_89 = arith.constant 0.000000e+00 : f32
    %67 = vector.broadcast %cst_89 : f32 to vector<160x128xf32>
    %68 = arith.maximumf %66, %67 : vector<160x128xf32>
    %69 = vector.shape_cast %68 : vector<160x128xf32> to vector<10x16x128xf32>
    %70 = arith.truncf %69 : vector<10x16x128xf32> to vector<10x16x128xbf16>
    %c0_90 = arith.constant 0 : index
    %c1_91 = arith.constant 1 : index
    %c0_92 = arith.constant 0 : index
    %71 = vector.load %arg8[%c0_90, %c1_91, %c0_92] : memref<10x18x128xbf16, #tpu.memory_space<vmem>>, vector<10x16x128xbf16>
    tpu.vector_store %arg8[%c0_90, %c1_91, %c0_92], %70 {strides = array<i32>} : memref<10x18x128xbf16, #tpu.memory_space<vmem>>, vector<10x16x128xbf16>,
    %cst_93 = arith.constant 0.000000e+00 : bf16
    %72 = vector.broadcast %cst_93 : bf16 to vector<10x1x128xbf16>
    %c0_94 = arith.constant 0 : index
    %c0_95 = arith.constant 0 : index
    %c0_96 = arith.constant 0 : index
    %73 = vector.load %arg8[%c0_94, %c0_95, %c0_96] : memref<10x18x128xbf16, #tpu.memory_space<vmem>>, vector<10x1x128xbf16>
    tpu.vector_store %arg8[%c0_94, %c0_95, %c0_96], %72 {strides = array<i32>} : memref<10x18x128xbf16, #tpu.memory_space<vmem>>, vector<10x1x128xbf16>,
    %c0_97 = arith.constant 0 : index
    %c17 = arith.constant 17 : index
    %c0_98 = arith.constant 0 : index
    %74 = vector.load %arg8[%c0_97, %c17, %c0_98] : memref<10x18x128xbf16, #tpu.memory_space<vmem>>, vector<10x1x128xbf16>
    tpu.vector_store %arg8[%c0_97, %c17, %c0_98], %72 {strides = array<i32>} : memref<10x18x128xbf16, #tpu.memory_space<vmem>>, vector<10x1x128xbf16>,
    %cst_99 = arith.constant 0.000000e+00 : bf16
    %75 = vector.broadcast %cst_99 : bf16 to vector<1x18x128xbf16>
    %c0_i32 = arith.constant 0 : i32
    %76 = arith.cmpi eq, %arg1, %c0_i32 : i32
    %77 = arith.extui %76 : i1 to i32
    %c0_i32_100 = arith.constant 0 : i32
    %78 = arith.cmpi ne, %77, %c0_i32_100 : i32
    scf.if %78 {
      %c0_186 = arith.constant 0 : index
      %c0_187 = arith.constant 0 : index
      %c0_188 = arith.constant 0 : index
      %149 = vector.load %arg8[%c0_186, %c0_187, %c0_188] : memref<10x18x128xbf16, #tpu.memory_space<vmem>>, vector<1x18x128xbf16>
      tpu.vector_store %arg8[%c0_186, %c0_187, %c0_188], %75 {strides = array<i32>} : memref<10x18x128xbf16, #tpu.memory_space<vmem>>, vector<1x18x128xbf16>,
    } else {
    }
    %c1_i32 = arith.constant 1 : i32
    %79 = arith.cmpi eq, %arg1, %c1_i32 : i32
    %80 = arith.extui %79 : i1 to i32
    %c0_i32_101 = arith.constant 0 : i32
    %81 = arith.cmpi ne, %80, %c0_i32_101 : i32
    scf.if %81 {
      %c9 = arith.constant 9 : index
      %c0_186 = arith.constant 0 : index
      %c0_187 = arith.constant 0 : index
      %149 = vector.load %arg8[%c9, %c0_186, %c0_187] : memref<10x18x128xbf16, #tpu.memory_space<vmem>>, vector<1x18x128xbf16>
      tpu.vector_store %arg8[%c9, %c0_186, %c0_187], %75 {strides = array<i32>} : memref<10x18x128xbf16, #tpu.memory_space<vmem>>, vector<1x18x128xbf16>,
    } else {
    }
    %cst_102 = arith.constant 0.000000e+00 : f32
    %82 = vector.broadcast %cst_102 : f32 to vector<128x128xf32>
    %c0_103 = arith.constant 0 : index
    %c0_104 = arith.constant 0 : index
    %c0_105 = arith.constant 0 : index
    %83 = vector.load %arg8[%c0_103, %c0_104, %c0_105] : memref<10x18x128xbf16, #tpu.memory_space<vmem>>, vector<8x16x128xbf16>
    %84 = vector.shape_cast %83 : vector<8x16x128xbf16> to vector<128x128xbf16>
    %c0_106 = arith.constant 0 : index
    %c0_107 = arith.constant 0 : index
    %c0_108 = arith.constant 0 : index
    %c0_109 = arith.constant 0 : index
    %85 = vector.load %arg5[%c0_106, %c0_107, %c0_108, %c0_109] : memref<3x3x128x128xbf16, #tpu.memory_space<vmem>>, vector<1x1x128x128xbf16>
    %86 = vector.shape_cast %85 : vector<1x1x128x128xbf16> to vector<128x128xbf16>
    %cst_110 = arith.constant dense<0.000000e+00> : vector<128x128xf32>
    %87 = tpu.matmul %84, %86, %cst_110 {dimension_numbers = #tpu.dot_dimension_numbers<[1], [0], [0], [1], [0, 0, 1, 1], [], []>} : vector<128x128xbf16>, vector<128x128xbf16>, vector<128x128xf32> -> vector<128x128xf32>
    %88 = arith.addf %82, %87 : vector<128x128xf32>
    %c0_111 = arith.constant 0 : index
    %c1_112 = arith.constant 1 : index
    %c0_113 = arith.constant 0 : index
    %89 = vector.load %arg8[%c0_111, %c1_112, %c0_113] : memref<10x18x128xbf16, #tpu.memory_space<vmem>>, vector<8x16x128xbf16>
    %90 = vector.shape_cast %89 : vector<8x16x128xbf16> to vector<128x128xbf16>
    %c0_114 = arith.constant 0 : index
    %c1_115 = arith.constant 1 : index
    %c0_116 = arith.constant 0 : index
    %c0_117 = arith.constant 0 : index
    %91 = vector.load %arg5[%c0_114, %c1_115, %c0_116, %c0_117] : memref<3x3x128x128xbf16, #tpu.memory_space<vmem>>, vector<1x1x128x128xbf16>
    %92 = vector.shape_cast %91 : vector<1x1x128x128xbf16> to vector<128x128xbf16>
    %cst_118 = arith.constant dense<0.000000e+00> : vector<128x128xf32>
    %93 = tpu.matmul %90, %92, %cst_118 {dimension_numbers = #tpu.dot_dimension_numbers<[1], [0], [0], [1], [0, 0, 1, 1], [], []>} : vector<128x128xbf16>, vector<128x128xbf16>, vector<128x128xf32> -> vector<128x128xf32>
    %94 = arith.addf %88, %93 : vector<128x128xf32>
    %c0_119 = arith.constant 0 : index
    %c2_120 = arith.constant 2 : index
    %c0_121 = arith.constant 0 : index
    %95 = vector.load %arg8[%c0_119, %c2_120, %c0_121] : memref<10x18x128xbf16, #tpu.memory_space<vmem>>, vector<8x16x128xbf16>
    %96 = vector.shape_cast %95 : vector<8x16x128xbf16> to vector<128x128xbf16>
    %c0_122 = arith.constant 0 : index
    %c2_123 = arith.constant 2 : index
    %c0_124 = arith.constant 0 : index
    %c0_125 = arith.constant 0 : index
    %97 = vector.load %arg5[%c0_122, %c2_123, %c0_124, %c0_125] : memref<3x3x128x128xbf16, #tpu.memory_space<vmem>>, vector<1x1x128x128xbf16>
    %98 = vector.shape_cast %97 : vector<1x1x128x128xbf16> to vector<128x128xbf16>
    %cst_126 = arith.constant dense<0.000000e+00> : vector<128x128xf32>
    %99 = tpu.matmul %96, %98, %cst_126 {dimension_numbers = #tpu.dot_dimension_numbers<[1], [0], [0], [1], [0, 0, 1, 1], [], []>} : vector<128x128xbf16>, vector<128x128xbf16>, vector<128x128xf32> -> vector<128x128xf32>
    %100 = arith.addf %94, %99 : vector<128x128xf32>
    %c1_127 = arith.constant 1 : index
    %c0_128 = arith.constant 0 : index
    %c0_129 = arith.constant 0 : index
    %101 = vector.load %arg8[%c1_127, %c0_128, %c0_129] : memref<10x18x128xbf16, #tpu.memory_space<vmem>>, vector<8x16x128xbf16>
    %102 = vector.shape_cast %101 : vector<8x16x128xbf16> to vector<128x128xbf16>
    %c1_130 = arith.constant 1 : index
    %c0_131 = arith.constant 0 : index
    %c0_132 = arith.constant 0 : index
    %c0_133 = arith.constant 0 : index
    %103 = vector.load %arg5[%c1_130, %c0_131, %c0_132, %c0_133] : memref<3x3x128x128xbf16, #tpu.memory_space<vmem>>, vector<1x1x128x128xbf16>
    %104 = vector.shape_cast %103 : vector<1x1x128x128xbf16> to vector<128x128xbf16>
    %cst_134 = arith.constant dense<0.000000e+00> : vector<128x128xf32>
    %105 = tpu.matmul %102, %104, %cst_134 {dimension_numbers = #tpu.dot_dimension_numbers<[1], [0], [0], [1], [0, 0, 1, 1], [], []>} : vector<128x128xbf16>, vector<128x128xbf16>, vector<128x128xf32> -> vector<128x128xf32>
    %106 = arith.addf %100, %105 : vector<128x128xf32>
    %c1_135 = arith.constant 1 : index
    %c1_136 = arith.constant 1 : index
    %c0_137 = arith.constant 0 : index
    %107 = vector.load %arg8[%c1_135, %c1_136, %c0_137] : memref<10x18x128xbf16, #tpu.memory_space<vmem>>, vector<8x16x128xbf16>
    %108 = vector.shape_cast %107 : vector<8x16x128xbf16> to vector<128x128xbf16>
    %c1_138 = arith.constant 1 : index
    %c1_139 = arith.constant 1 : index
    %c0_140 = arith.constant 0 : index
    %c0_141 = arith.constant 0 : index
    %109 = vector.load %arg5[%c1_138, %c1_139, %c0_140, %c0_141] : memref<3x3x128x128xbf16, #tpu.memory_space<vmem>>, vector<1x1x128x128xbf16>
    %110 = vector.shape_cast %109 : vector<1x1x128x128xbf16> to vector<128x128xbf16>
    %cst_142 = arith.constant dense<0.000000e+00> : vector<128x128xf32>
    %111 = tpu.matmul %108, %110, %cst_142 {dimension_numbers = #tpu.dot_dimension_numbers<[1], [0], [0], [1], [0, 0, 1, 1], [], []>} : vector<128x128xbf16>, vector<128x128xbf16>, vector<128x128xf32> -> vector<128x128xf32>
    %112 = arith.addf %106, %111 : vector<128x128xf32>
    %c1_143 = arith.constant 1 : index
    %c2_144 = arith.constant 2 : index
    %c0_145 = arith.constant 0 : index
    %113 = vector.load %arg8[%c1_143, %c2_144, %c0_145] : memref<10x18x128xbf16, #tpu.memory_space<vmem>>, vector<8x16x128xbf16>
    %114 = vector.shape_cast %113 : vector<8x16x128xbf16> to vector<128x128xbf16>
    %c1_146 = arith.constant 1 : index
    %c2_147 = arith.constant 2 : index
    %c0_148 = arith.constant 0 : index
    %c0_149 = arith.constant 0 : index
    %115 = vector.load %arg5[%c1_146, %c2_147, %c0_148, %c0_149] : memref<3x3x128x128xbf16, #tpu.memory_space<vmem>>, vector<1x1x128x128xbf16>
    %116 = vector.shape_cast %115 : vector<1x1x128x128xbf16> to vector<128x128xbf16>
    %cst_150 = arith.constant dense<0.000000e+00> : vector<128x128xf32>
    %117 = tpu.matmul %114, %116, %cst_150 {dimension_numbers = #tpu.dot_dimension_numbers<[1], [0], [0], [1], [0, 0, 1, 1], [], []>} : vector<128x128xbf16>, vector<128x128xbf16>, vector<128x128xf32> -> vector<128x128xf32>
    %118 = arith.addf %112, %117 : vector<128x128xf32>
    %c2_151 = arith.constant 2 : index
    %c0_152 = arith.constant 0 : index
    %c0_153 = arith.constant 0 : index
    %119 = vector.load %arg8[%c2_151, %c0_152, %c0_153] : memref<10x18x128xbf16, #tpu.memory_space<vmem>>, vector<8x16x128xbf16>
    %120 = vector.shape_cast %119 : vector<8x16x128xbf16> to vector<128x128xbf16>
    %c2_154 = arith.constant 2 : index
    %c0_155 = arith.constant 0 : index
    %c0_156 = arith.constant 0 : index
    %c0_157 = arith.constant 0 : index
    %121 = vector.load %arg5[%c2_154, %c0_155, %c0_156, %c0_157] : memref<3x3x128x128xbf16, #tpu.memory_space<vmem>>, vector<1x1x128x128xbf16>
    %122 = vector.shape_cast %121 : vector<1x1x128x128xbf16> to vector<128x128xbf16>
    %cst_158 = arith.constant dense<0.000000e+00> : vector<128x128xf32>
    %123 = tpu.matmul %120, %122, %cst_158 {dimension_numbers = #tpu.dot_dimension_numbers<[1], [0], [0], [1], [0, 0, 1, 1], [], []>} : vector<128x128xbf16>, vector<128x128xbf16>, vector<128x128xf32> -> vector<128x128xf32>
    %124 = arith.addf %118, %123 : vector<128x128xf32>
    %c2_159 = arith.constant 2 : index
    %c1_160 = arith.constant 1 : index
    %c0_161 = arith.constant 0 : index
    %125 = vector.load %arg8[%c2_159, %c1_160, %c0_161] : memref<10x18x128xbf16, #tpu.memory_space<vmem>>, vector<8x16x128xbf16>
    %126 = vector.shape_cast %125 : vector<8x16x128xbf16> to vector<128x128xbf16>
    %c2_162 = arith.constant 2 : index
    %c1_163 = arith.constant 1 : index
    %c0_164 = arith.constant 0 : index
    %c0_165 = arith.constant 0 : index
    %127 = vector.load %arg5[%c2_162, %c1_163, %c0_164, %c0_165] : memref<3x3x128x128xbf16, #tpu.memory_space<vmem>>, vector<1x1x128x128xbf16>
    %128 = vector.shape_cast %127 : vector<1x1x128x128xbf16> to vector<128x128xbf16>
    %cst_166 = arith.constant dense<0.000000e+00> : vector<128x128xf32>
    %129 = tpu.matmul %126, %128, %cst_166 {dimension_numbers = #tpu.dot_dimension_numbers<[1], [0], [0], [1], [0, 0, 1, 1], [], []>} : vector<128x128xbf16>, vector<128x128xbf16>, vector<128x128xf32> -> vector<128x128xf32>
    %130 = arith.addf %124, %129 : vector<128x128xf32>
    %c2_167 = arith.constant 2 : index
    %c2_168 = arith.constant 2 : index
    %c0_169 = arith.constant 0 : index
    %131 = vector.load %arg8[%c2_167, %c2_168, %c0_169] : memref<10x18x128xbf16, #tpu.memory_space<vmem>>, vector<8x16x128xbf16>
    %132 = vector.shape_cast %131 : vector<8x16x128xbf16> to vector<128x128xbf16>
    %c2_170 = arith.constant 2 : index
    %c2_171 = arith.constant 2 : index
    %c0_172 = arith.constant 0 : index
    %c0_173 = arith.constant 0 : index
    %133 = vector.load %arg5[%c2_170, %c2_171, %c0_172, %c0_173] : memref<3x3x128x128xbf16, #tpu.memory_space<vmem>>, vector<1x1x128x128xbf16>
    %134 = vector.shape_cast %133 : vector<1x1x128x128xbf16> to vector<128x128xbf16>
    %cst_174 = arith.constant dense<0.000000e+00> : vector<128x128xf32>
    %135 = tpu.matmul %132, %134, %cst_174 {dimension_numbers = #tpu.dot_dimension_numbers<[1], [0], [0], [1], [0, 0, 1, 1], [], []>} : vector<128x128xbf16>, vector<128x128xbf16>, vector<128x128xf32> -> vector<128x128xf32>
    %136 = arith.addf %130, %135 : vector<128x128xf32>
    %c0_175 = arith.constant 0 : index
    %c0_176 = arith.constant 0 : index
    %c2_177 = arith.constant 2 : index
    %c1_178 = arith.constant 1 : index
    %c0_179 = arith.constant 0 : index
    %137 = vector.load %arg2[%c0_175, %c0_176, %c2_177, %c1_178, %c0_179] : memref<1x1x12x18x128xbf16, #tpu.memory_space<vmem>>, vector<1x1x8x16x128xbf16>
    %138 = vector.shape_cast %137 : vector<1x1x8x16x128xbf16> to vector<8x16x128xbf16>
    %139 = vector.shape_cast %138 : vector<8x16x128xbf16> to vector<128x128xbf16>
    %c0_180 = arith.constant 0 : index
    %c0_181 = arith.constant 0 : index
    %140 = vector.load %arg6[%c0_180, %c0_181] : memref<1x128xf32, #tpu.memory_space<vmem>>, vector<1x128xf32>
    %141 = vector.broadcast %140 : vector<1x128xf32> to vector<128x128xf32>
    %142 = arith.addf %136, %141 : vector<128x128xf32>
    %143 = arith.extf %139 : vector<128x128xbf16> to vector<128x128xf32>
    %144 = arith.addf %142, %143 : vector<128x128xf32>
    %145 = vector.shape_cast %144 : vector<128x128xf32> to vector<8x16x128xf32>
    %c0_182 = arith.constant 0 : index
    %c0_183 = arith.constant 0 : index
    %c0_184 = arith.constant 0 : index
    %c0_185 = arith.constant 0 : index
    %146 = vector.load %arg7[%c0_182, %c0_183, %c0_184, %c0_185] : memref<1x8x16x128xf32, #tpu.memory_space<vmem>>, vector<1x8x16x128xf32>
    %147 = vector.shape_cast %146 : vector<1x8x16x128xf32> to vector<8x16x128xf32>
    %148 = vector.shape_cast %145 : vector<8x16x128xf32> to vector<1x8x16x128xf32>
    tpu.vector_store %arg7[%c0_182, %c0_183, %c0_184, %c0_185], %148 {strides = array<i32>} : memref<1x8x16x128xf32, #tpu.memory_space<vmem>>, vector<1x8x16x128xf32>,
    return
  }
  func.func @transform_0(%arg0: i32, %arg1: i32) -> (i32, i32, i32, i32, i32) {
    %c0_i32 = arith.constant 0 : i32
    %c0_i32_0 = arith.constant 0 : i32
    %c0_i32_1 = arith.constant 0 : i32
    %c0_i32_2 = arith.constant 0 : i32
    return %arg0, %arg1, %c0_i32, %c0_i32_0, %c0_i32_1 : i32, i32, i32, i32, i32
  }
  func.func @transform_1(%arg0: i32, %arg1: i32) -> (i32, i32, i32, i32) {
    %c0_i32 = arith.constant 0 : i32
    %c0_i32_0 = arith.constant 0 : i32
    %c0_i32_1 = arith.constant 0 : i32
    %c0_i32_2 = arith.constant 0 : i32
    %c0_i32_3 = arith.constant 0 : i32
    return %c0_i32, %c0_i32_0, %c0_i32_1, %c0_i32_2 : i32, i32, i32, i32
  }
  func.func @transform_2(%arg0: i32, %arg1: i32) -> (i32, i32) {
    %c0_i32 = arith.constant 0 : i32
    %c0_i32_0 = arith.constant 0 : i32
    %c0_i32_1 = arith.constant 0 : i32
    return %c0_i32, %c0_i32_0 : i32, i32
  }
  func.func @transform_3(%arg0: i32, %arg1: i32) -> (i32, i32, i32, i32) {
    %c0_i32 = arith.constant 0 : i32
    %c0_i32_0 = arith.constant 0 : i32
    %c0_i32_1 = arith.constant 0 : i32
    %c0_i32_2 = arith.constant 0 : i32
    %c0_i32_3 = arith.constant 0 : i32
    return %c0_i32, %c0_i32_0, %c0_i32_1, %c0_i32_2 : i32, i32, i32, i32
  }
  func.func @transform_4(%arg0: i32, %arg1: i32) -> (i32, i32) {
    %c0_i32 = arith.constant 0 : i32
    %c0_i32_0 = arith.constant 0 : i32
    %c0_i32_1 = arith.constant 0 : i32
    return %c0_i32, %c0_i32_0 : i32, i32
  }
  func.func @transform_5(%arg0: i32, %arg1: i32) -> (i32, i32, i32, i32) {
    %c0_i32 = arith.constant 0 : i32
    %c0_i32_0 = arith.constant 0 : i32
    %c0_i32_1 = arith.constant 0 : i32
    return %arg0, %arg1, %c0_i32, %c0_i32_0 : i32, i32, i32, i32
  }
}

</mosaic_0001>

<bundles_post_ra>
// kernel: resblock_forward.1
= control target key start
LH: loop header
LB: loop body
LE: loop exit
PB: predicated region body
PF: predicated region fallthrough
CT: control target
= control target key end

     0   :  { %s7946_s18 = smov 0   ;;  %s7948_s19 = smov 0   ;;  %s10039_s0 = inlined_call_operand.vmem [shape: bf16[2,2,12,18,128], index: 0, kind: input, shape index: {}]   ;;  %s10040_s1 = inlined_call_operand.vmem [shape: bf16[3,3,128,128], index: 1, kind: input, shape index: {}]   ;;  %s10041_s2 = inlined_call_operand.vmem [shape: f32[1,128], index: 2, kind: input, shape index: {}]   ;;  %s10042_s3 = inlined_call_operand.vmem [shape: bf16[3,3,128,128], index: 3, kind: input, shape index: {}]   ;;  %s10043_s4 = inlined_call_operand.vmem [shape: f32[1,128], index: 4, kind: input, shape index: {}]   ;;  %s10044_s5 = inlined_call_operand.vmem [shape: f32[2,16,16,128], index: 5, kind: output, shape index: {}]  }
   0x1   :  { %s7950_s20 = smov 0   ;;  %s7952_s21 = smov 0  }
   0x2   :  { %s7954_s22 = smov 0  }
   0x3 LB: > { %s24_s23 = sadd.s32 1, %s7904_s20  ;;  %s27_s24 = sadd.s32 1, %s7908_s21  ;;  %s7912_s22 = sphi %s7954_s22, %s15_s22   ;;  %s7908_s21 = sphi %s7952_s21, %s10075_s21   ;;  %s7904_s20 = sphi %s7950_s20, %s10074_s20   ;;  %s7900_s19 = sphi %s7948_s19, %s10073_s19   ;;  %s7896_s18 = sphi %s7946_s18, %s10072_s18  }
   0x4   : > { %p25_p0 = scmp.ge.s32.totalorder %s24_s23, 2  ;;  %p6350_p1 = scmp.ge.s32.totalorder %s7912_s22, 1 }
   0x5   : > { %p207_p2 = scmp.lt.s32.totalorder %s7912_s22, 5 }
   0x6   : > { %s10077_s23 = smov (%p25_p0, %s24_s23), 0  ;;  %s10079_s24 = smov (!%p25_p0, %s27_s24), %s7908_s21 }
   0x7   : > { %p208_p3 = pnand %p6350_p1, %p207_p2  ;;  %p29_p4 = scmp.ge.s32.totalorder %s10079_s24, 2 }
   0x9   : > { %s10081_s24 = smov (%p29_p4, %s10079_s24), 0  ;;  %211 = sbr.rel (%p208_p3) target bundleno = 1282 (0x502), region = 40 }
   0xe   : > { %v7631_v0 = vld [vmem:[%s10040_s1 + $0x78] sm:$0xff]  ;;  %p244_p5 = scmp.lt.s32.totalorder %s7900_s19, 1  ;;  %p246_p6 = scmp.lt.s32.totalorder %s7896_s18, 1  ;;  %v7630_v2 = vld [vmem:[%s10040_s1 + $0x70] sm:$0xff]  ;;  %v7629_v5 = vld [vmem:[%s10040_s1 + $0x68] sm:$0xff]  ;;  %vm915_vm3 = vcmask 1042432  }
   0xf   : > { %v7623_v1 = vld [vmem:[%s10040_s1 + $0x38] sm:$0xff]  ;;  %s6352_s29 = sshll.u32 %s7896_s18, 3  ;;  %659 = vmatpush.bf16.msra.mxu0 %v7631_v0  ;;  %v7622_v3 = vld [vmem:[%s10040_s1 + $0x30] sm:$0xff]  ;;  %v7621_v6 = vld [vmem:[%s10040_s1 + $0x28] sm:$0xff]  ;;  %vm311_vm0 = vsmask.f32 3328 }
  0x10   : > { %826 = vmatpush.bf16.msra.mxu1 %v7623_v1  ;;  %s10083_s19 = smov (!%p244_p5, %s7900_s19), 1  ;;  %7804 = vmatpush.bf16.msra.mxu3 %v7623_v1  ;;  %p256_p7 = scmp.lt.s32.totalorder %s6352_s29, 15  ;;  %v7996_v4 = vld [vmem:[%s10040_s1 + $0xb8] sm:$0xff]  ;;  %v7628_v7 = vld [vmem:[%s10040_s1 + $0x60] sm:$0xff]  ;;  %vm312_vm1 = vsmask.f32 7440 }
  0x11   : > { %s247_s9 = scalar_select %p246_p6, %s7896_s18, 1  ;;  %7812 = vmatpush.bf16.msra.mxu2 %v7996_v4  ;;  %v7620_v8 = vld [vmem:[%s10040_s1 + $0x20] sm:$0xff]  ;;  %v7627_v20 = vld [vmem:[%s10040_s1 + $0x58] sm:$0xff]  ;;  %v8041_v26 = vld [vmem:[%s10040_s1 + $0xb0] sm:$0xff]  ;;  %vm916_vm4 = vcmask 1046532   ;;  %vm3385_vm6 = vcmask 1043456  }
  0x12   : > { %s7821_s10 = smul.u32 72, %s10083_s19  ;;  %s6354_s12 = sshll.u32 %s10083_s19, 5  ;;  %v7619_v21 = vld [vmem:[%s10040_s1 + $0x18] sm:$0xff]  ;;  %v7626_v27 = vld [vmem:[%s10040_s1 + $0x50] sm:$0xff]  ;;  %vm8049_vm2 = vmor %vm311_vm0, %vm312_vm1  ;;  %vm3386_vm7 = vsmask.f32 7938 }
  0x13   : > { %s7820_s11 = smul.u32 36, %s247_s9  ;;  %660 = vmatpush.bf16.msra.mxu0 %v7630_v2  ;;  %s10085_s29 = smov (!%p256_p7, %s6352_s29), 15  ;;  %v7618_v28 = vld [vmem:[%s10040_s1 + $0x10] sm:$0xff]  ;;  %v8060_v34 = vld [vmem:[%s10040_s1 + $0xa8] sm:$0xff]  ;;  %v8078_v43 = vld [vmem:[%s10040_s1 + $0xa0] sm:$0xff]  ;;  %vm3392_vm10 = vcmask 1040384  }
  0x14   : > { %827 = vmatpush.bf16.msra.mxu1 %v7622_v3  ;;  %7805 = vmatpush.bf16.msra.mxu3 %v7622_v3  ;;  %s6353_s27 = sshll.u32 %s10085_s29, 1  ;;  %v7625_v37 = vld [vmem:[%s10040_s1 + $0x48] sm:$0xff]  ;;  %v7624_v48 = vld [vmem:[%s10040_s1 + $0x40] sm:$0xff]  ;;  %v7657_v54 = vld [vmem:[%s10040_s1 + $0xf8] sm:$0xff]  ;;  %vm3182_vm9 = vsmask.f32 256 }
  0x15   : > { %s250_s26 = sadd.s32 %s7821_s10, %s7820_s11  ;;  %s260_s9 = sadd.s32 %s6354_s12, %s6353_s27  ;;  %7813 = vmatpush.bf16.msra.mxu2 %v8041_v26  ;;  %v7617_v38 = vld [vmem:[%s10040_s1 + $0x8] sm:$0xff]  ;;  %v7616_v49 = vld [vmem:[%s10040_s1] sm:$0xff]  ;;  %v8096_v55 = vld [vmem:[%s10040_s1 + $0x98] sm:$0xff]  ;;  %vm3183_vm11 = vsmask.f32 4368 }
  0x16   : > { %s6351_s19 = sshll.u32 %s250_s26, 2  ;;  %s6355_s29 = sshll.u32 %s260_s9, 3  ;;  %v7656_v62 = vld [vmem:[%s10040_s1 + $0xf0] sm:$0xff]  ;;  %vm8134_vm5 = vmor %vm915_vm3, %vm916_vm4 }
  0x17   : > { %s8011_s8 = scalar_lea.vmem %s10039_s0, %s6351_s19  ;;  %661 = vmatpush.bf16.msra.mxu0 %v7629_v5  ;;  %s8023_s15 = scalar_lea.vmem %s10044_s5, %s6355_s29  ;;  %v8110_v0 = vld [vmem:[%s10040_s1 + $0x90] sm:$0xff]  ;;  %vm9172_vm8 = vmand %vm3385_vm6, %vm3386_vm7 }
  0x18   : > { %828 = vmatpush.bf16.msra.mxu1 %v7621_v6  ;;  %v265_v9 = vld [vmem:[%s8011_s8] sm:$0xf]  ;;  %v8018_v10 = vld [vmem:[%s8011_s8 + $0x4] sm:$0xf]  ;;  %7806 = vmatpush.bf16.msra.mxu3 %v7621_v6  ;;  %v8026_v11 = vld [vmem:[%s8011_s8 + $0x8] sm:$0x1] }
  0x19   : > { %v315_v12 = vshrl.u32 %v265_v9, 16  ;;  %v318_v13 = vshll.u32 %v265_v9, 16  ;;  %v324_v14 = vshll.u32 %v8018_v10, 16  ;;  %v328_v15 = vshrl.u32 %v8018_v10, 16  ;;  %v267_v25 = vld [vmem:[%s8011_s8 + $0xc] sm:$0xf]  ;;  %7814 = vmatpush.bf16.msra.mxu2 %v8060_v34  ;;  %vm9187_vm12 = vmand %vm3392_vm10, %vm3182_vm9 }
  0x1a   : > { %v334_v22 = vshll.u32 %v8026_v11, 16  ;;  %v8054_v33 = vld [vmem:[%s8011_s8 + $0x10] sm:$0xf]  ;;  %v339_v35 = vshrl.u32 %v267_v25, 16  ;;  %v342_v36 = vshll.u32 %v267_v25, 16  ;;  %v7606_v57 = vld [vmem:[%s8011_s8] sm:$0xff]  ;;  %vm9195_vm13 = vmor %vm3182_vm9, %vm3183_vm11 }
  0x1b   : > { %v317_v16 = vrot.slane %v315_v12, 4  ;;  %v320_v17 = vrot.slane %v318_v13, 5  ;;  %v326_v18 = vrot.slane %v324_v14, 5  ;;  %v330_v19 = vrot.slane %v328_v15, 4  ;;  %662 = vmatpush.bf16.msra.mxu0 %v7628_v7  ;;  %v8087_v52 = vld [vmem:[%s8011_s8 + $0x14] sm:$0x1]  ;;  %vm9221_vm14 = vmand %vm3392_vm10, %vm3386_vm7 }
  0x1c   : > { %829 = vmatpush.bf16.msra.mxu1 %v7620_v8  ;;  %7807 = vmatpush.bf16.msra.mxu3 %v7620_v8  ;;  %v336_v31 = vrot.slane %v334_v22, 5  ;;  %v348_v41 = vshll.u32 %v8054_v33, 16  ;;  %v352_v42 = vshrl.u32 %v8054_v33, 16  ;;  %v341_v44 = vrot.slane %v339_v35, 4  ;;  %v7613_v58 = vld [vmem:[%s8011_s8 + $0x54] sm:$0xff]  ;;  %v8131_v12 = vld [vmem:[%s10040_s1 + $0x88] sm:$0xff] }
  0x1d   : > { %v321_v23 = vor.u32 %v320_v17, %v317_v16  ;;  %v331_v24 = vor.u32 %v330_v19, %v326_v18  ;;  %v344_v45 = vrot.slane %v342_v36, 5  ;;  %7815 = vmatpush.bf16.msra.mxu2 %v8078_v43  ;;  %v358_v60 = vshll.u32 %v8087_v52, 16  ;;  %v269_v63 = vld [vmem:[%s8011_s8 + $0x18] sm:$0xf]  ;;  %v8113_v3 = vld [vmem:[%s8011_s8 + $0x1c] sm:$0xf] }
  0x1e   : > { %v350_v50 = vrot.slane %v348_v41, 5  ;;  %v354_v51 = vrot.slane %v352_v42, 4  ;;  %v363_v5 = vshrl.u32 %v269_v63, 16  ;;  %v8120_v6 = vld [vmem:[%s8011_s8 + $0x28] sm:$0xf]  ;;  %v366_v9 = vshll.u32 %v269_v63, 16 }
  0x1f   : > { %663 = vmatpush.bf16.msra.mxu0 %v7627_v20  ;;  %v322_v29 = vrot.slane %v321_v23, 4  ;;  %v332_v30 = vrot.slane %v331_v24, 4  ;;  %v345_v53 = vor.u32 %v344_v45, %v341_v44  ;;  %v360_v2 = vrot.slane %v358_v60, 5  ;;  %v8123_v7 = vld [vmem:[%s8011_s8 + $0x2c] sm:$0x1]  ;;  %v7654_v24 = vld [vmem:[%s10040_s1 + $0xe0] sm:$0xff] }
  0x20   : > { %830 = vmatpush.bf16.msra.mxu1 %v7619_v21  ;;  %7808 = vmatpush.bf16.msra.mxu3 %v7619_v21  ;;  %v355_v59 = vor.u32 %v354_v51, %v350_v50  ;;  %v888_v13 = vld [vmem:[%s8011_s8 + $0x24] sm:$0xe]  ;;  %v941_v15 = vrot.slane %v8120_v6, 5  ;;  %v944_v16 = vrot.slane %v8123_v7, 5  ;;  %v372_v17 = vshll.u32 %v8113_v3, 16  ;;  %p7042_p8 = scmp.ne.s32.totalorder %s7896_s18, 0 }
  0x21   : > { %v327_v39 = vsel %vm8049_vm2, %v322_v29, %v326_v18  ;;  %v337_v40 = vsel %vm8049_vm2, %v332_v30, %v336_v31  ;;  %v346_v61 = vrot.slane %v345_v53, 4  ;;  %7816 = vmatpush.bf16.msra.mxu2 %v8096_v55  ;;  %v376_v18 = vshrl.u32 %v8113_v3, 16  ;;  %v8157_v36 = vld [vmem:[%s8011_s8 + $0x20] sm:$0x1]  ;;  %v8175_v51 = vld [vmem:[%s8011_s8 + $0x38] sm:$0x1] }
  0x22   : > { %v571_v46 = vunpack.c.l.b16 %v327_v39  ;;  %v572_v47 = vunpack.c.l.b16 %v337_v40  ;;  %v356_v1 = vrot.slane %v355_v59, 4  ;;  %v6479_v19 = vrot.slane %v888_v13, 9  ;;  %v7607_v40 = vld [vmem:[%s8011_s8 + $0xc] sm:$0xff]  ;;  %v7614_v45 = vld [vmem:[%s8011_s8 + $0x60] sm:$0xff] }
  0x23   : > { %664 = vmatpush.bf16.msra.mxu0 %v7626_v27  ;;  %v351_v8 = vsel %vm8049_vm2, %v346_v61, %v350_v50  ;;  %v943_v21 = vrot.slane %v941_v15, 4  ;;  %v365_v25 = vrot.slane %v363_v5, 4  ;;  %v7632_v27 = vld [vmem:[%s10040_s1 + $0x80] sm:$0xff]  ;;  %v374_v31 = vrot.slane %v372_v17, 5  ;;  %v8172_v50 = vld [vmem:[%s8011_s8 + $0x34] sm:$0xf] }
  0x24   : > { %831 = vmatpush.bf16.msra.mxu1 %v7618_v28  ;;  %7809 = vmatpush.bf16.msra.mxu3 %v7618_v28  ;;  %v591_v56 = vpack.c.b16 %v572_v47, %v571_v46  ;;  %v361_v20 = vsel %vm8049_vm2, %v356_v1, %v360_v2  ;;  %v573_v22 = vunpack.c.l.b16 %v351_v8  ;;  %v942_v23 = vsel %vm8134_vm5, %v6479_v19, %v941_v15  ;;  %v889_v53 = vld [vmem:[%s8011_s8 + $0x30] sm:$0xe] }
  0x25   : > { %7817 = vmatpush.bf16.msra.mxu2 %v8110_v0  ;;  %v945_v28 = vsel %vm8134_vm5, %v943_v21, %v944_v16  ;;  %v1011_v29 = vunpack.c.l.b16 %v942_v23  ;;  %v574_v30 = vunpack.c.l.b16 %v361_v20  ;;  %v382_v44 = vshll.u32 %v8157_v36, 16  ;;  %v7615_v23 = vld [vmem:[%s8011_s8 + $0x6c] sm:$0xff] }
  0x26   : > { %v1012_v35 = vunpack.c.l.b16 %v945_v28  ;;  %v400_v61 = vshrl.u32 %v8120_v6, 16  ;;  %v406_v20 = vshll.u32 %v8123_v7, 16  ;;  %v273_v28 = vld [vmem:[%s8011_s8 + $0x30] sm:$0xf] }
  0x27   : > { %665 = vmatpush.bf16.msra.mxu0 %v7625_v37  ;;  %v592_v39 = vpack.c.b16 %v574_v30, %v573_v22  ;;  %v7608_v22 = vld [vmem:[%s8011_s8 + $0x18] sm:$0xff] }
  0x28   : > { %832 = vmatpush.bf16.msra.mxu1 %v7617_v38  ;;  %7810 = vmatpush.bf16.msra.mxu3 %v7617_v38  ;;  %v1028_v37 = vpack.c.b16 %v1012_v35, %v1011_v29  ;;  %v7653_v38 = vld [vmem:[%s10040_s1 + $0xd8] sm:$0xff]  ;;  %v402_v13 = vrot.slane %v400_v61, 4  ;;  %v8204_v29 = vld [vmem:[%s8011_s8 + $0x44] sm:$0x1]  ;;  %v7640_v61 = vld [vmem:[%s8011_s8 + $0xc] sm:$0xff] }
  0x29   : > { %7818 = vmatpush.bf16.msra.mxu2 %v8131_v12  ;;  %v890_v30 = vld [vmem:[%s8011_s8 + $0x3c] sm:$0xe]  ;;  %v958_v35 = vrot.slane %v8204_v29, 5 }
  0x2b   : > { %666 = vmatpush.bf16.msra.mxu0 %v7624_v48  ;;  %v384_v48 = vrot.slane %v382_v44, 5 }
  0x2c   : > { %833 = vmatpush.bf16.msra.mxu1 %v7616_v49  ;;  %7811 = vmatpush.bf16.msra.mxu3 %v7616_v49  ;;  %v271_v49 = vld [vmem:[%s8011_s8 + $0x24] sm:$0xf] }
  0x2d   : > { %7819 = vmatpush.bf16.msra.mxu2 %v7632_v27  ;;  %v387_v59 = vshrl.u32 %v271_v49, 16  ;;  %v390_v60 = vshll.u32 %v271_v49, 16 }
  0x2e   : > { %667 = vmatmul.bf16.vlgmr.msra.gmra.mxu0 %v591_v56  ;;  %v948_v56 = vrot.slane %v8172_v50, 5 }
  0x2f   : > { %1093 = vmatpush.bf16.msrb.mxu0 %v7996_v4  ;;  %834 = vmatmul.bf16.vlgmr.msra.gmra.mxu1 %v7606_v57  ;;  %v7655_v4 = vld [vmem:[%s10040_s1 + $0xe8] sm:$0xff]  ;;  %v951_v57 = vrot.slane %v8175_v51, 5  ;;  %v389_v8 = vrot.slane %v387_v59, 4 }
  0x30   : > { %1318 = vmatpush.bf16.msrb.mxu3 %v7657_v54  ;;  %1116 = vmatmul.bf16.vlgmr.msra.gmra.mxu2 %v1028_v37  ;;  %v396_v54 = vshll.u32 %v8120_v6, 16  ;;  %v950_v63 = vrot.slane %v948_v56, 4  ;;  %v7650_v6 = vld [vmem:[%s10040_s1 + $0xc0] sm:$0xff] }
  0x31   : > { %869 = vmatmul.bf16.vlgmr.msra.gmra.mxu3 %v7613_v58  ;;  %v7651_v58 = vld [vmem:[%s10040_s1 + $0xc8] sm:$0xff] }
  0x33   : > { %1094 = vmatpush.bf16.msrb.mxu0 %v8041_v26  ;;  %v368_v26 = vrot.slane %v366_v9, 5  ;;  %v392_v9 = vrot.slane %v390_v60, 5  ;;  %v430_v60 = vshll.u32 %v8175_v51, 16 }
  0x34   : > { %1319 = vmatpush.bf16.msrb.mxu3 %v7656_v62 }
  0x35   : > { %v369_v41 = vor.u32 %v368_v26, %v365_v25  ;;  %v408_v26 = vrot.slane %v406_v20, 5 }
  0x37   : > { %1095 = vmatpush.bf16.msrb.mxu0 %v8060_v34  ;;  %v378_v34 = vrot.slane %v376_v18, 4  ;;  %v370_v46 = vrot.slane %v369_v41, 4  ;;  %v424_v41 = vshrl.u32 %v8172_v50, 16 }
  0x38   : > { %1320 = vmatpush.bf16.msrb.mxu3 %v7655_v4  ;;  %v952_v4 = vsel %vm8134_vm5, %v950_v63, %v951_v57  ;;  %v7609_v57 = vld [vmem:[%s8011_s8 + $0x24] sm:$0xff] }
  0x39   : > { %v379_v42 = vor.u32 %v378_v34, %v374_v31  ;;  %v375_v1 = vsel %vm8049_vm2, %v370_v46, %v374_v31  ;;  %v1014_v15 = vunpack.c.l.b16 %v952_v4  ;;  %v6481_v31 = vrot.slane %v890_v30, 9  ;;  %v8224_v4 = vld [vmem:[%s8011_s8 + $0x50] sm:$0x1] }
  0x3a   : > { %v575_v16 = vunpack.c.l.b16 %v375_v1  ;;  %v432_v1 = vrot.slane %v430_v60, 5 }
  0x3b   : > { %1096 = vmatpush.bf16.msrb.mxu0 %v8078_v43  ;;  %v7652_v43 = vld [vmem:[%s10040_s1 + $0xd0] sm:$0xff]  ;;  %v380_v47 = vrot.slane %v379_v42, 4 }
  0x3c   : > { %1321 = vmatpush.bf16.msrb.mxu3 %v7654_v24 }
  0x3d   : > { %v385_v2 = vsel %vm8049_vm2, %v380_v47, %v384_v48 }
  0x3e   : > { %672 = vmatmul.bf16.gmra.mxu0 %v592_v39  ;;  %v576_v17 = vunpack.c.l.b16 %v385_v2  ;;  %v420_v39 = vshll.u32 %v8172_v50, 16  ;;  %v275_v2 = vld [vmem:[%s8011_s8 + $0x3c] sm:$0xf] }
  0x3f   : > { %1097 = vmatpush.bf16.msrb.mxu0 %v8096_v55  ;;  %839 = vmatmul.bf16.gmra.mxu1 %v7607_v40  ;;  %v6480_v55 = vrot.slane %v889_v53, 9  ;;  %v414_v40 = vshll.u32 %v273_v28, 16  ;;  %v438_v51 = vshll.u32 %v275_v2, 16 }
  0x40   : > { %1322 = vmatpush.bf16.msrb.mxu3 %v7653_v38  ;;  %v593_v21 = vpack.c.b16 %v576_v17, %v575_v16  ;;  %v411_v38 = vshrl.u32 %v273_v28, 16 }
  0x41   : > { %874 = vmatmul.bf16.gmra.mxu3 %v7614_v45  ;;  %v949_v62 = vsel %vm8134_vm5, %v6480_v55, %v948_v56  ;;  %v416_v53 = vrot.slane %v414_v40, 5  ;;  %v426_v55 = vrot.slane %v424_v41, 4 }
  0x42   : > { %v1013_v5 = vunpack.c.l.b16 %v949_v62  ;;  %v413_v49 = vrot.slane %v411_v38, 4  ;;  %v7641_v38 = vld [vmem:[%s8011_s8 + $0x18] sm:$0xff] }
  0x43   : > { %1098 = vmatpush.bf16.msrb.mxu0 %v8110_v0  ;;  %v398_v0 = vrot.slane %v396_v54, 5  ;;  %v422_v54 = vrot.slane %v420_v39, 5 }
  0x44   : > { %1323 = vmatpush.bf16.msrb.mxu3 %v7652_v43  ;;  %v1029_v18 = vpack.c.b16 %v1014_v15, %v1013_v5  ;;  %v891_v5 = vld [vmem:[%s8011_s8 + $0x48] sm:$0xe]  ;;  %v435_v15 = vshrl.u32 %v275_v2, 16 }
  0x45   : > { %v403_v19 = vor.u32 %v402_v13, %v398_v0  ;;  %v427_v59 = vor.u32 %v426_v55, %v422_v54  ;;  %v965_v13 = vrot.slane %v8224_v4, 5 }
  0x46   : > { %1121 = vmatmul.bf16.gmra.mxu2 %v1029_v18 }
  0x47   : > { %1099 = vmatpush.bf16.msrb.mxu0 %v8131_v12  ;;  %v393_v12 = vor.u32 %v392_v9, %v389_v8  ;;  %v404_v25 = vrot.slane %v403_v19, 4  ;;  %v428_v63 = vrot.slane %v427_v59, 4  ;;  %v6482_v8 = vrot.slane %v891_v5, 9 }
  0x48   : > { %1324 = vmatpush.bf16.msrb.mxu3 %v7651_v58  ;;  %v417_v58 = vor.u32 %v416_v53, %v413_v49 }
  0x49   : > { %v394_v24 = vrot.slane %v393_v12, 4  ;;  %v409_v37 = vsel %vm8049_vm2, %v404_v25, %v408_v26  ;;  %v433_v19 = vsel %vm8049_vm2, %v428_v63, %v432_v1 }
  0x4a   : > { %v578_v47 = vunpack.c.l.b16 %v409_v37  ;;  %v418_v62 = vrot.slane %v417_v58, 4  ;;  %v7610_v37 = vld [vmem:[%s8011_s8 + $0x30] sm:$0xff] }
  0x4b   : > { %1100 = vmatpush.bf16.msrb.mxu0 %v7632_v27  ;;  %v276_v27 = vld [vmem:[%s8011_s8 + $0x40] sm:$0xf]  ;;  %v399_v7 = vsel %vm8049_vm2, %v394_v24, %v398_v0  ;;  %v278_v0 = vld [vmem:[%s8011_s8 + $0x4c] sm:$0xf]  ;;  %v440_v24 = vrot.slane %v438_v51, 5  ;;  %v7642_v51 = vld [vmem:[%s8011_s8 + $0x24] sm:$0xff] }
  0x4c   : > { %1325 = vmatpush.bf16.msrb.mxu3 %v7650_v6  ;;  %v955_v34 = vrot.slane %v276_v27, 5  ;;  %v577_v46 = vunpack.c.l.b16 %v399_v7  ;;  %v444_v6 = vshll.u32 %v276_v27, 16  ;;  %v962_v9 = vrot.slane %v278_v0, 5 }
  0x4d   : > { %v448_v16 = vshrl.u32 %v276_v27, 16  ;;  %v423_v12 = vsel %vm8049_vm2, %v418_v62, %v422_v54  ;;  %v580_v27 = vunpack.c.l.b16 %v433_v19  ;;  %v468_v54 = vshll.u32 %v278_v0, 16  ;;  %v282_v19 = vld [vmem:[%s8011_s8 + $0x64] sm:$0xf] }
  0x4e   : > { %677 = vmatmul.bf16.gmra.mxu0 %v593_v21  ;;  %v956_v42 = vsel %vm8134_vm5, %v6481_v31, %v955_v34  ;;  %v957_v44 = vrot.slane %v955_v34, 4  ;;  %v594_v50 = vpack.c.b16 %v578_v47, %v577_v46  ;;  %v963_v17 = vsel %vm8134_vm5, %v6482_v8, %v962_v9  ;;  %v7611_v8 = vld [vmem:[%s8011_s8 + $0x3c] sm:$0xff] }
  0x4f   : > { %844 = vmatmul.bf16.gmra.mxu1 %v7608_v22  ;;  %v1015_v43 = vunpack.c.l.b16 %v956_v42  ;;  %v964_v18 = vrot.slane %v962_v9, 4  ;;  %v446_v20 = vrot.slane %v444_v6, 5  ;;  %v1017_v22 = vunpack.c.l.b16 %v963_v17  ;;  %v277_v42 = vld [vmem:[%s8011_s8 + $0x48] sm:$0xf] }
  0x50   : > { %v959_v45 = vsel %vm8134_vm5, %v957_v44, %v958_v35  ;;  %v450_v25 = vrot.slane %v448_v16, 4  ;;  %v579_v28 = vunpack.c.l.b16 %v423_v12  ;;  %v454_v35 = vshll.u32 %v8204_v29, 16  ;;  %v280_v44 = vld [vmem:[%s8011_s8 + $0x58] sm:$0xf]  ;;  %v279_v12 = vld [vmem:[%s8011_s8 + $0x54] sm:$0xf] }
  0x51   : > { %879 = vmatmul.bf16.gmra.mxu3 %v7615_v23  ;;  %v1016_v48 = vunpack.c.l.b16 %v959_v45  ;;  %v966_v21 = vsel %vm8134_vm5, %v964_v18, %v965_v13  ;;  %v437_v23 = vrot.slane %v435_v15, 4  ;;  %v8242_v45 = vld [vmem:[%s8011_s8 + $0x5c] sm:$0x1]  ;;  %v969_v47 = vrot.slane %v280_v44, 5 }
  0x52   : > { %v1018_v26 = vunpack.c.l.b16 %v966_v21  ;;  %v451_v34 = vor.u32 %v450_v25, %v446_v20  ;;  %v595_v7 = vpack.c.b16 %v580_v27, %v579_v28  ;;  %v456_v41 = vrot.slane %v454_v35, 5  ;;  %v893_v21 = vld [vmem:[%s8011_s8 + $0x60] sm:$0xe] }
  0x53   : > { %v1030_v56 = vpack.c.b16 %v1016_v48, %v1015_v43  ;;  %v441_v31 = vor.u32 %v440_v24, %v437_v23  ;;  %v892_v43 = vld [vmem:[%s8011_s8 + $0x54] sm:$0xe]  ;;  %v972_v48 = vrot.slane %v8242_v45, 5  ;;  %v459_v53 = vshrl.u32 %v277_v42, 16 }
  0x54   : > { %v1031_v30 = vpack.c.b16 %v1018_v26, %v1017_v22  ;;  %v452_v40 = vrot.slane %v451_v34, 4  ;;  %v6483_v46 = vrot.slane %v892_v43, 9  ;;  %v462_v55 = vshll.u32 %v277_v42, 16 }
  0x55   : > { %v442_v39 = vrot.slane %v441_v31, 4  ;;  %v461_v63 = vrot.slane %v459_v53, 4  ;;  %v470_v2 = vrot.slane %v468_v54, 5  ;;  %v478_v15 = vshll.u32 %v8224_v4, 16  ;;  %v7643_v53 = vld [vmem:[%s8011_s8 + $0x30] sm:$0xff] }
  0x56   : > { %1126 = vmatmul.bf16.gmra.mxu2 %v1030_v56  ;;  %v457_v49 = vsel %vm8049_vm2, %v452_v40, %v456_v41  ;;  %v472_v56 = vshrl.u32 %v278_v0, 16  ;;  %v464_v1 = vrot.slane %v462_v55, 5  ;;  %v6484_v22 = vrot.slane %v893_v21, 9 }
  0x57   : > { %v447_v29 = vsel %vm8049_vm2, %v442_v39, %v446_v20  ;;  %v480_v18 = vrot.slane %v478_v15, 5  ;;  %v8260_v20 = vld [vmem:[%s8011_s8 + $0x68] sm:$0x1]  ;;  %v976_v23 = vrot.slane %v282_v19, 5  ;;  %v483_v25 = vshrl.u32 %v279_v12, 16 }
  0x58   : > { %v581_v60 = vunpack.c.l.b16 %v447_v29  ;;  %v474_v5 = vrot.slane %v472_v56, 4  ;;  %v465_v9 = vor.u32 %v464_v1, %v461_v63  ;;  %v979_v24 = vrot.slane %v8260_v20, 5  ;;  %v310_v1 = vld [vmem:[%s8011_s8 + $0x74] sm:$0x1] }
  0x59   : > { %v486_v26 = vshll.u32 %v279_v12, 16  ;;  %v492_v4 = vshll.u32 %v280_v44, 16  ;;  %v496_v28 = vshrl.u32 %v280_v44, 16  ;;  %v977_v27 = vsel %vm8134_vm5, %v6484_v22, %v976_v23 }
  0x5a   : > { %v475_v13 = vor.u32 %v474_v5, %v470_v2  ;;  %v466_v16 = vrot.slane %v465_v9, 4 }
  0x5b   : > { %v494_v42 = vrot.slane %v492_v4, 5  ;;  %v498_v44 = vrot.slane %v496_v28, 4 }
  0x5c   : > { %v476_v17 = vrot.slane %v475_v13, 4  ;;  %v471_v31 = vsel %vm8049_vm2, %v466_v16, %v470_v2  ;;  %v894_v2 = vld [vmem:[%s8011_s8 + $0x6c] sm:$0xe] }
  0x5d   : > { %v583_v40 = vunpack.c.l.b16 %v471_v31  ;;  %v499_v29 = vor.u32 %v498_v44, %v494_v42  ;;  %v6485_v5 = vrot.slane %v894_v2, 9 }
  0x5e   : > { %682 = vmatmul.bf16.gmra.mxu0 %v594_v50  ;;  %v970_v50 = vsel %vm8134_vm5, %v6483_v46, %v969_v47  ;;  %v481_v34 = vsel %vm8049_vm2, %v476_v17, %v480_v18 }
  0x5f   : > { %849 = vmatmul.bf16.gmra.mxu1 %v7609_v57  ;;  %v971_v57 = vrot.slane %v969_v47, 4  ;;  %v1019_v59 = vunpack.c.l.b16 %v970_v50  ;;  %v584_v41 = vunpack.c.l.b16 %v481_v34  ;;  %v500_v55 = vrot.slane %v499_v29, 4  ;;  %v281_v50 = vld [vmem:[%s8011_s8 + $0x60] sm:$0xf] }
  0x61   : > { %1326 = vmatmul.bf16.vlgmr.msrb.gmra.mxu3 %v7640_v61  ;;  %v973_v58 = vsel %vm8134_vm5, %v971_v57, %v972_v48  ;;  %v582_v61 = vunpack.c.l.b16 %v457_v49  ;;  %v597_v47 = vpack.c.b16 %v584_v41, %v583_v40  ;;  %v7612_v48 = vld [vmem:[%s8011_s8 + $0x48] sm:$0xff]  ;;  %v502_v49 = vshll.u32 %v8242_v45, 16 }
  0x62   : > { %v1020_v62 = vunpack.c.l.b16 %v973_v58  ;;  %v507_v58 = vshrl.u32 %v281_v50, 16 }
  0x63   : > { %v596_v0 = vpack.c.b16 %v582_v61, %v581_v60  ;;  %v504_v56 = vrot.slane %v502_v49, 5  ;;  %v284_v60 = vld [vmem:[%s8011_s8 + $0x70] sm:$0xf]  ;;  %v516_v61 = vshll.u32 %v282_v19, 16 }
  0x64   : > { %v1032_v6 = vpack.c.b16 %v1020_v62, %v1019_v59  ;;  %v510_v59 = vshll.u32 %v281_v50, 16  ;;  %v520_v62 = vshrl.u32 %v282_v19, 16  ;;  %v983_v63 = vrot.slane %v284_v60, 5 }
  0x65   : > { %v505_v45 = vsel %vm8049_vm2, %v500_v55, %v504_v56  ;;  %v509_v13 = vrot.slane %v507_v58, 4 }
  0x66   : > { %1131 = vmatmul.bf16.gmra.mxu2 %v1031_v30  ;;  %v978_v30 = vrot.slane %v976_v23, 4  ;;  %v586_v9 = vunpack.c.l.b16 %v505_v45  ;;  %v512_v15 = vrot.slane %v510_v59, 5  ;;  %v522_v16 = vrot.slane %v520_v62, 4  ;;  %v7664_v62 = vld [vmem:[%s10040_s1 + $0x130] sm:$0xff] }
  0x67   : > { %v984_v17 = vsel %vm8134_vm5, %v6485_v5, %v983_v63 }
  0x68   : > { %v980_v35 = vsel %vm8134_vm5, %v978_v30, %v979_v24  ;;  %v1023_v12 = vunpack.c.l.b16 %v984_v17  ;;  %v513_v23 = vor.u32 %v512_v15, %v509_v13  ;;  %v283_v30 = vld [vmem:[%s8011_s8 + $0x6c] sm:$0xf]  ;;  %v920_v13 = vrot.slane %v8018_v10, 5  ;;  %v7699_v17 = vld [vmem:[%s10040_s1 + $0x1f8] sm:$0xff]  ;;  %v7662_v10 = vld [vmem:[%s10040_s1 + $0x120] sm:$0xff] }
  0x69   : > { %v1022_v39 = vunpack.c.l.b16 %v980_v35  ;;  %v531_v35 = vshrl.u32 %v283_v30, 16  ;;  %2745 = vmatpush.bf16.msra.mxu3 %v7699_v17  ;;  %v7658_v17 = vld [vmem:[%s10040_s1 + $0x100] sm:$0xff] }
  0x6a   : > { %v514_v4 = vrot.slane %v513_v23, 4  ;;  %v7690_v23 = vld [vmem:[%s10040_s1 + $0x1b0] sm:$0xff] }
  0x6b   : > { %v533_v40 = vrot.slane %v531_v35, 4  ;;  %v7661_v35 = vld [vmem:[%s10040_s1 + $0x118] sm:$0xff] }
  0x6e   : > { %687 = vmatmul.bf16.gmra.mxu0 %v595_v7  ;;  %v1021_v7 = vunpack.c.l.b16 %v977_v27 }
  0x6f   : > { %854 = vmatmul.bf16.gmra.mxu1 %v7610_v37  ;;  %v485_v37 = vrot.slane %v483_v25, 4  ;;  %v526_v25 = vshll.u32 %v8260_v20, 16 }
  0x70   : > { %v1033_v43 = vpack.c.b16 %v1022_v39, %v1021_v7  ;;  %v534_v7 = vshll.u32 %v283_v30, 16  ;;  %v7689_v30 = vld [vmem:[%s10040_s1 + $0x1a8] sm:$0xff] }
  0x71   : > { %1331 = vmatmul.bf16.gmra.mxu3 %v7641_v38  ;;  %v488_v38 = vrot.slane %v486_v26, 5  ;;  %v7644_v26 = vld [vmem:[%s8011_s8 + $0x3c] sm:$0xff]  ;;  %v528_v27 = vrot.slane %v526_v25, 5 }
  0x72   : > { %v536_v41 = vrot.slane %v534_v7, 5  ;;  %v7697_v7 = vld [vmem:[%s10040_s1 + $0x1e8] sm:$0xff] }
  0x73   : > { %v489_v46 = vor.u32 %v488_v38, %v485_v37  ;;  %v540_v37 = vshll.u32 %v284_v60, 16  ;;  %v544_v38 = vshrl.u32 %v284_v60, 16 }
  0x74   : > { %v537_v29 = vor.u32 %v536_v41, %v533_v40  ;;  %v7696_v41 = vld [vmem:[%s10040_s1 + $0x1e0] sm:$0xff] }
  0x75   : > { %v490_v54 = vrot.slane %v489_v46, 4  ;;  %v546_v44 = vrot.slane %v544_v38, 4  ;;  %v7688_v38 = vld [vmem:[%s10040_s1 + $0x1a0] sm:$0xff] }
  0x76   : > { %1136 = vmatmul.bf16.gmra.mxu2 %v1032_v6  ;;  %v985_v6 = vrot.slane %v983_v63, 4  ;;  %v538_v55 = vrot.slane %v537_v29, 4  ;;  %v7660_v29 = vld [vmem:[%s10040_s1 + $0x110] sm:$0xff] }
  0x77   : > { %v495_v57 = vsel %vm8049_vm2, %v490_v54, %v494_v42  ;;  %v542_v42 = vrot.slane %v540_v37, 5  ;;  %v7671_v37 = vld [vmem:[%s10040_s1 + $0x168] sm:$0xff] }
  0x79   : > { %v547_v49 = vor.u32 %v546_v44, %v542_v42  ;;  %v543_v45 = vsel %vm8049_vm2, %v538_v55, %v542_v42 }
  0x7a   : > { %v589_v63 = vunpack.c.l.b16 %v543_v45  ;;  %v7686_v45 = vld [vmem:[%s10040_s1 + $0x190] sm:$0xff] }
  0x7b   : > { %v548_v56 = vrot.slane %v547_v49, 4  ;;  %v7670_v49 = vld [vmem:[%s10040_s1 + $0x160] sm:$0xff] }
  0x7e   : > { %692 = vmatmul.bf16.gmra.mxu0 %v596_v0  ;;  %v986_v0 = vrot.slane %v310_v1, 5 }
  0x7f   : > { %859 = vmatmul.bf16.gmra.mxu1 %v7611_v8  ;;  %v585_v8 = vunpack.c.l.b16 %v495_v57  ;;  %v7665_v57 = vld [vmem:[%s10040_s1 + $0x138] sm:$0xff] }
  0x80   : > { %v987_v18 = vsel %vm8134_vm5, %v985_v6, %v986_v0  ;;  %1772 = vmatpush.bf16.msra.mxu0 %v7665_v57  ;;  %v7663_v6 = vld [vmem:[%s10040_s1 + $0x128] sm:$0xff]  ;;  %v7669_v57 = vld [vmem:[%s10040_s1 + $0x158] sm:$0xff] }
  0x81   : > { %1336 = vmatmul.bf16.gmra.mxu3 %v7642_v51  ;;  %v518_v51 = vrot.slane %v516_v61, 5  ;;  %v1024_v19 = vunpack.c.l.b16 %v987_v18  ;;  %v598_v22 = vpack.c.b16 %v586_v9, %v585_v8  ;;  %v7646_v9 = vld [vmem:[%s8011_s8 + $0x54] sm:$0xff] }
  0x83   : > { %v1034_v21 = vpack.c.b16 %v1024_v19, %v1023_v12  ;;  %v523_v24 = vor.u32 %v522_v16, %v518_v51  ;;  %v519_v31 = vsel %vm8049_vm2, %v514_v4, %v518_v51  ;;  %v885_v51 = vld [vmem:[%s8011_s8] sm:$0xe]  ;;  %v7691_v16 = vld [vmem:[%s10040_s1 + $0x1b8] sm:$0xff]  ;;  %v922_v12 = vrot.slane %v920_v13, 4 }
  0x84   : > { %v587_v20 = vunpack.c.l.b16 %v519_v31  ;;  %1773 = vmatpush.bf16.msra.mxu0 %v7664_v62  ;;  %2291 = vmatpush.bf16.msrb.mxu2 %v7691_v16  ;;  %v6476_v18 = vrot.slane %v885_v51, 9  ;;  %v923_v19 = vrot.slane %v8026_v11, 5  ;;  %v7698_v11 = vld [vmem:[%s10040_s1 + $0x1f0] sm:$0xff]  ;;  %v7659_v62 = vld [vmem:[%s10040_s1 + $0x108] sm:$0xff] }
  0x85   : > { %v524_v28 = vrot.slane %v523_v24, 4  ;;  %2746 = vmatpush.bf16.msra.mxu3 %v7698_v11  ;;  %v7693_v16 = vld [vmem:[%s10040_s1 + $0x1c8] sm:$0xff] }
  0x86   : > { %1141 = vmatmul.bf16.gmra.mxu2 %v1033_v43  ;;  %v921_v4 = vsel %vm8134_vm5, %v6476_v18, %v920_v13  ;;  %v7667_v18 = vld [vmem:[%s10040_s1 + $0x148] sm:$0xff] }
  0x87   : > { %v529_v34 = vsel %vm8049_vm2, %v524_v28, %v528_v27  ;;  %v924_v28 = vsel %vm8134_vm5, %v922_v12, %v923_v19  ;;  %v7672_v27 = vld [vmem:[%s10040_s1 + $0x170] sm:$0xff]  ;;  %v1005_v31 = vunpack.c.l.b16 %v921_v4  ;;  %v7684_v12 = vld [vmem:[%s10040_s1 + $0x180] sm:$0xff] }
  0x88   : > { %v588_v39 = vunpack.c.l.b16 %v529_v34  ;;  %1774 = vmatpush.bf16.msra.mxu0 %v7663_v6  ;;  %2292 = vmatpush.bf16.msrb.mxu2 %v7690_v23  ;;  %v1006_v34 = vunpack.c.l.b16 %v924_v28  ;;  %v6643_v19 = vld [vmem:[%s8011_s8 + $0x10] sm:$0xf]  ;;  %v887_v28 = vld [vmem:[%s8011_s8 + $0x18] sm:$0xe] }
  0x89   : > { %2747 = vmatpush.bf16.msra.mxu3 %v7697_v7  ;;  %v1893_v23 = vrot.slane %v6643_v19, 5 }
  0x8a   : > { %v599_v43 = vpack.c.b16 %v588_v39, %v587_v20  ;;  %v1025_v39 = vpack.c.b16 %v1006_v34, %v1005_v31 }
  0x8c   : > { %1775 = vmatpush.bf16.msra.mxu0 %v7662_v10  ;;  %2293 = vmatpush.bf16.msrb.mxu2 %v7689_v30  ;;  %v8441_v10 = vld [vmem:[%s8011_s8 + $0x14] sm:$0x1]  ;;  %v7692_v30 = vld [vmem:[%s10040_s1 + $0x1c0] sm:$0xff] }
  0x8d   : > { %2748 = vmatpush.bf16.msra.mxu3 %v7696_v41  ;;  %v1896_v34 = vrot.slane %v8441_v10, 5 }
  0x8e   : > { %697 = vmatmul.bf16.gmra.mxu0 %v597_v47 }
  0x8f   : > { %864 = vmatmul.bf16.gmra.mxu1 %v7612_v48  ;;  %v7645_v48 = vld [vmem:[%s8011_s8 + $0x48] sm:$0xff] }
  0x90   : > { %1776 = vmatpush.bf16.msra.mxu0 %v7661_v35  ;;  %2294 = vmatpush.bf16.msrb.mxu2 %v7688_v38  ;;  %v7674_v38 = vld [vmem:[%s8011_s8 + $0x18] sm:$0xff] }
  0x91   : > { %1341 = vmatmul.bf16.gmra.mxu3 %v7643_v53  ;;  %v550_v53 = vshll.u32 %v310_v1, 16 }
  0x93   : > { %v552_v50 = vrot.slane %v550_v53, 5  ;;  %v7687_v53 = vld [vmem:[%s10040_s1 + $0x198] sm:$0xff] }
  0x94   : > { %1777 = vmatpush.bf16.msra.mxu0 %v7660_v29  ;;  %2295 = vmatpush.bf16.msrb.mxu2 %v7687_v53 }
  0x95   : > { %v553_v61 = vsel %vm8049_vm2, %v548_v56, %v552_v50  ;;  %v930_v50 = vrot.slane %v8087_v52, 5  ;;  %v7694_v52 = vld [vmem:[%s10040_s1 + $0x1d0] sm:$0xff] }
  0x96   : > { %1146 = vmatmul.bf16.gmra.mxu2 %v1034_v21  ;;  %v590_v1 = vunpack.c.l.b16 %v553_v61 }
  0x98   : > { %v600_v5 = vpack.c.b16 %v590_v1, %v589_v63  ;;  %2296 = vmatpush.bf16.msrb.mxu2 %v7686_v45  ;;  %1778 = vmatpush.bf16.msra.mxu0 %v7659_v62 }
  0x9c   : > { %1779 = vmatpush.bf16.msra.mxu0 %v7658_v17 }
  0x9e   : > { %702 = vmatmul.bf16.gmra.mxu0 %v598_v22  ;;  %v7673_v22 = vld [vmem:[%s10040_s1 + $0x178] sm:$0xff] }
  0x9f   : > { %2066 = vmatpush.bf16.msrb.mxu1 %v7673_v22  ;;  %v6720_v22 = vld [vmem:[%s8011_s8 + $0xc] sm:$0xe] }
  0xa0   : > { %v6730_v31 = vrot.slane %v6720_v22, 9 }
  0xa1   : > { %1346 = vmatmul.bf16.gmra.mxu3 %v7644_v26 }
  0xa3   : > { %2067 = vmatpush.bf16.msrb.mxu1 %v7672_v27  ;;  %v934_v27 = vrot.slane %v8113_v3, 5  ;;  %v7666_v3 = vld [vmem:[%s10040_s1 + $0x140] sm:$0xff] }
  0xa5   : > { %v936_v29 = vrot.slane %v934_v27, 4 }
  0xa7   : > { %2068 = vmatpush.bf16.msrb.mxu1 %v7671_v37  ;;  %v7648_v37 = vld [vmem:[%s8011_s8 + $0x6c] sm:$0xff] }
  0xab   : > { %v668_v46 = vpop.f32.mrf.mxu0  ;;  %2069 = vmatpush.bf16.msrb.mxu1 %v7670_v49  ;;  %v937_v49 = vrot.slane %v8157_v36, 5 }
  0xac   : > { %v835_v47 = vpop.f32.mrf.mxu1 }
  0xad   : > { %v8295_v54 = vadd.f32 %v835_v47, %v668_v46  ;;  %v886_v46 = vld [vmem:[%s8011_s8 + $0xc] sm:$0xe]  ;;  %v927_v47 = vrot.slane %v8054_v33, 5  ;;  %v7695_v33 = vld [vmem:[%s10040_s1 + $0x1d8] sm:$0xff] }
  0xae   : > { %707 = vmatmul.bf16.gmra.mxu0 %v599_v43  ;;  %v7647_v43 = vld [vmem:[%s8011_s8 + $0x60] sm:$0xff]  ;;  %v6477_v55 = vrot.slane %v886_v46, 9  ;;  %2749 = vmatpush.bf16.msra.mxu3 %v7695_v33  ;;  %v6642_v33 = vld [vmem:[%s8011_s8 + $0xc] sm:$0xf] }
  0xaf   : > { %v929_v56 = vrot.slane %v927_v47, 4  ;;  %2070 = vmatpush.bf16.msrb.mxu1 %v7669_v57  ;;  %v6897_v57 = vld [vmem:[%s8011_s8 + $0x1c] sm:$0xf]  ;;  %v1431_v62 = vshll.u32 %v6642_v33, 16 }
  0xb0   : > { %v2410_v17 = vshll.u32 %v6897_v57, 16 }
  0xb1   : > { %1351 = vmatmul.bf16.gmra.mxu3 %v7645_v48  ;;  %v931_v6 = vsel %vm8134_vm5, %v929_v56, %v930_v50  ;;  %v7707_v56 = vld [vmem:[%s10040_s1 + $0x238] sm:$0xff] }
  0xb2   : > { %2750 = vmatpush.bf16.msra.mxu3 %v7694_v52  ;;  %v1008_v51 = vunpack.c.l.b16 %v931_v6  ;;  %v6896_v50 = vld [vmem:[%s8011_s8 + $0x18] sm:$0xf]  ;;  %v1437_v6 = vshll.u32 %v6643_v19, 16 }
  0xb3   : > { %v8302_v59 = vpop.f32.mrf.mxu0  ;;  %v8333_v21 = vpop.f32.mrf.mxu2 }
  0xb4   : > { %v8300_v58 = vpop.f32.mrf.mxu3  ;;  %v8304_v60 = vpop.f32.mrf.mxu1 }
  0xb6   : > { %2751 = vmatpush.bf16.msra.mxu3 %v7693_v16  ;;  %v2404_v16 = vshll.u32 %v6896_v50, 16 }
  0xba   : > { %2752 = vmatpush.bf16.msra.mxu3 %v7692_v30  ;;  %v2406_v30 = vrot.slane %v2404_v16, 5 }
  0xbb   : > { %v673_v0 = vpop.f32.mrf.mxu0  ;;  %v8374_v40 = vpop.f32.mrf.mxu2 }
  0xbc   : > { %v8313_v2 = vpop.f32.mrf.mxu3  ;;  %v840_v8 = vpop.f32.mrf.mxu1 }
  0xbd   : > { %v8320_v15 = vadd.f32 %v840_v8, %v673_v0  ;;  %v7668_v8 = vld [vmem:[%s10040_s1 + $0x150] sm:$0xff] }
  0xbe   : > { %712 = vmatmul.bf16.gmra.mxu0 %v600_v5  ;;  %v928_v5 = vsel %vm8134_vm5, %v6477_v55, %v927_v47  ;;  %2071 = vmatpush.bf16.msrb.mxu1 %v7668_v8  ;;  %v1441_v8 = vshrl.u32 %v6643_v19, 16 }
  0xbf   : > { %v1007_v13 = vunpack.c.l.b16 %v928_v5  ;;  %v938_v5 = vsel %vm8134_vm5, %v936_v29, %v937_v49 }
  0xc0   : > { %v1010_v22 = vunpack.c.l.b16 %v938_v5  ;;  %v1443_v19 = vrot.slane %v1441_v8, 4 }
  0xc1   : > { %1356 = vmatmul.bf16.gmra.mxu3 %v7646_v9  ;;  %v7685_v9 = vld [vmem:[%s10040_s1 + $0x188] sm:$0xff]  ;;  %v1026_v4 = vpack.c.b16 %v1008_v51, %v1007_v13  ;;  %v2401_v51 = vshrl.u32 %v6896_v50, 16 }
  0xc2   : > { %2297 = vmatpush.bf16.msrb.mxu2 %v7685_v9  ;;  %2072 = vmatpush.bf16.msrb.mxu1 %v7667_v18  ;;  %v2414_v18 = vshrl.u32 %v6897_v57, 16 }
  0xc3   : > { %v8346_v25 = vpop.f32.mrf.mxu0 }
  0xc4   : > { %v8341_v24 = vpop.f32.mrf.mxu3  ;;  %v8348_v26 = vpop.f32.mrf.mxu1 }
  0xc6   : > { %2298 = vmatpush.bf16.msrb.mxu2 %v7684_v12  ;;  %2073 = vmatpush.bf16.msrb.mxu1 %v7666_v3  ;;  %v6721_v3 = vld [vmem:[%s8011_s8 + $0x18] sm:$0xe] }
  0xc7   : > { %v6731_v29 = vrot.slane %v6721_v3, 9 }
  0xc9   : > { %v8419_v0 = vpop.f32.mrf.mxu2  ;;  %2299 = vmatmul.bf16.vlgmr.msrb.gmra.mxu2 %v7674_v38 }
  0xcb   : > { %v678_v42 = vpop.f32.mrf.mxu0 }
  0xcc   : > { %v8372_v20 = vpop.f32.mrf.mxu3  ;;  %v845_v44 = vpop.f32.mrf.mxu1 }
  0xcd   : > { %v8382_v48 = vadd.f32 %v845_v44, %v678_v42  ;;  %v1894_v42 = vsel %vm8134_vm5, %v6730_v31, %v1893_v23  ;;  %v6478_v44 = vrot.slane %v887_v28, 9  ;;  %v8483_v28 = vrot.slane %v1437_v6, 5 }
  0xce   : > { %1101 = vmatmul.bf16.vlgmr.msrb.gmra.mxu0 %v1025_v39  ;;  %v1895_v39 = vrot.slane %v1893_v23, 4  ;;  %v1978_v46 = vunpack.c.l.b16 %v1894_v42  ;;  %v8485_v31 = vrot.slane %v2410_v17, 5 }
  0xcf   : > { %3039 = vmatpush.bf16.msrb.mxu0 %v7707_v56  ;;  %v935_v36 = vsel %vm8134_vm5, %v6478_v44, %v934_v27  ;;  %v2403_v27 = vrot.slane %v2401_v51, 4  ;;  %v1444_v44 = vor.u32 %v1443_v19, %v8483_v28  ;;  %v7649_v56 = vld [vmem:[%s8011_s8 + $0x78] sm:$0xff] }
  0xd0   : > { %v1009_v12 = vunpack.c.l.b16 %v935_v36 }
  0xd1   : > { %1361 = vmatmul.bf16.gmra.mxu3 %v7647_v43  ;;  %v1897_v43 = vsel %vm8134_vm5, %v1895_v39, %v1896_v34  ;;  %v8465_v53 = vpop.f32.mrf.mxu2  ;;  %v2416_v34 = vrot.slane %v2414_v18, 4  ;;  %v2407_v50 = vor.u32 %v2406_v30, %v2403_v27  ;;  %v1445_v17 = vrot.slane %v1444_v44, 4  ;;  %v6899_v30 = vld [vmem:[%s8011_s8 + $0x24] sm:$0xf] }
  0xd2   : > { %v1979_v55 = vunpack.c.l.b16 %v1897_v43  ;;  %v1027_v39 = vpack.c.b16 %v1010_v22, %v1009_v12  ;;  %v1447_v43 = vshll.u32 %v8441_v10, 16  ;;  %v6645_v10 = vld [vmem:[%s8011_s8 + $0x18] sm:$0xf] }
  0xd3   : > { %v8411_v63 = vpop.f32.mrf.mxu0  ;;  %v2417_v57 = vor.u32 %v2416_v34, %v8485_v31  ;;  %v2408_v22 = vrot.slane %v2407_v50, 4  ;;  %v1452_v19 = vshrl.u32 %v6645_v10, 16  ;;  %v1455_v27 = vshll.u32 %v6645_v10, 16 }
  0xd4   : > { %v8403_v61 = vpop.f32.mrf.mxu3  ;;  %v8413_v1 = vpop.f32.mrf.mxu1  ;;  %v1998_v45 = vpack.c.b16 %v1979_v55, %v1978_v46  ;;  %v8497_v46 = vld [vmem:[%s8011_s8 + $0x20] sm:$0x1]  ;;  %v1449_v18 = vrot.slane %v1447_v43, 5 }
  0xd5   : > { %v1457_v50 = vrot.slane %v1455_v27, 5  ;;  %v6722_v27 = vld [vmem:[%s8011_s8 + $0x24] sm:$0xe] }
  0xd6   : > { %2074 = vmatmul.bf16.vlgmr.msrb.gmra.mxu1 %v1998_v45 }
  0xdb   : > { %v683_v35 = vpop.f32.mrf.mxu0 }
  0xdc   : > { %v8444_v11 = vpop.f32.mrf.mxu3  ;;  %v850_v7 = vpop.f32.mrf.mxu1 }
  0xdd   : > { %v851_v41 = vadd.f32 %v850_v7, %v683_v35  ;;  %v6646_v35 = vld [vmem:[%s8011_s8 + $0x1c] sm:$0xf]  ;;  %v8488_v7 = vpop.f32.mrf.mxu2 }
  0xde   : > { %1106 = vmatmul.bf16.gmra.mxu0 %v1026_v4  ;;  %v1433_v4 = vrot.slane %v1431_v62, 5  ;;  %v1900_v38 = vrot.slane %v6646_v35, 5  ;;  %v1903_v62 = vrot.slane %v8497_v46, 5 }
  0xdf   : > { %v8462_v47 = vadd.f32 %v8333_v21, %v851_v41  ;;  %v1428_v21 = vshrl.u32 %v6642_v33, 16 }
  0xe0   : > { %v1902_v49 = vrot.slane %v1900_v38, 4  ;;  %v1901_v5 = vsel %vm8134_vm5, %v6731_v29, %v1900_v38  ;;  %v1465_v38 = vshrl.u32 %v6646_v35, 16 }
  0xe1   : > { %1366 = vmatmul.bf16.gmra.mxu3 %v7648_v37  ;;  %v1430_v23 = vrot.slane %v1428_v21, 4  ;;  %v6898_v37 = vld [vmem:[%s8011_s8 + $0x20] sm:$0x1]  ;;  %v7675_v21 = vld [vmem:[%s8011_s8 + $0x24] sm:$0xff]  ;;  %v1980_v51 = vunpack.c.l.b16 %v1901_v5 }
  0xe2   : > { %v2420_v45 = vshll.u32 %v6898_v37, 16  ;;  %v1904_v8 = vsel %vm8134_vm5, %v1902_v49, %v1903_v62  ;;  %2304 = vmatmul.bf16.gmra.mxu2 %v7675_v21  ;;  %v1461_v37 = vshll.u32 %v6646_v35, 16  ;;  %v2413_v35 = vsel %vm8049_vm2, %v2408_v22, %v8485_v31 }
  0xe3   : > { %v8479_v9 = vpop.f32.mrf.mxu0  ;;  %v1434_v41 = vor.u32 %v1433_v4, %v1430_v23  ;;  %v1981_v12 = vunpack.c.l.b16 %v1904_v8  ;;  %v2418_v23 = vrot.slane %v2417_v57, 4  ;;  %v1467_v62 = vrot.slane %v1465_v38, 4 }
  0xe4   : > { %v8473_v52 = vpop.f32.mrf.mxu3  ;;  %v8481_v13 = vpop.f32.mrf.mxu1  ;;  %v2422_v4 = vrot.slane %v2420_v45, 5  ;;  %v8534_v21 = vrot.slane %v1461_v37, 5  ;;  %v2657_v5 = vunpack.c.l.b16 %v2413_v35  ;;  %v8549_v37 = vld [vmem:[%s8011_s8 + $0x2c] sm:$0x1]  ;;  %v6732_v38 = vrot.slane %v6722_v27, 9 }
  0xe5   : > { %v1435_v6 = vrot.slane %v1434_v41, 4  ;;  %v1999_v34 = vpack.c.b16 %v1981_v12, %v1980_v51  ;;  %v6900_v41 = vld [vmem:[%s8011_s8 + $0x28] sm:$0xf]  ;;  %v8520_v44 = vpop.f32.mrf.mxu2 }
  0xe6   : > { %v2423_v49 = vsel %vm8049_vm2, %v2418_v23, %v2422_v4  ;;  %v2434_v57 = vshll.u32 %v6900_v41, 16  ;;  %v2438_v45 = vshrl.u32 %v6900_v41, 16  ;;  %v8537_v51 = vld [vmem:[%s8011_s8 + $0x28] sm:$0xf]  ;;  %v1468_v4 = vor.u32 %v1467_v62, %v8534_v21 }
  0xe7   : > { %2079 = vmatmul.bf16.gmra.mxu1 %v1999_v34  ;;  %v1907_v23 = vrot.slane %v8537_v51, 5 }
  0xe8   : > { %v8540_v12 = vrot.slane %v2434_v57, 5  ;;  %v2440_v22 = vrot.slane %v2438_v45, 4  ;;  %v1469_v62 = vrot.slane %v1468_v4, 4 }
  0xe9   : > { %v1909_v41 = vrot.slane %v1907_v23, 4  ;;  %v1908_v57 = vsel %vm8134_vm5, %v6732_v38, %v1907_v23  ;;  %v6903_v23 = vld [vmem:[%s8011_s8 + $0x34] sm:$0xf] }
  0xeb   : > { %v688_v33 = vpop.f32.mrf.mxu0 }
  0xec   : > { %v8492_v42 = vpop.f32.mrf.mxu3  ;;  %v855_v55 = vpop.f32.mrf.mxu1 }
  0xed   : > { %v856_v36 = vadd.f32 %v855_v55, %v688_v33  ;;  %v2425_v33 = vshrl.u32 %v6899_v30, 16  ;;  %v7706_v55 = vld [vmem:[%s10040_s1 + $0x230] sm:$0xff]  ;;  %v8556_v45 = vpop.f32.mrf.mxu2 }
  0xee   : > { %1111 = vmatmul.bf16.gmra.mxu0 %v1027_v39  ;;  %v1450_v39 = vsel %vm8049_vm2, %v1445_v17, %v1449_v18  ;;  %v6901_v18 = vld [vmem:[%s8011_s8 + $0x2c] sm:$0x1] }
  0xef   : > { %v8509_v16 = vadd.f32 %v8419_v0, %v856_v36  ;;  %v1440_v0 = vsel %vm8049_vm2, %v1435_v6, %v8483_v28  ;;  %v2428_v28 = vshll.u32 %v6899_v30, 16  ;;  %3040 = vmatpush.bf16.msrb.mxu0 %v7706_v55  ;;  %v1685_v36 = vunpack.c.l.b16 %v1450_v39 }
  0xf0   : > { %v1684_v31 = vunpack.c.l.b16 %v1440_v0  ;;  %v2658_v6 = vunpack.c.l.b16 %v2423_v49  ;;  %v2427_v10 = vrot.slane %v2425_v33, 4  ;;  %v2444_v33 = vshll.u32 %v6901_v18, 16 }
  0xf1   : > { %1371 = vmatmul.bf16.gmra.mxu3 %v7649_v56  ;;  %v1454_v56 = vrot.slane %v1452_v19, 4  ;;  %v2430_v8 = vrot.slane %v2428_v28, 5  ;;  %v1471_v19 = vshll.u32 %v8497_v46, 16  ;;  %v7676_v28 = vld [vmem:[%s8011_s8 + $0x30] sm:$0xff]  ;;  %v1910_v55 = vrot.slane %v8549_v37, 5 }
  0xf2   : > { %v1704_v34 = vpack.c.b16 %v1685_v36, %v1684_v31  ;;  %v2677_v35 = vpack.c.b16 %v2658_v6, %v2657_v5  ;;  %v2441_v46 = vor.u32 %v2440_v22, %v8540_v12  ;;  %v6648_v36 = vld [vmem:[%s8011_s8 + $0x24] sm:$0xf]  ;;  %v1982_v6 = vunpack.c.l.b16 %v1908_v57  ;;  %2309 = vmatmul.bf16.gmra.mxu2 %v7676_v28  ;;  %v6902_v22 = vld [vmem:[%s8011_s8 + $0x30] sm:$0xf] }
  0xf3   : > { %v8522_v43 = vpop.f32.mrf.mxu0  ;;  %v1458_v17 = vor.u32 %v1457_v50, %v1454_v56  ;;  %v2431_v49 = vor.u32 %v2430_v8, %v2427_v10  ;;  %v1473_v31 = vrot.slane %v1471_v19, 5  ;;  %v1911_v5 = vsel %vm8134_vm5, %v1909_v41, %v1910_v55 }
  0xf4   : > { %v8513_v3 = vpop.f32.mrf.mxu3  ;;  %v8524_v29 = vpop.f32.mrf.mxu1  ;;  %v1983_v8 = vunpack.c.l.b16 %v1911_v5  ;;  %v2446_v18 = vrot.slane %v2444_v33, 5  ;;  %v2442_v27 = vrot.slane %v2441_v46, 4  ;;  %v1476_v38 = vshrl.u32 %v6648_v36, 16 }
  0xf5   : > { %v1459_v50 = vrot.slane %v1458_v17, 4  ;;  %v2432_v17 = vrot.slane %v2431_v49, 4  ;;  %v1479_v4 = vshll.u32 %v6648_v36, 16  ;;  %v2452_v49 = vshll.u32 %v6902_v22, 16 }
  0xf6   : > { %v2000_v19 = vpack.c.b16 %v1983_v8, %v1982_v6  ;;  %v2458_v33 = vshll.u32 %v6903_v23, 16  ;;  %v2462_v28 = vshrl.u32 %v6903_v23, 16  ;;  %v2447_v46 = vsel %vm8049_vm2, %v2442_v27, %v2446_v18  ;;  %v6904_v6 = vld [vmem:[%s8011_s8 + $0x38] sm:$0x1] }
  0xf7   : > { %v1464_v41 = vsel %vm8049_vm2, %v1459_v50, %v8534_v21  ;;  %v2437_v21 = vsel %vm8049_vm2, %v2432_v17, %v8540_v12  ;;  %v1481_v57 = vrot.slane %v1479_v4, 5  ;;  %v7705_v17 = vld [vmem:[%s10040_s1 + $0x228] sm:$0xff]  ;;  %v2660_v27 = vunpack.c.l.b16 %v2447_v46  ;;  %v8593_v4 = vld [vmem:[%s8011_s8 + $0x34] sm:$0xf] }
  0xf8   : > { %2084 = vmatmul.bf16.gmra.mxu1 %v2000_v19  ;;  %v8585_v23 = vrot.slane %v2458_v33, 5  ;;  %v2464_v12 = vrot.slane %v2462_v28, 4  ;;  %v2659_v18 = vunpack.c.l.b16 %v2437_v21  ;;  %3041 = vmatpush.bf16.msrb.mxu0 %v7705_v17  ;;  %v7677_v17 = vld [vmem:[%s8011_s8 + $0x3c] sm:$0xff] }
  0xfb   : > { %v693_v0 = vpop.f32.mrf.mxu0 }
  0xfc   : > { %v8546_v30 = vpop.f32.mrf.mxu3  ;;  %v860_v39 = vpop.f32.mrf.mxu1 }
  0xfd   : > { %v861_v56 = vadd.f32 %v860_v39, %v693_v0  ;;  %v1489_v0 = vshrl.u32 %v8537_v51, 16 }
  0xfe   : > { %1780 = vmatmul.bf16.vlgmr.msra.gmra.mxu0 %v1704_v34  ;;  %v1485_v34 = vshll.u32 %v8537_v51, 16  ;;  %v1478_v51 = vrot.slane %v1476_v38, 4  ;;  %v8590_v38 = vpop.f32.mrf.mxu2 }
  0xff   : > { %v8562_v10 = vadd.f32 %v8488_v7, %v861_v56  ;;  %v1474_v7 = vsel %vm8049_vm2, %v1469_v62, %v1473_v31  ;;  %v1686_v62 = vunpack.c.l.b16 %v1464_v41  ;;  %v1491_v5 = vrot.slane %v1489_v0, 4 }
 0x100   : > { %v1687_v31 = vunpack.c.l.b16 %v1474_v7  ;;  %v8582_v36 = vrot.slane %v1485_v34, 5  ;;  %v1482_v19 = vor.u32 %v1481_v57, %v1478_v51  ;;  %v1495_v41 = vshll.u32 %v8549_v37, 16 }
 0x101   : > { %2753 = vmatmul.bf16.vlgmr.msra.gmra.mxu3 %v2677_v35  ;;  %v2449_v35 = vshrl.u32 %v6902_v22, 16  ;;  %v2454_v22 = vrot.slane %v2452_v49, 5  ;;  %v1914_v7 = vrot.slane %v8593_v4, 5  ;;  %v6723_v49 = vld [vmem:[%s8011_s8 + $0x30] sm:$0xe]  ;;  %v2678_v57 = vpack.c.b16 %v2660_v27, %v2659_v18 }
 0x102   : > { %v1705_v34 = vpack.c.b16 %v1687_v31, %v1686_v62  ;;  %v1492_v0 = vor.u32 %v1491_v5, %v8582_v36  ;;  %v6733_v21 = vrot.slane %v6723_v49, 9  ;;  %v1483_v31 = vrot.slane %v1482_v19, 4  ;;  %2314 = vmatmul.bf16.gmra.mxu2 %v7677_v17  ;;  %v6651_v19 = vld [vmem:[%s8011_s8 + $0x30] sm:$0xf] }
 0x103   : > { %v695_v55 = vpop.f32.mrf.mxu0  ;;  %v2451_v8 = vrot.slane %v2449_v35, 4  ;;  %v2468_v35 = vshll.u32 %v6904_v6, 16  ;;  %v1916_v46 = vrot.slane %v1914_v7, 4  ;;  %v1497_v5 = vrot.slane %v1495_v41, 5  ;;  %v6905_v41 = vld [vmem:[%s8011_s8 + $0x3c] sm:$0xf] }
 0x104   : > { %v8573_v39 = vpop.f32.mrf.mxu3  ;;  %v862_v56 = vpop.f32.mrf.mxu1  ;;  %v1915_v6 = vsel %vm8134_vm5, %v6733_v21, %v1914_v7  ;;  %v1503_v21 = vshll.u32 %v6651_v19, 16  ;;  %v1513_v17 = vshrl.u32 %v8593_v4, 16 }
 0x105   : > { %10052 = vst [vmem:[#allocation3_spill] sm:$0xff] %v8573_v39  ;;  %v8578_v50 = vadd.f32 %v862_v56, %v695_v55  ;;  %v2455_v28 = vor.u32 %v2454_v22, %v2451_v8  ;;  %v2465_v55 = vor.u32 %v2464_v12, %v8585_v23  ;;  %v8603_v56 = vld [vmem:[%s8011_s8 + $0x38] sm:$0x1]  ;;  %v1493_v8 = vrot.slane %v1492_v0, 4 }
 0x106   : > { %v1917_v39 = vrot.slane %v8603_v56, 5  ;;  %v2470_v22 = vrot.slane %v2468_v35, 5  ;;  %v1984_v49 = vunpack.c.l.b16 %v1915_v6  ;;  %v1137_v7 = vpop.f32.mrf.mxu2  ;;  %v1488_v0 = vsel %vm8049_vm2, %v1483_v31, %v8582_v36  ;;  %v6906_v35 = vld [vmem:[%s8011_s8 + $0x40] sm:$0xf] }
 0x107   : > { %v2456_v27 = vrot.slane %v2455_v28, 4  ;;  %v1509_v36 = vshll.u32 %v8593_v4, 16  ;;  %v2476_v31 = vshll.u32 %v6905_v41, 16  ;;  %v1688_v6 = vunpack.c.l.b16 %v1488_v0  ;;  %v8639_v4 = vld [vmem:[%s8011_s8 + $0x40] sm:$0xf] }
 0x108   : > { %v1918_v12 = vsel %vm8134_vm5, %v1916_v46, %v1917_v39  ;;  %v1498_v39 = vsel %vm8049_vm2, %v1493_v8, %v1497_v5  ;;  %v2486_v5 = vshrl.u32 %v6906_v35, 16 }
 0x109   : > { %v1689_v8 = vunpack.c.l.b16 %v1498_v39  ;;  %v6724_v39 = vld [vmem:[%s8011_s8 + $0x3c] sm:$0xe] }
 0x10b   : > { %v698_v51 = vpop.f32.mrf.mxu0  ;;  %v1706_v0 = vpack.c.b16 %v1689_v8, %v1688_v6 }
 0x10c   : > { %v8599_v33 = vpop.f32.mrf.mxu3  ;;  %v865_v37 = vpop.f32.mrf.mxu1 }
 0x10d   : > { %10053 = vst [vmem:[#allocation4_spill] sm:$0xff] %v8599_v33  ;;  %v866_v62 = vadd.f32 %v865_v37, %v698_v51  ;;  %v2466_v33 = vrot.slane %v2465_v55, 4  ;;  %v1985_v51 = vunpack.c.l.b16 %v1918_v12  ;;  %v1500_v55 = vshrl.u32 %v6651_v19, 16 }
 0x10e   : > { %1785 = vmatmul.bf16.gmra.mxu0 %v1705_v34  ;;  %v2461_v34 = vsel %vm8049_vm2, %v2456_v27, %v8585_v23  ;;  %v2482_v23 = vshll.u32 %v6906_v35, 16  ;;  %v8636_v27 = vrot.slane %v1509_v36, 5  ;;  %v2488_v35 = vrot.slane %v2486_v5, 4 }
 0x10f   : > { %v8612_v18 = vadd.f32 %v8556_v45, %v866_v62  ;;  %v2001_v37 = vpack.c.b16 %v1985_v51, %v1984_v49  ;;  %v2471_v28 = vsel %vm8049_vm2, %v2466_v33, %v2470_v22  ;;  %v2473_v62 = vshrl.u32 %v6905_v41, 16 }
 0x110   : > { %v853_v33 = vadd.f32 %v8481_v13, %v8479_v9  ;;  %v2662_v22 = vunpack.c.l.b16 %v2471_v28  ;;  %v1502_v12 = vrot.slane %v1500_v55, 4  ;;  %v1505_v49 = vrot.slane %v1503_v21, 5 }
 0x111   : > { %2758 = vmatmul.bf16.gmra.mxu3 %v2678_v57  ;;  %2089 = vmatmul.bf16.gmra.mxu1 %v2001_v37  ;;  %v1515_v51 = vrot.slane %v1513_v17, 4  ;;  %v2475_v19 = vrot.slane %v2473_v62, 4  ;;  %v6907_v37 = vld [vmem:[%s8011_s8 + $0x44] sm:$0x1]  ;;  %v2478_v41 = vrot.slane %v2476_v31, 5  ;;  %v1921_v9 = vrot.slane %v8639_v4, 5  ;;  %v8650_v31 = vpop.f32.mrf.mxu2 }
 0x112   : > { %v1159_v13 = vadd.f32 %v8374_v40, %v853_v33  ;;  %v1506_v55 = vor.u32 %v1505_v49, %v1502_v12  ;;  %v1519_v21 = vshll.u32 %v8603_v56, 16  ;;  %v6734_v36 = vrot.slane %v6724_v39, 9  ;;  %v7704_v40 = vld [vmem:[%s10040_s1 + $0x220] sm:$0xff]  ;;  %v7678_v33 = vld [vmem:[%s8011_s8 + $0x48] sm:$0xff] }
 0x113   : > { %v8630_v57 = vpop.f32.mrf.mxu0  ;;  %v2492_v5 = vshll.u32 %v6907_v37, 16  ;;  %v1923_v6 = vrot.slane %v1921_v9, 4  ;;  %3042 = vmatpush.bf16.msrb.mxu0 %v7704_v40  ;;  %2319 = vmatmul.bf16.gmra.mxu2 %v7678_v33 }
 0x114   : > { %v1342_v45 = vpop.f32.mrf.mxu3  ;;  %v1922_v12 = vsel %vm8134_vm5, %v6734_v36, %v1921_v9  ;;  %v1507_v37 = vrot.slane %v1506_v55, 4  ;;  %v6908_v36 = vld [vmem:[%s8011_s8 + $0x48] sm:$0xf]  ;;  %v1533_v55 = vshll.u32 %v8639_v4, 16 }
 0x115   : > { %v8628_v46 = vadd.f32 %v1342_v45, %v8462_v47  ;;  %v2661_v47 = vunpack.c.l.b16 %v2461_v34  ;;  %v8642_v45 = vrot.slane %v2482_v23, 5  ;;  %v1516_v23 = vor.u32 %v1515_v51, %v8636_v27 }
 0x116   : > { %v1986_v39 = vunpack.c.l.b16 %v1922_v12 }
 0x117   : > { %v2679_v28 = vpack.c.b16 %v2662_v22, %v2661_v47  ;;  %v2479_v47 = vor.u32 %v2478_v41, %v2475_v19  ;;  %v2489_v56 = vor.u32 %v2488_v35, %v8642_v45  ;;  %v8660_v22 = vld [vmem:[%s8011_s8 + $0x44] sm:$0x1]  ;;  %v1521_v19 = vrot.slane %v1519_v21, 5 }
 0x118   : > { %v1924_v49 = vrot.slane %v8660_v22, 5  ;;  %v1537_v21 = vshrl.u32 %v8639_v4, 16 }
 0x119   : > { %v2480_v35 = vrot.slane %v2479_v47, 4  ;;  %v2490_v9 = vrot.slane %v2489_v56, 4  ;;  %v2497_v47 = vshrl.u32 %v6908_v36, 16  ;;  %v2500_v56 = vshll.u32 %v6908_v36, 16 }
 0x11a   : > { %v1925_v41 = vsel %vm8134_vm5, %v1923_v6, %v1924_v49  ;;  %v858_v49 = vadd.f32 %v8524_v29, %v8522_v43 }
 0x11b   : > { %v703_v62 = vpop.f32.mrf.mxu0  ;;  %v2485_v12 = vsel %vm8049_vm2, %v2480_v35, %v8642_v45  ;;  %v8695_v45 = vrot.slane %v1533_v55, 5  ;;  %v2502_v36 = vrot.slane %v2500_v56, 5  ;;  %v6725_v55 = vld [vmem:[%s8011_s8 + $0x48] sm:$0xe] }
 0x11c   : > { %v1344_v34 = vpop.f32.mrf.mxu3  ;;  %v871_v8 = vadd.f32 %v8300_v58, %v703_v62  ;;  %v1517_v58 = vrot.slane %v1516_v23, 4  ;;  %v1987_v62 = vunpack.c.l.b16 %v1925_v41  ;;  %v1539_v41 = vrot.slane %v1537_v21, 4 }
 0x11d   : > { %v8648_v17 = vadd.f32 %v1344_v34, %v1159_v13  ;;  %v6654_v13 = vld [vmem:[%s8011_s8 + $0x3c] sm:$0xf]  ;;  %v2494_v34 = vrot.slane %v2492_v5, 5  ;;  %v2663_v35 = vunpack.c.l.b16 %v2485_v12  ;;  %v6735_v56 = vrot.slane %v6725_v55, 9 }
 0x11e   : > { %v8665_v51 = vadd.f32 %v1137_v7, %v871_v8  ;;  %1790 = vmatmul.bf16.gmra.mxu0 %v1706_v0  ;;  %v1524_v40 = vshrl.u32 %v6654_v13, 16  ;;  %v1527_v7 = vshll.u32 %v6654_v13, 16  ;;  %v8672_v8 = vld [vmem:[%s8011_s8 + $0x4c] sm:$0xf]  ;;  %v2002_v23 = vpack.c.b16 %v1987_v62, %v1986_v39 }
 0x11f   : > { %10054 = vst [vmem:[#allocation5_spill] sm:$0xff] %v8672_v8  ;;  %v1522_v6 = vsel %vm8049_vm2, %v1517_v58, %v1521_v19  ;;  %v2506_v4 = vshll.u32 %v8672_v8, 16  ;;  %v8698_v62 = vld [vmem:[%s8011_s8 + $0x4c] sm:$0xf] }
 0x120   : > { %v1526_v13 = vrot.slane %v1524_v40, 4  ;;  %v1529_v39 = vrot.slane %v1527_v7, 5  ;;  %v1691_v19 = vunpack.c.l.b16 %v1522_v6  ;;  %v1928_v29 = vrot.slane %v8698_v62, 5 }
 0x121   : > { %2763 = vmatmul.bf16.gmra.mxu3 %v2679_v28  ;;  %v1512_v28 = vsel %vm8049_vm2, %v1507_v37, %v8636_v27  ;;  %v2495_v27 = vsel %vm8049_vm2, %v2490_v9, %v2494_v34  ;;  %2094 = vmatmul.bf16.gmra.mxu1 %v2002_v23  ;;  %v1142_v37 = vpop.f32.mrf.mxu2  ;;  %v2499_v34 = vrot.slane %v2497_v47, 4  ;;  %v1161_v40 = vadd.f32 %v8465_v53, %v858_v49 }
 0x122   : > { %v1690_v58 = vunpack.c.l.b16 %v1512_v28  ;;  %v2664_v9 = vunpack.c.l.b16 %v2495_v27  ;;  %v1530_v7 = vor.u32 %v1529_v39, %v1526_v13  ;;  %v8705_v28 = vld [vmem:[%s8011_s8 + $0x50] sm:$0x1]  ;;  %v1540_v6 = vor.u32 %v1539_v41, %v8695_v45 }
 0x123   : > { %v8682_v5 = vpop.f32.mrf.mxu0  ;;  %v1543_v47 = vshll.u32 %v8660_v22, 16  ;;  %v1930_v53 = vrot.slane %v1928_v29, 4  ;;  %v2516_v39 = vshll.u32 %v8705_v28, 16  ;;  %v1929_v22 = vsel %vm8134_vm5, %v6735_v56, %v1928_v29  ;;  %v7703_v29 = vld [vmem:[%s10040_s1 + $0x218] sm:$0xff] }
 0x124   : > { %v1347_v0 = vpop.f32.mrf.mxu3  ;;  %v1707_v23 = vpack.c.b16 %v1691_v19, %v1690_v58  ;;  %v8717_v58 = vld [vmem:[%s8011_s8 + $0x50] sm:$0x1]  ;;  %v1531_v19 = vrot.slane %v1530_v7, 4  ;;  %3043 = vmatpush.bf16.msrb.mxu0 %v7703_v29 }
 0x125   : > { %v8680_v33 = vadd.f32 %v1347_v0, %v8509_v16  ;;  %v2510_v16 = vshrl.u32 %v8672_v8, 16  ;;  %v8700_v0 = vrot.slane %v2506_v4, 5  ;;  %v2680_v4 = vpack.c.b16 %v2664_v9, %v2663_v35  ;;  %v7679_v8 = vld [vmem:[%s8011_s8 + $0x54] sm:$0xff] }
 0x126   : > { %v1931_v41 = vrot.slane %v8717_v58, 5  ;;  %v1541_v35 = vrot.slane %v1540_v6, 4  ;;  %v1545_v9 = vrot.slane %v1543_v47, 5  ;;  %2324 = vmatmul.bf16.gmra.mxu2 %v7679_v8  ;;  %v1536_v6 = vsel %vm8049_vm2, %v1531_v19, %v8695_v45 }
 0x127   : > { %v2512_v43 = vrot.slane %v2510_v16, 4  ;;  %v2503_v16 = vor.u32 %v2502_v36, %v2499_v34  ;;  %v1988_v34 = vunpack.c.l.b16 %v1929_v22 }
 0x128   : > { %v1932_v7 = vsel %vm8134_vm5, %v1930_v53, %v1931_v41  ;;  %v1561_v53 = vshrl.u32 %v8698_v62, 16 }
 0x129   : > { %v2513_v13 = vor.u32 %v2512_v43, %v8700_v0  ;;  %v1144_v36 = vpop.f32.mrf.mxu2  ;;  %v2504_v43 = vrot.slane %v2503_v16, 4  ;;  %v1557_v16 = vshll.u32 %v8698_v62, 16 }
 0x12b   : > { %v708_v27 = vpop.f32.mrf.mxu0  ;;  %v2514_v55 = vrot.slane %v2513_v13, 4  ;;  %v2509_v45 = vsel %vm8049_vm2, %v2504_v43, %v8700_v0  ;;  %v8754_v43 = vrot.slane %v1557_v16, 5  ;;  %v1567_v16 = vshll.u32 %v8717_v58, 16 }
 0x12c   : > { %v1349_v21 = vpop.f32.mrf.mxu3  ;;  %v876_v49 = vadd.f32 %v8341_v24, %v708_v27  ;;  %v6657_v24 = vld [vmem:[%s8011_s8 + $0x48] sm:$0xf]  ;;  %v8735_v27 = vld [vmem:[%s8011_s8 + $0x58] sm:$0xf] }
 0x12d   : > { %v8710_v12 = vadd.f32 %v1349_v21, %v1161_v40  ;;  %v6911_v21 = vld [vmem:[%s8011_s8 + $0x54] sm:$0xf]  ;;  %v1548_v47 = vshrl.u32 %v6657_v24, 16  ;;  %v1551_v56 = vshll.u32 %v6657_v24, 16  ;;  %10055 = vst [vmem:[#allocation6_spill] sm:$0xff] %v8735_v27  ;;  %v2530_v62 = vshll.u32 %v8735_v27, 16 }
 0x12e   : > { %v8722_v40 = vadd.f32 %v1142_v37, %v876_v49  ;;  %1795 = vmatmul.bf16.gmra.mxu0 %v1707_v23  ;;  %v2518_v37 = vrot.slane %v2516_v39, 5  ;;  %v1989_v23 = vunpack.c.l.b16 %v1932_v7  ;;  %v2521_v22 = vshrl.u32 %v6911_v21, 16 }
 0x12f   : > { %v2524_v19 = vshll.u32 %v6911_v21, 16  ;;  %v1550_v24 = vrot.slane %v1548_v47, 4  ;;  %v1563_v7 = vrot.slane %v1561_v53, 4  ;;  %v1163_v47 = vadd.f32 %v8520_v44, %v8578_v50  ;;  %v6726_v53 = vld [vmem:[%s8011_s8 + $0x54] sm:$0xe]  ;;  %v7680_v50 = vld [vmem:[%s8011_s8 + $0x60] sm:$0xff] }
 0x130   : > { %v2003_v49 = vpack.c.b16 %v1989_v23, %v1988_v34  ;;  %v1553_v34 = vrot.slane %v1551_v56, 5  ;;  %v8757_v23 = vld [vmem:[%s8011_s8 + $0x5c] sm:$0x1] }
 0x131   : > { %2768 = vmatmul.bf16.gmra.mxu3 %v2680_v4  ;;  %v1546_v4 = vsel %vm8049_vm2, %v1541_v35, %v1545_v9  ;;  %v2519_v35 = vsel %vm8049_vm2, %v2514_v55, %v2518_v37  ;;  %v2534_v9 = vshrl.u32 %v8735_v27, 16  ;;  %10056 = vst [vmem:[#allocation7_spill] sm:$0xff] %v8757_v23  ;;  %v2523_v55 = vrot.slane %v2521_v22, 4  ;;  %v1147_v56 = vpop.f32.mrf.mxu2  ;;  %v6660_v27 = vld [vmem:[%s8011_s8 + $0x54] sm:$0xf] }
 0x132   : > { %2099 = vmatmul.bf16.gmra.mxu1 %v2003_v49  ;;  %v1693_v0 = vunpack.c.l.b16 %v1546_v4  ;;  %v2666_v21 = vunpack.c.l.b16 %v2519_v35  ;;  %v2526_v37 = vrot.slane %v2524_v19, 5  ;;  %v1554_v4 = vor.u32 %v1553_v34, %v1550_v24 }
 0x133   : > { %v710_v39 = vpop.f32.mrf.mxu0  ;;  %v1564_v22 = vor.u32 %v1563_v7, %v8754_v43  ;;  %v2540_v19 = vshll.u32 %v8757_v23, 16  ;;  %v1572_v23 = vshrl.u32 %v6660_v27, 16 }
 0x134   : > { %v1352_v8 = vpop.f32.mrf.mxu3  ;;  %v878_v41 = vadd.f32 %v8372_v20, %v710_v39  ;;  %v2665_v20 = vunpack.c.l.b16 %v2509_v45  ;;  %v8762_v39 = vrot.slane %v2530_v62, 5  ;;  %v2527_v44 = vor.u32 %v2526_v37, %v2523_v55  ;;  %v6914_v37 = vld [vmem:[%s8011_s8 + $0x60] sm:$0xf] }
 0x135   : > { %v8742_v13 = vadd.f32 %v1352_v8, %v8562_v10  ;;  %v1692_v10 = vunpack.c.l.b16 %v1536_v6  ;;  %v8760_v8 = vld [vmem:[%s8011_s8 + $0x58] sm:$0xf]  ;;  %v2536_v6 = vrot.slane %v2534_v9, 4  ;;  %v1555_v7 = vrot.slane %v1554_v4, 4 }
 0x136   : > { %v8752_v29 = vadd.f32 %v1144_v36, %v878_v41  ;;  %v1935_v36 = vrot.slane %v8760_v8, 5  ;;  %v6736_v41 = vrot.slane %v6726_v53, 9  ;;  %v2681_v9 = vpack.c.b16 %v2666_v21, %v2665_v20  ;;  %2329 = vmatmul.bf16.gmra.mxu2 %v7680_v50 }
 0x137   : > { %v1708_v45 = vpack.c.b16 %v1693_v0, %v1692_v10  ;;  %v2537_v34 = vor.u32 %v2536_v6, %v8762_v39  ;;  %v8778_v10 = vld [vmem:[%s8011_s8 + $0x5c] sm:$0x1]  ;;  %v1565_v21 = vrot.slane %v1564_v22, 4  ;;  %v2542_v55 = vrot.slane %v2540_v19, 5  ;;  %v867_v6 = vpop.f32.mrf.mxu1 }
 0x138   : > { %v1937_v24 = vrot.slane %v1935_v36, 4  ;;  %v1936_v0 = vsel %vm8134_vm5, %v6736_v41, %v1935_v36  ;;  %v1938_v53 = vrot.slane %v8778_v10, 5  ;;  %v2545_v22 = vshrl.u32 %v6914_v37, 16 }
 0x139   : > { %v2538_v4 = vrot.slane %v2537_v34, 4  ;;  %v2548_v19 = vshll.u32 %v6914_v37, 16  ;;  %v1574_v37 = vrot.slane %v1572_v23, 4 }
 0x13a   : > { %v1939_v36 = vsel %vm8134_vm5, %v1937_v24, %v1938_v53 }
 0x13b   : > { %v713_v62 = vpop.f32.mrf.mxu0 }
 0x13c   : > { %v1354_v49 = vpop.f32.mrf.mxu3  ;;  %v881_v58 = vadd.f32 %v8403_v61, %v713_v62  ;;  %v1990_v61 = vunpack.c.l.b16 %v1936_v0  ;;  %v2528_v62 = vrot.slane %v2527_v44, 4  ;;  %v1149_v0 = vpop.f32.mrf.mxu2 }
 0x13d   : > { %v8771_v35 = vadd.f32 %v1354_v49, %v1163_v47  ;;  %v1569_v47 = vrot.slane %v1567_v16, 5  ;;  %v8787_v49 = vld [vmem:[%s8011_s8 + $0x64] sm:$0xf]  ;;  %v1585_v16 = vshrl.u32 %v8760_v8, 16 }
 0x13e   : > { %v8783_v20 = vadd.f32 %v1147_v56, %v881_v58  ;;  %1800 = vmatmul.bf16.gmra.mxu0 %v1708_v45  ;;  %v1581_v56 = vshll.u32 %v8760_v8, 16  ;;  %v1991_v45 = vunpack.c.l.b16 %v1939_v36  ;;  %v2554_v41 = vshll.u32 %v8787_v49, 16 }
 0x13f   : > { %10057 = vst [vmem:[#allocation8_spill] sm:$0xff] %v8771_v35  ;;  %v1575_v35 = vshll.u32 %v6660_v27, 16  ;;  %v2558_v58 = vshrl.u32 %v8787_v49, 16  ;;  %v1560_v27 = vsel %vm8049_vm2, %v1555_v7, %v8754_v43  ;;  %v1570_v50 = vsel %vm8049_vm2, %v1565_v21, %v1569_v47  ;;  %v7702_v43 = vld [vmem:[%s10040_s1 + $0x210] sm:$0xff] }
 0x140   : > { %v2004_v24 = vpack.c.b16 %v1991_v45, %v1990_v61  ;;  %v2533_v53 = vsel %vm8049_vm2, %v2528_v62, %v8762_v39  ;;  %v2543_v47 = vsel %vm8049_vm2, %v2538_v4, %v2542_v55  ;;  %v1587_v21 = vrot.slane %v1585_v16, 4  ;;  %3044 = vmatpush.bf16.msrb.mxu0 %v7702_v43  ;;  %v7681_v43 = vld [vmem:[%s8011_s8 + $0x6c] sm:$0xff] }
 0x141   : > { %2773 = vmatmul.bf16.gmra.mxu3 %v2681_v9  ;;  %v868_v9 = vadd.f32 %v867_v6, %v8630_v57  ;;  %v1577_v57 = vrot.slane %v1575_v35, 5  ;;  %v2547_v61 = vrot.slane %v2545_v22, 4  ;;  %v2550_v6 = vrot.slane %v2548_v19, 5 }
 0x142   : > { %2104 = vmatmul.bf16.gmra.mxu1 %v2004_v24  ;;  %v8815_v39 = vrot.slane %v2554_v41, 5  ;;  %v2560_v23 = vrot.slane %v2558_v58, 4  ;;  %v1694_v62 = vunpack.c.l.b16 %v1560_v27  ;;  %v1695_v36 = vunpack.c.l.b16 %v1570_v50  ;;  %v6727_v50 = vld [vmem:[%s8011_s8 + $0x60] sm:$0xe] }
 0x143   : > { %v715_v34 = vpop.f32.mrf.mxu0  ;;  %v2667_v45 = vunpack.c.l.b16 %v2533_v53  ;;  %v2668_v55 = vunpack.c.l.b16 %v2543_v47  ;;  %v1578_v4 = vor.u32 %v1577_v57, %v1574_v37  ;;  %v1591_v22 = vshll.u32 %v8778_v10, 16 }
 0x144   : > { %v1357_v44 = vpop.f32.mrf.mxu3  ;;  %v883_v7 = vadd.f32 %v8444_v11, %v715_v34  ;;  %v8820_v11 = vld [vmem:[%s8011_s8 + $0x68] sm:$0x1]  ;;  %v1165_v41 = vadd.f32 %v8590_v38, %v868_v9  ;;  %v2551_v58 = vor.u32 %v2550_v6, %v2547_v61  ;;  %v1709_v34 = vpack.c.b16 %v1695_v36, %v1694_v62 }
 0x145   : > { %v8802_v8 = vadd.f32 %v1357_v44, %v8612_v18  ;;  %v8813_v18 = vrot.slane %v1581_v56, 5  ;;  %v8823_v56 = vld [vmem:[%s8011_s8 + $0x64] sm:$0xf]  ;;  %v2561_v44 = vor.u32 %v2560_v23, %v8815_v39  ;;  %v2564_v27 = vshll.u32 %v8820_v11, 16 }
 0x146   : > { %v8817_v35 = vadd.f32 %v1149_v0, %v883_v7  ;;  %v1942_v19 = vrot.slane %v8823_v56, 5  ;;  %v6737_v0 = vrot.slane %v6727_v50, 9  ;;  %v2682_v57 = vpack.c.b16 %v2668_v55, %v2667_v45  ;;  %v6663_v45 = vld [vmem:[%s8011_s8 + $0x60] sm:$0xf]  ;;  %2334 = vmatmul.bf16.gmra.mxu2 %v7681_v43  ;;  %v8861_v50 = vld [vmem:[%s8011_s8 + $0x70] sm:$0xf] }
 0x147   : > { %v1588_v16 = vor.u32 %v1587_v21, %v8813_v18  ;;  %v1579_v10 = vrot.slane %v1578_v4, 4  ;;  %v1593_v47 = vrot.slane %v1591_v22, 5  ;;  %v8839_v21 = vld [vmem:[%s8011_s8 + $0x68] sm:$0x1]  ;;  %v2552_v6 = vrot.slane %v2551_v58, 4 }
 0x148   : > { %v1944_v7 = vrot.slane %v1942_v19, 4  ;;  %v1943_v61 = vsel %vm8134_vm5, %v6737_v0, %v1942_v19  ;;  %v2562_v23 = vrot.slane %v2561_v44, 4  ;;  %v2566_v62 = vrot.slane %v2564_v27, 5  ;;  %v6917_v22 = vld [vmem:[%s8011_s8 + $0x6c] sm:$0xf] }
 0x149   : > { %v1589_v9 = vrot.slane %v1588_v16, 4  ;;  %v1945_v36 = vrot.slane %v8839_v21, 5  ;;  %v1992_v55 = vunpack.c.l.b16 %v1943_v61  ;;  %v838_v4 = vadd.f32 %v8304_v60, %v8302_v59 }
 0x14a   : > { %v1584_v16 = vsel %vm8049_vm2, %v1579_v10, %v8813_v18  ;;  %v2557_v58 = vsel %vm8049_vm2, %v2552_v6, %v8815_v39  ;;  %v2567_v44 = vsel %vm8049_vm2, %v2562_v23, %v2566_v62  ;;  %v1596_v27 = vshrl.u32 %v6663_v45, 16 }
 0x14b   : > { %v1102_v37 = vpop.f32.mrf.mxu0  ;;  %v1599_v60 = vshll.u32 %v6663_v45, 16  ;;  %v1609_v18 = vshrl.u32 %v8823_v56, 16  ;;  %v2572_v10 = vshll.u32 %v6917_v22, 16  ;;  %v873_v39 = vadd.f32 %v8313_v2, %v8682_v5 }
 0x14c   : > { %v1359_v24 = vpop.f32.mrf.mxu3  ;;  %v8836_v38 = vadd.f32 %v1102_v37, %v8295_v54  ;;  %v1946_v54 = vsel %vm8134_vm5, %v1944_v7, %v1945_v36  ;;  %v2578_v7 = vshll.u32 %v8861_v50, 16  ;;  %v2669_v61 = vunpack.c.l.b16 %v2557_v58  ;;  %v6728_v58 = vld [vmem:[%s8011_s8 + $0x6c] sm:$0xe] }
 0x14d   : > { %v8832_v53 = vadd.f32 %v1359_v24, %v1165_v41  ;;  %v1993_v19 = vunpack.c.l.b16 %v1946_v54  ;;  %v1594_v41 = vsel %vm8049_vm2, %v1589_v9, %v1593_v47  ;;  %v1605_v24 = vshll.u32 %v8823_v56, 16 }
 0x14e   : > { %1805 = vmatmul.bf16.gmra.mxu0 %v1709_v34  ;;  %v2582_v9 = vshrl.u32 %v8861_v50, 16  ;;  %v1696_v56 = vunpack.c.l.b16 %v1584_v16  ;;  %v1697_v47 = vunpack.c.l.b16 %v1594_v41  ;;  %v2670_v6 = vunpack.c.l.b16 %v2567_v44 }
 0x14f   : > { %v2005_v34 = vpack.c.b16 %v1993_v19, %v1992_v55  ;;  %v1598_v23 = vrot.slane %v1596_v27, 4  ;;  %v1601_v2 = vrot.slane %v1599_v60, 5  ;;  %v8877_v5 = vrot.slane %v1605_v24, 5  ;;  %v8880_v55 = vld [vmem:[%s8011_s8 + $0x74] sm:$0x1] }
 0x150   : > { %v1611_v62 = vrot.slane %v1609_v18, 4  ;;  %v2574_v45 = vrot.slane %v2572_v10, 5  ;;  %v8882_v54 = vrot.slane %v2578_v7, 5  ;;  %v1167_v16 = vadd.f32 %v8650_v31, %v873_v39  ;;  %v8890_v18 = vld [vmem:[%s8011_s8 + $0x74] sm:$0x1]  ;;  %v7682_v39 = vld [vmem:[%s8011_s8 + $0x78] sm:$0xff] }
 0x151   : > { %2778 = vmatmul.bf16.gmra.mxu3 %v2682_v57  ;;  %v2569_v57 = vshrl.u32 %v6917_v22, 16  ;;  %v6667_v22 = vld [vmem:[%s8011_s8 + $0x70] sm:$0xf]  ;;  %v1710_v19 = vpack.c.b16 %v1697_v47, %v1696_v56  ;;  %v2683_v41 = vpack.c.b16 %v2670_v6, %v2669_v61  ;;  %v1615_v24 = vshll.u32 %v8839_v21, 16  ;;  %v6666_v56 = vld [vmem:[%s8011_s8 + $0x6c] sm:$0xf] }
 0x152   : > { %2109 = vmatmul.bf16.gmra.mxu1 %v2005_v34  ;;  %v1949_v44 = vrot.slane %v6667_v22, 5  ;;  %v1612_v60 = vor.u32 %v1611_v62, %v8877_v5  ;;  %v6738_v34 = vrot.slane %v6728_v58, 9  ;;  %v2588_v31 = vshll.u32 %v8880_v55, 16 }
 0x153   : > { %v1104_v37 = vpop.f32.mrf.mxu0  ;;  %v2571_v36 = vrot.slane %v2569_v57, 4  ;;  %v1952_v7 = vrot.slane %v8890_v18, 5  ;;  %v1617_v6 = vrot.slane %v1615_v24, 5  ;;  %v1620_v58 = vshrl.u32 %v6666_v56, 16 }
 0x154   : > { %v1362_v59 = vpop.f32.mrf.mxu3  ;;  %v8870_v43 = vadd.f32 %v1104_v37, %v838_v4  ;;  %v2584_v4 = vrot.slane %v2582_v9, 4  ;;  %v1950_v21 = vsel %vm8134_vm5, %v6738_v34, %v1949_v44  ;;  %v1951_v47 = vrot.slane %v1949_v44, 4 }
 0x155   : > { %v8866_v0 = vadd.f32 %v1362_v59, %v8665_v51  ;;  %v7701_v51 = vld [vmem:[%s10040_s1 + $0x208] sm:$0xff]  ;;  %v1602_v59 = vor.u32 %v1601_v2, %v1598_v23  ;;  %v2575_v10 = vor.u32 %v2574_v45, %v2571_v36  ;;  %v6920_v23 = vld [vmem:[%s8011_s8 + $0x78] sm:$0xf]  ;;  %v1994_v2 = vunpack.c.l.b16 %v1950_v21 }
 0x156   : > { %3045 = vmatpush.bf16.msrb.mxu0 %v7701_v51  ;;  %v2585_v51 = vor.u32 %v2584_v4, %v8882_v54  ;;  %v1613_v62 = vrot.slane %v1612_v60, 4  ;;  %v2590_v45 = vrot.slane %v2588_v31, 5  ;;  %2339 = vmatmul.bf16.gmra.mxu2 %v7682_v39  ;;  %v1629_v44 = vshll.u32 %v6667_v22, 16 }
 0x157   : > { %v1603_v61 = vrot.slane %v1602_v59, 4  ;;  %v2576_v36 = vrot.slane %v2575_v10, 4  ;;  %v2593_v59 = vshrl.u32 %v6920_v23, 16  ;;  %v2596_v24 = vshll.u32 %v6920_v23, 16 }
 0x158   : > { %v2586_v4 = vrot.slane %v2585_v51, 4  ;;  %v1622_v21 = vrot.slane %v1620_v58, 4 }
 0x159   : > { %v1608_v51 = vsel %vm8049_vm2, %v1603_v61, %v8877_v5  ;;  %v2595_v61 = vrot.slane %v2593_v59, 4 }
 0x15a   : > { %v1698_v23 = vunpack.c.l.b16 %v1608_v51 }
 0x15b   : > { %v1107_v57 = vpop.f32.mrf.mxu0 }
 0x15c   : > { %v1364_v27 = vpop.f32.mrf.mxu3  ;;  %v8898_v9 = vadd.f32 %v1107_v57, %v8320_v15  ;;  %v1953_v15 = vsel %vm8134_vm5, %v1951_v47, %v1952_v7  ;;  %v8929_v47 = vrot.slane %v1629_v44, 5 }
 0x15d   : > { %v8892_v37 = vadd.f32 %v1364_v27, %v1167_v16  ;;  %v8906_v16 = vld [vmem:[%s8011_s8 + $0x7c] sm:$0xf]  ;;  %v1623_v27 = vshll.u32 %v6666_v56, 16  ;;  %v1995_v34 = vunpack.c.l.b16 %v1953_v15 }
 0x15e   : > { %1810 = vmatmul.bf16.gmra.mxu0 %v1710_v19  ;;  %v1633_v19 = vshrl.u32 %v6667_v22, 16  ;;  %v2602_v57 = vshll.u32 %v8906_v16, 16  ;;  %v2606_v10 = vshrl.u32 %v8906_v16, 16  ;;  %v1618_v22 = vsel %vm8049_vm2, %v1613_v62, %v1617_v6 }
 0x15f   : > { %v2006_v31 = vpack.c.b16 %v1995_v34, %v1994_v2  ;;  %v1625_v56 = vrot.slane %v1623_v27, 5  ;;  %v2598_v6 = vrot.slane %v2596_v24, 5  ;;  %v1699_v2 = vunpack.c.l.b16 %v1618_v22  ;;  %v8934_v34 = vld [vmem:[%s8011_s8 + $0x80] sm:$0x1] }
 0x160   : > { %v1635_v5 = vrot.slane %v1633_v19, 4  ;;  %v8931_v62 = vrot.slane %v2602_v57, 5  ;;  %v1639_v27 = vshll.u32 %v8890_v18, 16  ;;  %v6729_v19 = vld [vmem:[%s8011_s8 + $0x78] sm:$0xe]  ;;  %v2612_v57 = vshll.u32 %v8934_v34, 16 }
 0x161   : > { %2783 = vmatmul.bf16.gmra.mxu3 %v2683_v41  ;;  %v843_v41 = vadd.f32 %v8348_v26, %v8346_v25  ;;  %v2581_v25 = vsel %vm8049_vm2, %v2576_v36, %v8882_v54  ;;  %v2608_v54 = vrot.slane %v2606_v10, 4  ;;  %v2599_v44 = vor.u32 %v2598_v6, %v2595_v61  ;;  %v7700_v22 = vld [vmem:[%s10040_s1 + $0x200] sm:$0xff] }
 0x162   : > { %2114 = vmatmul.bf16.gmra.mxu1 %v2006_v31  ;;  %v2671_v36 = vunpack.c.l.b16 %v2581_v25  ;;  %v1636_v58 = vor.u32 %v1635_v5, %v8929_v47  ;;  %v1711_v24 = vpack.c.b16 %v1699_v2, %v1698_v23  ;;  %v6739_v10 = vrot.slane %v6729_v19, 9  ;;  %v7683_v18 = vld [vmem:[%s8011_s8 + $0x84] sm:$0xff]  ;;  %3046 = vmatpush.bf16.msrb.mxu0 %v7700_v22 }
 0x163   : > { %v1109_v7 = vpop.f32.mrf.mxu0  ;;  %v1641_v61 = vrot.slane %v1639_v27, 5  ;;  %v2600_v6 = vrot.slane %v2599_v44, 4 }
 0x164   : > { %v1367_v60 = vpop.f32.mrf.mxu3  ;;  %v8925_v26 = vadd.f32 %v1109_v7, %v843_v41  ;;  %v8937_v41 = vld [vmem:[%s8011_s8 + $0x7c] sm:$0xf]  ;;  %v1637_v5 = vrot.slane %v1636_v58, 4 }
 0x165   : > { %v8915_v39 = vadd.f32 %v1367_v60, %v8722_v40  ;;  %v2591_v40 = vsel %vm8049_vm2, %v2586_v4, %v2590_v45  ;;  %v1626_v45 = vor.u32 %v1625_v56, %v1622_v21  ;;  %v1956_v4 = vrot.slane %v8937_v41, 5  ;;  %v8956_v56 = vld [vmem:[%s8011_s8 + $0x80] sm:$0x1] }
 0x166   : > { %v2672_v15 = vunpack.c.l.b16 %v2591_v40  ;;  %v2609_v60 = vor.u32 %v2608_v54, %v8931_v62  ;;  %v1959_v23 = vrot.slane %v8956_v56, 5  ;;  %v2614_v54 = vrot.slane %v2612_v57, 5  ;;  %2344 = vmatmul.bf16.gmra.mxu2 %v7683_v18 }
 0x167   : > { %v1958_v25 = vrot.slane %v1956_v4, 4  ;;  %v1627_v21 = vrot.slane %v1626_v45, 4  ;;  %v6923_v45 = vld [vmem:[%s8011_s8 + $0x84] sm:$0xf]  ;;  %v1642_v27 = vsel %vm8049_vm2, %v1637_v5, %v1641_v61  ;;  %v2605_v44 = vsel %vm8049_vm2, %v2600_v6, %v8931_v62 }
 0x168   : > { %v2684_v51 = vpack.c.b16 %v2672_v15, %v2671_v36  ;;  %v2610_v2 = vrot.slane %v2609_v60, 4  ;;  %v2617_v22 = vshrl.u32 %v6923_v45, 16  ;;  %v2620_v62 = vshll.u32 %v6923_v45, 16 }
 0x169   : > { %v1960_v15 = vsel %vm8134_vm5, %v1958_v25, %v1959_v23  ;;  %v1632_v58 = vsel %vm8049_vm2, %v1627_v21, %v8929_v47  ;;  %v1701_v5 = vunpack.c.l.b16 %v1642_v27  ;;  %v2673_v61 = vunpack.c.l.b16 %v2605_v44 }
 0x16a   : > { %v1997_v19 = vunpack.c.l.b16 %v1960_v15  ;;  %v2615_v60 = vsel %vm8049_vm2, %v2610_v2, %v2614_v54 }
 0x16b   : > { %v1112_v7 = vpop.f32.mrf.mxu0 }
 0x16c   : > { %v1369_v59 = vpop.f32.mrf.mxu3  ;;  %v8953_v40 = vadd.f32 %v1112_v7, %v8382_v48  ;;  %v6669_v48 = vld [vmem:[%s8011_s8 + $0x78] sm:$0xf]  ;;  %v1653_v7 = vshll.u32 %v8937_v41, 16 }
 0x16d   : > { %v8946_v31 = vadd.f32 %v1369_v59, %v8752_v29  ;;  %v1957_v29 = vsel %vm8134_vm5, %v6739_v10, %v1956_v4  ;;  %v848_v4 = vadd.f32 %v8413_v1, %v8411_v63  ;;  %v8976_v59 = vld [vmem:[%s8011_s8 + $0x88] sm:$0xf]  ;;  %v1644_v57 = vshrl.u32 %v6669_v48, 16 }
 0x16e   : > { %1815 = vmatmul.bf16.gmra.mxu0 %v1711_v24  ;;  %v1996_v36 = vunpack.c.l.b16 %v1957_v29  ;;  %v1647_v10 = vshll.u32 %v6669_v48, 16  ;;  %v2626_v25 = vshll.u32 %v8976_v59, 16  ;;  %v2630_v21 = vshrl.u32 %v8976_v59, 16 }
 0x16f   : > { %v1700_v29 = vunpack.c.l.b16 %v1632_v58  ;;  %v1646_v6 = vrot.slane %v1644_v57, 4  ;;  %v1655_v2 = vrot.slane %v1653_v7, 5  ;;  %v1663_v57 = vshll.u32 %v8956_v56, 16 }
 0x170   : > { %v2007_v63 = vpack.c.b16 %v1997_v19, %v1996_v36  ;;  %v1649_v23 = vrot.slane %v1647_v10, 5  ;;  %v2619_v36 = vrot.slane %v2617_v22, 4  ;;  %v2628_v48 = vrot.slane %v2626_v25, 5  ;;  %v8990_v19 = vld [vmem:[%s8011_s8 + $0x8c] sm:$0x1] }
 0x171   : > { %2788 = vmatmul.bf16.gmra.mxu3 %v2684_v51  ;;  %v1657_v51 = vshrl.u32 %v8937_v41, 16  ;;  %v2622_v41 = vrot.slane %v2620_v62, 5  ;;  %v2632_v15 = vrot.slane %v2630_v21, 4  ;;  %v1378_v21 = vadd.f32 %v8492_v42, %v8870_v43 }
 0x172   : > { %2119 = vmatmul.bf16.gmra.mxu1 %v2007_v63  ;;  %v1650_v44 = vor.u32 %v1649_v23, %v1646_v6 }
 0x173   : > { %v1114_v47 = vpop.f32.mrf.mxu0  ;;  %v1659_v54 = vrot.slane %v1657_v51, 4  ;;  %v2633_v7 = vor.u32 %v2632_v15, %v2628_v48  ;;  %v2636_v51 = vshll.u32 %v8990_v19, 16 }
 0x174   : > { %v1372_v24 = vpop.f32.mrf.mxu3  ;;  %v8985_v18 = vadd.f32 %v1114_v47, %v848_v4  ;;  %v1377_v4 = vadd.f32 %v8473_v52, %v8836_v38  ;;  %v2623_v47 = vor.u32 %v2622_v41, %v2619_v36  ;;  %v1651_v22 = vrot.slane %v1650_v44, 4  ;;  %v7866_v44 = vld [vmem:[%s8011_s8 + $0x20] sm:$0x1] }
 0x175   : > { %v8981_v1 = vadd.f32 %v1372_v24, %v8783_v20  ;;  %v2674_v20 = vunpack.c.l.b16 %v2615_v60  ;;  %v1712_v24 = vpack.c.b16 %v1701_v5, %v1700_v29  ;;  %v1660_v60 = vor.u32 %v1659_v54, %v1655_v2 }
 0x176   : > { %v1665_v38 = vrot.slane %v1663_v57, 5  ;;  %v2624_v62 = vrot.slane %v2623_v47, 4  ;;  %v2634_v25 = vrot.slane %v2633_v7, 4  ;;  %v1656_v56 = vsel %vm8049_vm2, %v1651_v22, %v1655_v2 }
 0x177   : > { %v2685_v63 = vpack.c.b16 %v2674_v20, %v2673_v61  ;;  %v1661_v52 = vrot.slane %v1660_v60, 4  ;;  %v1702_v23 = vunpack.c.l.b16 %v1656_v56  ;;  %v1379_v2 = vadd.f32 %v8513_v3, %v8898_v9 }
 0x178   : > { %v2629_v20 = vsel %vm8049_vm2, %v2624_v62, %v2628_v48  ;;  %v2869_v60 = vrot.slane %v7866_v44, 5  ;;  %v1380_v57 = vadd.f32 %v8546_v30, %v8925_v26  ;;  %v6975_v26 = vld [vmem:[%s8011_s8 + $0x24] sm:$0xe]  ;;  %v7870_v44 = vld [vmem:[%s8011_s8 + $0x38] sm:$0x1] }
 0x179   : > { %v1666_v5 = vsel %vm8049_vm2, %v1661_v52, %v1665_v38  ;;  %v2675_v42 = vunpack.c.l.b16 %v2629_v20  ;;  %v10058_v52 = vld [vmem:[#allocation3_spill] sm:$0xff] }
 0x17a   : > { %v1703_v54 = vunpack.c.l.b16 %v1666_v5  ;;  %v1381_v38 = vadd.f32 %v10058_v52, %v8953_v40  ;;  %v7868_v5 = vld [vmem:[%s8011_s8 + $0x2c] sm:$0x1] }
 0x17b   : > { %v1781_v27 = vpop.f32.mrf.mxu0  ;;  %v2876_v20 = vrot.slane %v7868_v5, 5 }
 0x17c   : > { %v1374_v45 = vpop.f32.mrf.mxu3  ;;  %v8998_v10 = vadd.f32 %v1781_v27, %v1377_v4  ;;  %v1713_v36 = vpack.c.b16 %v1703_v54, %v1702_v23 }
 0x17d   : > { %v8995_v58 = vadd.f32 %v1374_v45, %v8817_v35  ;;  %v2638_v35 = vrot.slane %v2636_v51, 5  ;;  %v7865_v45 = vld [vmem:[%s8011_s8 + $0x1c] sm:$0xf] }
 0x17e   : > { %1820 = vmatmul.bf16.gmra.mxu0 %v1712_v24  ;;  %v2866_v4 = vrot.slane %v7865_v45, 5  ;;  %v7869_v45 = vld [vmem:[%s8011_s8 + $0x34] sm:$0xf] }
 0x17f   : > { %v2639_v6 = vsel %vm8049_vm2, %v2634_v25, %v2638_v35  ;;  %v7867_v35 = vld [vmem:[%s8011_s8 + $0x28] sm:$0xf] }
 0x180   : > { %v2676_v43 = vunpack.c.l.b16 %v2639_v6  ;;  %v2868_v27 = vrot.slane %v2866_v4, 4  ;;  %v10059_v6 = vld [vmem:[#allocation4_spill] sm:$0xff] }
 0x181   : > { %2793 = vmatmul.bf16.gmra.mxu3 %v2685_v63  ;;  %v6974_v63 = vld [vmem:[%s8011_s8 + $0x18] sm:$0xe]  ;;  %v1382_v23 = vadd.f32 %v10059_v6, %v8985_v18  ;;  %v6976_v18 = vld [vmem:[%s8011_s8 + $0x30] sm:$0xe] }
 0x182   : > { %v2686_v15 = vpack.c.b16 %v2676_v43, %v2675_v42  ;;  %v6984_v48 = vrot.slane %v6974_v63, 9  ;;  %v2870_v47 = vsel %vm8134_vm5, %v2868_v27, %v2869_v60  ;;  %v2883_v60 = vrot.slane %v7870_v44, 5 }
 0x183   : > { %v1783_v29 = vpop.f32.mrf.mxu0  ;;  %v2952_v22 = vunpack.c.l.b16 %v2870_v47 }
 0x184   : > { %v9007_v61 = vadd.f32 %v1783_v29, %v1378_v21  ;;  %v2867_v9 = vsel %vm8134_vm5, %v6984_v48, %v2866_v4  ;;  %v2873_v21 = vrot.slane %v7867_v35, 5  ;;  %v6985_v29 = vrot.slane %v6975_v26, 9  ;;  %v6977_v35 = vld [vmem:[%s8011_s8 + $0x3c] sm:$0xe] }
 0x185   : > { %v2951_v51 = vunpack.c.l.b16 %v2867_v9  ;;  %v2880_v4 = vrot.slane %v7869_v45, 5  ;;  %v6986_v48 = vrot.slane %v6976_v18, 9 }
 0x186   : > { %v2875_v56 = vrot.slane %v2873_v21, 4  ;;  %v2874_v40 = vsel %vm8134_vm5, %v6985_v29, %v2873_v21  ;;  %v6987_v21 = vrot.slane %v6977_v35, 9  ;;  %v7872_v29 = vld [vmem:[%s8011_s8 + $0x44] sm:$0x1] }
 0x187   : > { %v2971_v62 = vpack.c.b16 %v2952_v22, %v2951_v51  ;;  %v2882_v27 = vrot.slane %v2880_v4, 4 }
 0x188   : > { %v2877_v42 = vsel %vm8134_vm5, %v2875_v56, %v2876_v20  ;;  %v2890_v56 = vrot.slane %v7872_v29, 5 }
 0x189   : > { %v2884_v9 = vsel %vm8134_vm5, %v2882_v27, %v2883_v60  ;;  %v10061_v27 = vld [vmem:[#allocation8_spill] sm:$0xff] }
 0x18a   : > { %v2956_v51 = vunpack.c.l.b16 %v2884_v9  ;;  %v10062_v9 = vld [vmem:[#allocation6_spill] sm:$0xff] }
 0x18b   : > { %v1786_v41 = vpop.f32.mrf.mxu0 }
 0x18c   : > { %v9016_v24 = vadd.f32 %v1786_v41, %v1379_v2  ;;  %v2953_v2 = vunpack.c.l.b16 %v2874_v40 }
 0x18e   : > { %1825 = vmatmul.bf16.gmra.mxu0 %v1713_v36  ;;  %v2954_v36 = vunpack.c.l.b16 %v2877_v42  ;;  %v10060_v42 = vld [vmem:[#allocation5_spill] sm:$0xff] }
 0x190   : > { %v2972_v41 = vpack.c.b16 %v2954_v36, %v2953_v2  ;;  %v2894_v2 = vrot.slane %v10060_v42, 5 }
 0x191   : > { %2798 = vmatmul.bf16.gmra.mxu3 %v2686_v15 }
 0x192   : > { %v2896_v45 = vrot.slane %v2894_v2, 4 }
 0x193   : > { %v1788_v3 = vpop.f32.mrf.mxu0 }
 0x194   : > { %v9026_v7 = vadd.f32 %v1788_v3, %v1380_v57  ;;  %v2881_v3 = vsel %vm8134_vm5, %v6986_v48, %v2880_v4  ;;  %v2897_v4 = vrot.slane %v8705_v28, 5  ;;  %v6979_v28 = vld [vmem:[%s8011_s8 + $0x54] sm:$0xe] }
 0x196   : > { %v2898_v48 = vsel %vm8134_vm5, %v2896_v45, %v2897_v4 }
 0x19b   : > { %v1791_v25 = vpop.f32.mrf.mxu0 }
 0x19c   : > { %v9031_v30 = vadd.f32 %v1791_v25, %v1381_v38  ;;  %v7871_v38 = vld [vmem:[%s8011_s8 + $0x40] sm:$0xf] }
 0x19e   : > { %3047 = vmatmul.bf16.vlgmr.msrb.gmra.mxu0 %v2971_v62  ;;  %v2887_v62 = vrot.slane %v7871_v38, 5  ;;  %v10063_v38 = vld [vmem:[#allocation7_spill] sm:$0xff] }
 0x1a0   : > { %v2889_v26 = vrot.slane %v2887_v62, 4 }
 0x1a2   : > { %v2891_v20 = vsel %vm8134_vm5, %v2889_v26, %v2890_v56 }
 0x1a3   : > { %v1793_v54 = vpop.f32.mrf.mxu0 }
 0x1a4   : > { %v9041_v43 = vadd.f32 %v1793_v54, %v1382_v23 }
 0x1ab   : > { %v1796_v15 = vpop.f32.mrf.mxu0 }
 0x1ac   : > { %v9045_v63 = vadd.f32 %v1796_v15, %v8628_v46  ;;  %v2955_v46 = vunpack.c.l.b16 %v2881_v3 }
 0x1ae   : > { %3052 = vmatmul.bf16.gmra.mxu0 %v2972_v41  ;;  %v2973_v22 = vpack.c.b16 %v2956_v51, %v2955_v46  ;;  %v6978_v41 = vld [vmem:[%s8011_s8 + $0x48] sm:$0xe]  ;;  %v2901_v46 = vrot.slane %v10062_v9, 5 }
 0x1af   : > { %v6988_v15 = vrot.slane %v6978_v41, 9  ;;  %v2911_v41 = vrot.slane %v8820_v11, 5  ;;  %v2915_v11 = vrot.slane %v8861_v50, 5 }
 0x1b3   : > { %v1798_v57 = vpop.f32.mrf.mxu0 }
 0x1b4   : > { %v9054_v47 = vadd.f32 %v1798_v57, %v8648_v17  ;;  %v2888_v17 = vsel %vm8134_vm5, %v6987_v21, %v2887_v62  ;;  %v2904_v62 = vrot.slane %v10063_v38, 5 }
 0x1b5   : > { %v2957_v23 = vunpack.c.l.b16 %v2888_v17 }
 0x1bb   : > { %v1801_v52 = vpop.f32.mrf.mxu0 }
 0x1bc   : > { %v9058_v25 = vadd.f32 %v1801_v52, %v8680_v33  ;;  %v2958_v33 = vunpack.c.l.b16 %v2891_v20  ;;  %v2903_v52 = vrot.slane %v2901_v46, 4 }
 0x1be   : > { %3057 = vmatmul.bf16.gmra.mxu0 %v2973_v22  ;;  %v2974_v54 = vpack.c.b16 %v2958_v33, %v2957_v23  ;;  %v6989_v22 = vrot.slane %v6979_v28, 9  ;;  %v2905_v26 = vsel %vm8134_vm5, %v2903_v52, %v2904_v62  ;;  %v2908_v23 = vrot.slane %v8787_v49, 5 }
 0x1bf   : > { %v2917_v28 = vrot.slane %v2915_v11, 4 }
 0x1c0   : > { %v2902_v21 = vsel %vm8134_vm5, %v6989_v22, %v2901_v46 }
 0x1c1   : > { %v2961_v56 = vunpack.c.l.b16 %v2902_v21 }
 0x1c3   : > { %v1803_v5 = vpop.f32.mrf.mxu0 }
 0x1c4   : > { %v9067_v6 = vadd.f32 %v1803_v5, %v8710_v12  ;;  %v2895_v12 = vsel %vm8134_vm5, %v6988_v15, %v2894_v2  ;;  %v2075_v5 = vpop.f32.mrf.mxu1  ;;  %v2910_v2 = vrot.slane %v2908_v23, 4 }
 0x1c5   : > { %v2959_v60 = vunpack.c.l.b16 %v2895_v12 }
 0x1c6   : > { %v2912_v49 = vsel %vm8134_vm5, %v2910_v2, %v2911_v41  ;;  %v2925_v2 = vrot.slane %v8934_v34, 5 }
 0x1c7   : > { %v2964_v12 = vunpack.c.l.b16 %v2912_v49 }
 0x1cb   : > { %v1806_v40 = vpop.f32.mrf.mxu0 }
 0x1cc   : > { %v9071_v36 = vadd.f32 %v1806_v40, %v8742_v13  ;;  %v2960_v13 = vunpack.c.l.b16 %v2898_v48  ;;  %v2300_v40 = vpop.f32.mrf.mxu2  ;;  %v2077_v15 = vpop.f32.mrf.mxu1 }
 0x1ce   : > { %3062 = vmatmul.bf16.gmra.mxu0 %v2974_v54  ;;  %v2975_v57 = vpack.c.b16 %v2960_v13, %v2959_v60  ;;  %v6980_v54 = vld [vmem:[%s8011_s8 + $0x60] sm:$0xe] }
 0x1cf   : > { %v6990_v42 = vrot.slane %v6980_v54, 9 }
 0x1d1   : > { %v2909_v4 = vsel %vm8134_vm5, %v6990_v42, %v2908_v23  ;;  %v6982_v23 = vld [vmem:[%s8011_s8 + $0x78] sm:$0xe] }
 0x1d3   : > { %v1808_v18 = vpop.f32.mrf.mxu0 }
 0x1d4   : > { %v9080_v44 = vadd.f32 %v1808_v18, %v10061_v27  ;;  %v2963_v18 = vunpack.c.l.b16 %v2909_v4  ;;  %v2302_v48 = vpop.f32.mrf.mxu2  ;;  %v2080_v9 = vpop.f32.mrf.mxu1 }
 0x1d6   : > { %v2977_v27 = vpack.c.b16 %v2964_v12, %v2963_v18 }
 0x1db   : > { %v1811_v3 = vpop.f32.mrf.mxu0 }
 0x1dc   : > { %v9084_v51 = vadd.f32 %v1811_v3, %v8802_v8  ;;  %v2962_v8 = vunpack.c.l.b16 %v2905_v26  ;;  %v6981_v3 = vld [vmem:[%s8011_s8 + $0x6c] sm:$0xe]  ;;  %v2305_v22 = vpop.f32.mrf.mxu2  ;;  %v2082_v26 = vpop.f32.mrf.mxu1 }
 0x1dd   : > { %v6991_v46 = vrot.slane %v6981_v3, 9 }
 0x1de   : > { %3067 = vmatmul.bf16.gmra.mxu0 %v2975_v57  ;;  %v2976_v17 = vpack.c.b16 %v2962_v8, %v2961_v56 }
 0x1df   : > { %v2916_v38 = vsel %vm8134_vm5, %v6991_v46, %v2915_v11 }
 0x1e3   : > { %v1813_v35 = vpop.f32.mrf.mxu0 }
 0x1e4   : > { %v9093_v29 = vadd.f32 %v1813_v35, %v8832_v53  ;;  %v2754_v53 = vpop.f32.mrf.mxu3  ;;  %v2965_v35 = vunpack.c.l.b16 %v2916_v38  ;;  %v9123_v8 = vpop.f32.mrf.mxu2 }
 0x1e5   : > { %v9133_v41 = vpop.f32.mrf.mxu1 }
 0x1eb   : > { %v1816_v20 = vpop.f32.mrf.mxu0 }
 0x1ec   : > { %v9097_v33 = vadd.f32 %v1816_v20, %v8866_v0  ;;  %v2756_v60 = vpop.f32.mrf.mxu3  ;;  %v9143_v18 = vpop.f32.mrf.mxu2 }
 0x1ed   : > { %v9153_v46 = vpop.f32.mrf.mxu1 }
 0x1ee   : > { %3072 = vmatmul.bf16.gmra.mxu0 %v2976_v17  ;;  %v2922_v17 = vrot.slane %v8906_v16, 5 }
 0x1f0   : > { %v2924_v42 = vrot.slane %v2922_v17, 4 }
 0x1f3   : > { %v1818_v45 = vpop.f32.mrf.mxu0 }
 0x1f4   : > { %v9106_v0 = vadd.f32 %v1818_v45, %v8892_v37  ;;  %v2918_v37 = vrot.slane %v8880_v55, 5  ;;  %v2125_v45 = vadd.f32 %v2075_v5, %v8998_v10  ;;  %v2126_v10 = vadd.f32 %v2077_v15, %v9007_v61  ;;  %v9151_v5 = vld [vmem:[%s10041_s2] ss:$0 sm:$0xff] }
 0x1f5   : > { %v2932_v15 = vrot.slane %v8990_v19, 5  ;;  %v9168_v19 = vpop.f32.mrf.mxu1 }
 0x1f6   : > { %v2919_v62 = vsel %vm8134_vm5, %v2917_v28, %v2918_v37  ;;  %v2350_v12 = vadd.f32 %v2300_v40, %v2125_v45  ;;  %v6983_v28 = vld [vmem:[%s8011_s8 + $0x84] sm:$0xe]  ;;  %v2929_v37 = vrot.slane %v8976_v59, 5 }
 0x1f7   : > { %v2966_v21 = vunpack.c.l.b16 %v2919_v62  ;;  %v9158_v62 = vpop.f32.mrf.mxu2 }
 0x1f8   : > { %v2804_v11 = vadd.f32 %v2754_v53, %v2350_v12  ;;  %v6993_v53 = vrot.slane %v6983_v28, 9  ;;  %v2931_v61 = vrot.slane %v2929_v37, 4 }
 0x1f9   : > { %v2978_v56 = vpack.c.b16 %v2966_v21, %v2965_v35  ;;  %v2127_v21 = vadd.f32 %v2080_v9, %v9016_v24 }
 0x1fb   : > { %v1821_v13 = vpop.f32.mrf.mxu0 }
 0x1fc   : > { %v9110_v57 = vadd.f32 %v1821_v13, %v8915_v39  ;;  %v9121_v39 = vpop.f32.mrf.mxu3 }
 0x1fe   : > { %3077 = vmatmul.bf16.gmra.mxu0 %v2977_v27 }
 0x203   : > { %v1823_v52 = vpop.f32.mrf.mxu0 }
 0x204   : > { %v9119_v50 = vadd.f32 %v1823_v52, %v8946_v31  ;;  %v9130_v54 = vpop.f32.mrf.mxu3  ;;  %v6992_v31 = vrot.slane %v6982_v23, 9  ;;  %v2351_v52 = vadd.f32 %v2302_v48, %v2126_v10  ;;  %v2933_v23 = vsel %vm8134_vm5, %v2931_v61, %v2932_v15  ;;  %v9192_v61 = vpop.f32.mrf.mxu1 }
 0x206   : > { %v2923_v16 = vsel %vm8134_vm5, %v6992_v31, %v2922_v17  ;;  %v2930_v17 = vsel %vm8134_vm5, %v6993_v53, %v2929_v37 }
 0x207   : > { %v2967_v27 = vunpack.c.l.b16 %v2923_v16  ;;  %v2969_v45 = vunpack.c.l.b16 %v2930_v17 }
 0x20b   : > { %v1826_v55 = vpop.f32.mrf.mxu0 }
 0x20c   : > { %v9127_v20 = vadd.f32 %v1826_v55, %v8981_v1  ;;  %v2926_v1 = vsel %vm8134_vm5, %v2924_v42, %v2925_v2  ;;  %v9145_v13 = vpop.f32.mrf.mxu3  ;;  %v2352_v2 = vadd.f32 %v2305_v22, %v2127_v21 }
 0x20d   : > { %v2968_v34 = vunpack.c.l.b16 %v2926_v1  ;;  %v3388_v1 = vld [vmem:[#allocation2] sm:$0xf] }
 0x20e   : > { %3082 = vmatmul.bf16.gmra.mxu0 %v2978_v56  ;;  %v2805_v56 = vadd.f32 %v2756_v60, %v2351_v52  ;;  %v2806_v22 = vadd.f32 %v9121_v39, %v2352_v2 }
 0x20f   : > { %v2979_v3 = vpack.c.b16 %v2968_v34, %v2967_v27  ;;  %v2128_v34 = vadd.f32 %v2082_v26, %v9026_v7 }
 0x211   : > { %v2353_v52 = vadd.f32 %v9123_v8, %v2128_v34  ;;  %v3394_v8 = vld [vmem:[#allocation2 + $0x8] sm:$0x1] }
 0x213   : > { %v1828_v4 = vpop.f32.mrf.mxu0  ;;  %v2807_v17 = vadd.f32 %v9130_v54, %v2353_v52 }
 0x214   : > { %v9141_v49 = vadd.f32 %v1828_v4, %v8995_v58  ;;  %v9164_v59 = vpop.f32.mrf.mxu3  ;;  %v2970_v4 = vunpack.c.l.b16 %v2933_v23 }
 0x21b   : > { %v3048_v58 = vpop.f32.mrf.mxu0 }
 0x21c   : > { %v3098_v40 = vadd.f32 %v3048_v58, %v2804_v11  ;;  %v9177_v11 = vpop.f32.mrf.mxu2  ;;  %v2980_v58 = vpack.c.b16 %v2970_v4, %v2969_v45 }
 0x21e   : > { %v3122_v38 = vadd.f32 %v9151_v5, %v3098_v40  ;;  %3087 = vmatmul.bf16.gmra.mxu0 %v2979_v3 }
 0x220   : > { %v3142_v35 = vmax.f32 %v3122_v38, 0.0  ;;  %v9183_v38 = vpop.f32.mrf.mxu3 }
 0x222   : > { %v3162_v55 = vpack.c.bf16 %v3142_v35, %v3142_v35 }
 0x223   : > { %v3050_v48 = vpop.f32.mrf.mxu0 }
 0x224   : > { %v3186_v31 = vshrl.u32 %v3162_v55, 16  ;;  %v3099_v42 = vadd.f32 %v3050_v48, %v2805_v56  ;;  %v3189_v60 = vshll.u32 %v3162_v55, 16  ;;  %v2129_v48 = vadd.f32 %v9133_v41, %v9031_v30  ;;  %v9206_v45 = vpop.f32.mrf.mxu2 }
 0x226   : > { %v3188_v24 = vrot.slane %v3186_v31, 7  ;;  %v3123_v9 = vadd.f32 %v9151_v5, %v3099_v42  ;;  %v2354_v30 = vadd.f32 %v9143_v18, %v2129_v48 }
 0x228   : > { %v3191_v12 = vor.u32 %v3189_v60, %v3188_v24  ;;  %v3143_v27 = vmax.f32 %v3123_v9, 0.0  ;;  %v3192_v35 = vrot.slane %v3188_v24, 4 }
 0x22a   : > { %v3389_v10 = vsel %vm9172_vm8, %v3191_v12, %v3388_v1  ;;  %v3163_v3 = vpack.c.bf16 %v3143_v27, %v3143_v27  ;;  %v9212_v12 = vpop.f32.mrf.mxu3  ;;  %v3397_v27 = vld [vmem:[#allocation2 + $0xc] sm:$0xf] }
 0x22b   : > { %3390 = vst [vmem:[#allocation2] sm:$0xf] %v3389_v10  ;;  %v3053_v28 = vpop.f32.mrf.mxu0  ;;  %v2130_v10 = vadd.f32 %v9153_v46, %v9041_v43 }
 0x22c   : > { %v3194_v37 = vshrl.u32 %v3163_v3, 16  ;;  %v3100_v40 = vadd.f32 %v3053_v28, %v2806_v22  ;;  %v3197_v26 = vshll.u32 %v3163_v3, 16  ;;  %v9216_v3 = vpop.f32.mrf.mxu1  ;;  %v9228_v46 = vpop.f32.mrf.mxu2 }
 0x22d   : > { %v2355_v43 = vadd.f32 %v9158_v62, %v2130_v10  ;;  %v2131_v62 = vadd.f32 %v9168_v19, %v9045_v63 }
 0x22e   : > { %v3196_v39 = vrot.slane %v3194_v37, 7  ;;  %v3124_v53 = vadd.f32 %v9151_v5, %v3100_v40  ;;  %3092 = vmatmul.bf16.gmra.mxu0 %v2980_v58  ;;  %v2808_v58 = vadd.f32 %v9145_v13, %v2354_v30 }
 0x22f   : > { %v2356_v63 = vadd.f32 %v9177_v11, %v2131_v62 }
 0x230   : > { %v3199_v21 = vor.u32 %v3197_v26, %v3196_v39  ;;  %v3201_v56 = vrot.slane %v3196_v39, 4  ;;  %v3144_v55 = vmax.f32 %v3124_v53, 0.0 }
 0x232   : > { %v3460_v23 = vld [vmem:[#allocation2] sm:$0x1]  ;;  %v3200_v31 = vsel %vm9195_vm13, %v3192_v35, %v3199_v21  ;;  %v3395_v42 = vsel %vm9187_vm12, %v3201_v56, %v3394_v8  ;;  %v3164_v2 = vpack.c.bf16 %v3144_v55, %v3144_v55  ;;  %v3401_v21 = vld [vmem:[#allocation2 + $0x14] sm:$0x1] }
 0x233   : > { %v3461_v24 = vsel %vm9187_vm12, 0, %v3460_v23  ;;  %3391 = vst [vmem:[#allocation2 + $0x4] sm:$0xf] %v3200_v31  ;;  %v3055_v60 = vpop.f32.mrf.mxu0  ;;  %v2809_v23 = vadd.f32 %v9164_v59, %v2355_v43  ;;  %v9234_v31 = vpop.f32.mrf.mxu3 }
 0x234   : > { %3462 = vst [vmem:[#allocation2] sm:$0x1] %v3461_v24  ;;  %v3203_v54 = vshrl.u32 %v3164_v2, 16  ;;  %v3101_v9 = vadd.f32 %v3055_v60, %v2807_v17  ;;  %v3206_v4 = vshll.u32 %v3164_v2, 16 }
 0x235   : > { %3396 = vst [vmem:[#allocation2 + $0x8] sm:$0x1] %v3395_v42 }
 0x236   : > { %v3205_v41 = vrot.slane %v3203_v54, 7  ;;  %v3125_v1 = vadd.f32 %v9151_v5, %v3101_v9  ;;  %v2097_v54 = vpop.f32.mrf.mxu1 }
 0x238   : > { %v3208_v34 = vor.u32 %v3206_v4, %v3205_v41  ;;  %v3145_v22 = vmax.f32 %v3125_v1, 0.0  ;;  %v3209_v56 = vrot.slane %v3205_v41, 4 }
 0x23a   : > { %v3398_v28 = vsel %vm9172_vm8, %v3208_v34, %v3397_v27  ;;  %v3165_v37 = vpack.c.bf16 %v3145_v22, %v3145_v22  ;;  %v2322_v27 = vpop.f32.mrf.mxu2  ;;  %v3404_v34 = vld [vmem:[#allocation2 + $0x18] sm:$0xf] }
 0x23b   : > { %3399 = vst [vmem:[#allocation2 + $0xc] sm:$0xf] %v3398_v28  ;;  %v3058_v40 = vpop.f32.mrf.mxu0  ;;  %v2810_v28 = vadd.f32 %v9183_v38, %v2356_v63 }
 0x23c   : > { %v3491_v52 = vld [vmem:[#allocation2 + $0x8] sm:$0x1]  ;;  %v3211_v39 = vshrl.u32 %v3165_v37, 16  ;;  %v3102_v26 = vadd.f32 %v3058_v40, %v2808_v58  ;;  %v3214_v8 = vshll.u32 %v3165_v37, 16  ;;  %v2132_v58 = vadd.f32 %v9192_v61, %v9054_v47 }
 0x23d   : > { %v3492_v13 = vsel %vm9221_vm14, 0, %v3491_v52  ;;  %v9251_v52 = vpop.f32.mrf.mxu3 }
 0x23e   : > { %3493 = vst [vmem:[#allocation2 + $0x8] sm:$0x1] %v3492_v13  ;;  %v3213_v53 = vrot.slane %v3211_v39, 7  ;;  %v3126_v35 = vadd.f32 %v9151_v5, %v3102_v26  ;;  %v2357_v13 = vadd.f32 %v9206_v45, %v2132_v58  ;;  %v2133_v45 = vadd.f32 %v9216_v3, %v9058_v25 }
 0x240   : > { %v3216_v55 = vor.u32 %v3214_v8, %v3213_v53  ;;  %v3218_v17 = vrot.slane %v3213_v53, 4  ;;  %v3146_v48 = vmax.f32 %v3126_v35, 0.0  ;;  %v2100_v53 = vpop.f32.mrf.mxu1  ;;  %v3408_v35 = vld [vmem:[#allocation2 + $0x20] sm:$0x1]  ;;  %v2358_v25 = vadd.f32 %v9228_v46, %v2133_v45 }
 0x242   : > { %v3463_v42 = vld [vmem:[#allocation2 + $0xc] sm:$0x1]  ;;  %v3217_v2 = vsel %vm9195_vm13, %v3209_v56, %v3216_v55  ;;  %v3402_v24 = vsel %vm9187_vm12, %v3218_v17, %v3401_v21  ;;  %v3166_v60 = vpack.c.bf16 %v3146_v48, %v3146_v48  ;;  %v2811_v48 = vadd.f32 %v9212_v12, %v2357_v13 }
 0x243   : > { %v3464_v9 = vsel %vm9187_vm12, 0, %v3463_v42  ;;  %3400 = vst [vmem:[#allocation2 + $0x10] sm:$0xf] %v3217_v2  ;;  %v3060_v30 = vpop.f32.mrf.mxu0 }
 0x244   : > { %3465 = vst [vmem:[#allocation2 + $0xc] sm:$0x1] %v3464_v9  ;;  %v3220_v59 = vshrl.u32 %v3166_v60, 16  ;;  %v3103_v41 = vadd.f32 %v3060_v30, %v2809_v23  ;;  %v3223_v4 = vshll.u32 %v3166_v60, 16  ;;  %v2325_v23 = vpop.f32.mrf.mxu2 }
 0x245   : > { %3403 = vst [vmem:[#allocation2 + $0x14] sm:$0x1] %v3402_v24 }
 0x246   : > { %v3222_v19 = vrot.slane %v3220_v59, 7  ;;  %v3127_v1 = vadd.f32 %v9151_v5, %v3103_v41  ;;  %v2779_v59 = vpop.f32.mrf.mxu3 }
 0x248   : > { %v3225_v22 = vor.u32 %v3223_v4, %v3222_v19  ;;  %v3147_v10 = vmax.f32 %v3127_v1, 0.0  ;;  %v3226_v21 = vrot.slane %v3222_v19, 4  ;;  %v2102_v19 = vpop.f32.mrf.mxu1  ;;  %v3411_v4 = vld [vmem:[#allocation2 + $0x24] sm:$0xf] }
 0x24a   : > { %v3405_v37 = vsel %vm9172_vm8, %v3225_v22, %v3404_v34  ;;  %v3167_v40 = vpack.c.bf16 %v3147_v10, %v3147_v10  ;;  %v2134_v22 = vadd.f32 %v2097_v54, %v9067_v6  ;;  %v2812_v10 = vadd.f32 %v9234_v31, %v2358_v25  ;;  %v3415_v54 = vld [vmem:[#allocation2 + $0x2c] sm:$0x1] }
 0x24b   : > { %3406 = vst [vmem:[#allocation2 + $0x18] sm:$0xf] %v3405_v37  ;;  %v3063_v11 = vpop.f32.mrf.mxu0 }
 0x24c   : > { %v3494_v39 = vld [vmem:[#allocation2 + $0x14] sm:$0x1]  ;;  %v3228_v26 = vshrl.u32 %v3167_v40, 16  ;;  %v3104_v43 = vadd.f32 %v3063_v11, %v2810_v28  ;;  %v3231_v38 = vshll.u32 %v3167_v40, 16  ;;  %v2327_v37 = vpop.f32.mrf.mxu2 }
 0x24d   : > { %v3495_v8 = vsel %vm9221_vm14, 0, %v3494_v39 }
 0x24e   : > { %3496 = vst [vmem:[#allocation2 + $0x14] sm:$0x1] %v3495_v8  ;;  %v3230_v47 = vrot.slane %v3228_v26, 7  ;;  %v3128_v61 = vadd.f32 %v9151_v5, %v3104_v43  ;;  %v2359_v26 = vadd.f32 %v2322_v27, %v2134_v22  ;;  %v2781_v31 = vpop.f32.mrf.mxu3 }
 0x250   : > { %v3233_v56 = vor.u32 %v3231_v38, %v3230_v47  ;;  %v3235_v55 = vrot.slane %v3230_v47, 4  ;;  %v3148_v17 = vmax.f32 %v3128_v61, 0.0 }
 0x252   : > { %v3466_v62 = vld [vmem:[#allocation2 + $0x18] sm:$0x1]  ;;  %v3234_v42 = vsel %vm9195_vm13, %v3226_v21, %v3233_v56  ;;  %v3409_v2 = vsel %vm9187_vm12, %v3235_v55, %v3408_v35  ;;  %v3168_v24 = vpack.c.bf16 %v3148_v17, %v3148_v17  ;;  %v2813_v21 = vadd.f32 %v9251_v52, %v2359_v26  ;;  %v2105_v56 = vpop.f32.mrf.mxu1 }
 0x253   : > { %v3467_v60 = vsel %vm9187_vm12, 0, %v3466_v62  ;;  %3407 = vst [vmem:[#allocation2 + $0x1c] sm:$0xf] %v3234_v42  ;;  %v3065_v9 = vpop.f32.mrf.mxu0  ;;  %v2135_v55 = vadd.f32 %v2100_v53, %v9071_v36 }
 0x254   : > { %3468 = vst [vmem:[#allocation2 + $0x18] sm:$0x1] %v3467_v60  ;;  %v3237_v30 = vshrl.u32 %v3168_v24, 16  ;;  %v3105_v12 = vadd.f32 %v3065_v9, %v2811_v48  ;;  %v3240_v41 = vshll.u32 %v3168_v24, 16  ;;  %v2330_v52 = vpop.f32.mrf.mxu2 }
 0x255   : > { %3410 = vst [vmem:[#allocation2 + $0x20] sm:$0x1] %v3409_v2  ;;  %v2360_v60 = vadd.f32 %v2325_v23, %v2135_v55 }
 0x256   : > { %v3239_v3 = vrot.slane %v3237_v30, 7  ;;  %v3129_v63 = vadd.f32 %v9151_v5, %v3105_v12  ;;  %v3418_v30 = vld [vmem:[#allocation2 + $0x30] sm:$0xf] }
 0x258   : > { %v3242_v1 = vor.u32 %v3240_v41, %v3239_v3  ;;  %v3149_v34 = vmax.f32 %v3129_v63, 0.0  ;;  %v3243_v47 = vrot.slane %v3239_v3, 4  ;;  %v2136_v3 = vadd.f32 %v2102_v19, %v9080_v44  ;;  %v2784_v41 = vpop.f32.mrf.mxu3  ;;  %v3422_v19 = vld [vmem:[#allocation2 + $0x38] sm:$0x1] }
 0x259   : > { %v2814_v63 = vadd.f32 %v2779_v59, %v2360_v60 }
 0x25a   : > { %v3412_v58 = vsel %vm9172_vm8, %v3242_v1, %v3411_v4  ;;  %v3169_v28 = vpack.c.bf16 %v3149_v34, %v3149_v34  ;;  %v2107_v34 = vpop.f32.mrf.mxu1 }
 0x25b   : > { %3413 = vst [vmem:[#allocation2 + $0x24] sm:$0xf] %v3412_v58  ;;  %v3068_v40 = vpop.f32.mrf.mxu0 }
 0x25c   : > { %v3497_v46 = vld [vmem:[#allocation2 + $0x20] sm:$0x1]  ;;  %v3245_v11 = vshrl.u32 %v3169_v28, 16  ;;  %v3106_v39 = vadd.f32 %v3068_v40, %v2812_v10  ;;  %v3248_v8 = vshll.u32 %v3169_v28, 16  ;;  %v2361_v28 = vadd.f32 %v2327_v37, %v2136_v3  ;;  %v2332_v59 = vpop.f32.mrf.mxu2 }
 0x25d   : > { %v3498_v43 = vsel %vm9221_vm14, 0, %v3497_v46 }
 0x25e   : > { %3499 = vst [vmem:[#allocation2 + $0x20] sm:$0x1] %v3498_v43  ;;  %v3247_v13 = vrot.slane %v3245_v11, 7  ;;  %v3130_v6 = vadd.f32 %v9151_v5, %v3106_v39 }
 0x260   : > { %v3250_v38 = vor.u32 %v3248_v8, %v3247_v13  ;;  %v3252_v61 = vrot.slane %v3247_v13, 4  ;;  %v3150_v35 = vmax.f32 %v3130_v6, 0.0  ;;  %v2815_v8 = vadd.f32 %v2781_v31, %v2361_v28 }
 0x261   : > { %v2137_v6 = vadd.f32 %v2105_v56, %v9084_v51 }
 0x262   : > { %v3469_v27 = vld [vmem:[#allocation2 + $0x24] sm:$0x1]  ;;  %v3251_v17 = vsel %vm9195_vm13, %v3243_v47, %v3250_v38  ;;  %v3416_v48 = vsel %vm9187_vm12, %v3252_v61, %v3415_v54  ;;  %v3170_v45 = vpack.c.bf16 %v3150_v35, %v3150_v35  ;;  %v2786_v61 = vpop.f32.mrf.mxu3  ;;  %v2110_v31 = vpop.f32.mrf.mxu1 }
 0x263   : > { %v3470_v62 = vsel %vm9187_vm12, 0, %v3469_v27  ;;  %3414 = vst [vmem:[#allocation2 + $0x28] sm:$0xf] %v3251_v17  ;;  %v3070_v42 = vpop.f32.mrf.mxu0  ;;  %v2362_v51 = vadd.f32 %v2330_v52, %v2137_v6 }
 0x264   : > { %3471 = vst [vmem:[#allocation2 + $0x24] sm:$0x1] %v3470_v62  ;;  %v3254_v2 = vshrl.u32 %v3170_v45, 16  ;;  %v3107_v24 = vadd.f32 %v3070_v42, %v2813_v21  ;;  %v3257_v53 = vshll.u32 %v3170_v45, 16  ;;  %v3425_v45 = vld [vmem:[#allocation2 + $0x3c] sm:$0xf] }
 0x265   : > { %3417 = vst [vmem:[#allocation2 + $0x2c] sm:$0x1] %v3416_v48  ;;  %v2816_v60 = vadd.f32 %v2784_v41, %v2362_v51 }
 0x266   : > { %v3256_v36 = vrot.slane %v3254_v2, 7  ;;  %v3131_v9 = vadd.f32 %v9151_v5, %v3107_v24  ;;  %v2138_v2 = vadd.f32 %v2107_v34, %v9093_v29  ;;  %v2335_v24 = vpop.f32.mrf.mxu2  ;;  %v3429_v34 = vld [vmem:[#allocation2 + $0x44] sm:$0x1] }
 0x268   : > { %v3259_v12 = vor.u32 %v3257_v53, %v3256_v36  ;;  %v3151_v25 = vmax.f32 %v3131_v9, 0.0  ;;  %v3260_v39 = vrot.slane %v3256_v36, 4 }
 0x26a   : > { %v3419_v4 = vsel %vm9172_vm8, %v3259_v12, %v3418_v30  ;;  %v3171_v1 = vpack.c.bf16 %v3151_v25, %v3151_v25  ;;  %v2363_v25 = vadd.f32 %v2332_v59, %v2138_v2  ;;  %v2789_v3 = vpop.f32.mrf.mxu3  ;;  %v2112_v41 = vpop.f32.mrf.mxu1 }
 0x26b   : > { %3420 = vst [vmem:[#allocation2 + $0x30] sm:$0xf] %v3419_v4  ;;  %v3073_v22 = vpop.f32.mrf.mxu0 }
 0x26c   : > { %v3500_v10 = vld [vmem:[#allocation2 + $0x2c] sm:$0x1]  ;;  %v3262_v23 = vshrl.u32 %v3171_v1, 16  ;;  %v3108_v58 = vadd.f32 %v3073_v22, %v2814_v63  ;;  %v3265_v11 = vshll.u32 %v3171_v1, 16  ;;  %v2817_v28 = vadd.f32 %v2786_v61, %v2363_v25 }
 0x26d   : > { %v3501_v40 = vsel %vm9221_vm14, 0, %v3500_v10 }
 0x26e   : > { %3502 = vst [vmem:[#allocation2 + $0x2c] sm:$0x1] %v3501_v40  ;;  %v3264_v46 = vrot.slane %v3262_v23, 7  ;;  %v3132_v44 = vadd.f32 %v9151_v5, %v3108_v58  ;;  %v2139_v40 = vadd.f32 %v2110_v31, %v9097_v33 }
 0x270   : > { %v3267_v26 = vor.u32 %v3265_v11, %v3264_v46  ;;  %v3269_v43 = vrot.slane %v3264_v46, 4  ;;  %v3152_v13 = vmax.f32 %v3132_v44, 0.0 }
 0x272   : > { %v3472_v54 = vld [vmem:[#allocation2 + $0x30] sm:$0x1]  ;;  %v3268_v37 = vsel %vm9195_vm13, %v3260_v39, %v3267_v26  ;;  %v3423_v47 = vsel %vm9187_vm12, %v3269_v43, %v3422_v19  ;;  %v3172_v38 = vpack.c.bf16 %v3152_v13, %v3152_v13  ;;  %v2337_v19 = vpop.f32.mrf.mxu2 }
 0x273   : > { %v3473_v35 = vsel %vm9187_vm12, 0, %v3472_v54  ;;  %3421 = vst [vmem:[#allocation2 + $0x34] sm:$0xf] %v3268_v37  ;;  %v3075_v21 = vpop.f32.mrf.mxu0  ;;  %v2791_v37 = vpop.f32.mrf.mxu3 }
 0x274   : > { %3474 = vst [vmem:[#allocation2 + $0x30] sm:$0x1] %v3473_v35  ;;  %v3271_v55 = vshrl.u32 %v3172_v38, 16  ;;  %v3109_v27 = vadd.f32 %v3075_v21, %v2815_v8  ;;  %v3274_v17 = vshll.u32 %v3172_v38, 16  ;;  %v2364_v8 = vadd.f32 %v2335_v24, %v2139_v40  ;;  %v2115_v21 = vpop.f32.mrf.mxu1 }
 0x275   : > { %3424 = vst [vmem:[#allocation2 + $0x38] sm:$0x1] %v3423_v47  ;;  %v3432_v47 = vld [vmem:[#allocation2 + $0x48] sm:$0xf]  ;;  %v2140_v35 = vadd.f32 %v2112_v41, %v9106_v0  ;;  %v2141_v25 = vadd.f32 %v2115_v21, %v9110_v57 }
 0x276   : > { %v3273_v56 = vrot.slane %v3271_v55, 7  ;;  %v3133_v48 = vadd.f32 %v9151_v5, %v3109_v27  ;;  %v2818_v55 = vadd.f32 %v2789_v3, %v2364_v8 }
 0x278   : > { %v3276_v62 = vor.u32 %v3274_v17, %v3273_v56  ;;  %v3153_v42 = vmax.f32 %v3133_v48, 0.0  ;;  %v3277_v22 = vrot.slane %v3273_v56, 4 }
 0x27a   : > { %v3426_v36 = vsel %vm9172_vm8, %v3276_v62, %v3425_v45  ;;  %v3173_v53 = vpack.c.bf16 %v3153_v42, %v3153_v42  ;;  %v2365_v45 = vadd.f32 %v2337_v19, %v2140_v35  ;;  %v2340_v62 = vpop.f32.mrf.mxu2  ;;  %v3443_v35 = vld [vmem:[#allocation2 + $0x5c] sm:$0x1] }
 0x27b   : > { %3427 = vst [vmem:[#allocation2 + $0x3c] sm:$0xf] %v3426_v36  ;;  %v3078_v9 = vpop.f32.mrf.mxu0 }
 0x27c   : > { %v3503_v30 = vld [vmem:[#allocation2 + $0x38] sm:$0x1]  ;;  %v3279_v12 = vshrl.u32 %v3173_v53, 16  ;;  %v3110_v52 = vadd.f32 %v3078_v9, %v2816_v60  ;;  %v3282_v1 = vshll.u32 %v3173_v53, 16  ;;  %v3436_v60 = vld [vmem:[#allocation2 + $0x50] sm:$0x1] }
 0x27d   : > { %v3504_v63 = vsel %vm9221_vm14, 0, %v3503_v30 }
 0x27e   : > { %3505 = vst [vmem:[#allocation2 + $0x38] sm:$0x1] %v3504_v63  ;;  %v3281_v4 = vrot.slane %v3279_v12, 7  ;;  %v3134_v29 = vadd.f32 %v9151_v5, %v3110_v52  ;;  %v2819_v12 = vadd.f32 %v2791_v37, %v2365_v45  ;;  %v2794_v52 = vpop.f32.mrf.mxu3 }
 0x280   : > { %v3284_v10 = vor.u32 %v3282_v1, %v3281_v4  ;;  %v3286_v23 = vrot.slane %v3281_v4, 4  ;;  %v3154_v58 = vmax.f32 %v3134_v29, 0.0  ;;  %v2117_v29 = vpop.f32.mrf.mxu1 }
 0x282   : > { %v3475_v46 = vld [vmem:[#allocation2 + $0x3c] sm:$0x1]  ;;  %v3285_v11 = vsel %vm9195_vm13, %v3277_v22, %v3284_v10  ;;  %v3430_v44 = vsel %vm9187_vm12, %v3286_v23, %v3429_v34  ;;  %v3174_v59 = vpack.c.bf16 %v3154_v58, %v3154_v58  ;;  %v2366_v23 = vadd.f32 %v2340_v62, %v2141_v25  ;;  %v2342_v40 = vpop.f32.mrf.mxu2 }
 0x283   : > { %v3476_v39 = vsel %vm9187_vm12, 0, %v3475_v46  ;;  %3428 = vst [vmem:[#allocation2 + $0x40] sm:$0xf] %v3285_v11  ;;  %v3080_v26 = vpop.f32.mrf.mxu0  ;;  %v3439_v46 = vld [vmem:[#allocation2 + $0x54] sm:$0xf] }
 0x284   : > { %3477 = vst [vmem:[#allocation2 + $0x3c] sm:$0x1] %v3476_v39  ;;  %v3288_v43 = vshrl.u32 %v3174_v59, 16  ;;  %v3111_v13 = vadd.f32 %v3080_v26, %v2817_v28  ;;  %v3291_v6 = vshll.u32 %v3174_v59, 16  ;;  %v2142_v59 = vadd.f32 %v2117_v29, %v9119_v50 }
 0x285   : > { %3431 = vst [vmem:[#allocation2 + $0x44] sm:$0x1] %v3430_v44  ;;  %v2820_v19 = vadd.f32 %v2794_v52, %v2366_v23  ;;  %v3446_v52 = vld [vmem:[#allocation2 + $0x60] sm:$0xf] }
 0x286   : > { %v3290_v33 = vrot.slane %v3288_v43, 7  ;;  %v3135_v54 = vadd.f32 %v9151_v5, %v3111_v13  ;;  %v2796_v43 = vpop.f32.mrf.mxu3 }
 0x288   : > { %v3293_v38 = vor.u32 %v3291_v6, %v3290_v33  ;;  %v3155_v61 = vmax.f32 %v3135_v54, 0.0  ;;  %v3294_v36 = vrot.slane %v3290_v33, 4  ;;  %v2367_v54 = vadd.f32 %v2342_v40, %v2142_v59  ;;  %v2120_v37 = vpop.f32.mrf.mxu1 }
 0x28a   : > { %v3433_v27 = vsel %vm9172_vm8, %v3293_v38, %v3432_v47  ;;  %v3175_v31 = vpack.c.bf16 %v3155_v61, %v3155_v61 }
 0x28b   : > { %3434 = vst [vmem:[#allocation2 + $0x48] sm:$0xf] %v3433_v27  ;;  %v3083_v51 = vpop.f32.mrf.mxu0 }
 0x28c   : > { %v3506_v56 = vld [vmem:[#allocation2 + $0x44] sm:$0x1]  ;;  %v3296_v17 = vshrl.u32 %v3175_v31, 16  ;;  %v3112_v48 = vadd.f32 %v3083_v51, %v2818_v55  ;;  %v3299_v24 = vshll.u32 %v3175_v31, 16  ;;  %v2821_v51 = vadd.f32 %v2796_v43, %v2367_v54 }
 0x28d   : > { %v3507_v42 = vsel %vm9221_vm14, 0, %v3506_v56  ;;  %v2345_v56 = vpop.f32.mrf.mxu2 }
 0x28e   : > { %3508 = vst [vmem:[#allocation2 + $0x44] sm:$0x1] %v3507_v42  ;;  %v3298_v2 = vrot.slane %v3296_v17, 7  ;;  %v3136_v0 = vadd.f32 %v9151_v5, %v3112_v48  ;;  %v2143_v17 = vadd.f32 %v2120_v37, %v9127_v20 }
 0x290   : > { %v3301_v53 = vor.u32 %v3299_v24, %v3298_v2  ;;  %v3303_v9 = vrot.slane %v3298_v2, 4  ;;  %v3156_v30 = vmax.f32 %v3136_v0, 0.0 }
 0x292   : > { %v3478_v3 = vld [vmem:[#allocation2 + $0x48] sm:$0x1]  ;;  %v3302_v63 = vsel %vm9195_vm13, %v3294_v36, %v3301_v53  ;;  %v3437_v4 = vsel %vm9187_vm12, %v3303_v9, %v3436_v60  ;;  %v3176_v1 = vpack.c.bf16 %v3156_v30, %v3156_v30  ;;  %v2799_v36 = vpop.f32.mrf.mxu3  ;;  %v2368_v53 = vadd.f32 %v2345_v56, %v2143_v17 }
 0x293   : > { %v3479_v41 = vsel %vm9187_vm12, 0, %v3478_v3  ;;  %3435 = vst [vmem:[#allocation2 + $0x4c] sm:$0xf] %v3302_v63  ;;  %v3085_v34 = vpop.f32.mrf.mxu0 }
 0x294   : > { %3480 = vst [vmem:[#allocation2 + $0x48] sm:$0x1] %v3479_v41  ;;  %v3305_v22 = vshrl.u32 %v3176_v1, 16  ;;  %v3113_v10 = vadd.f32 %v3085_v34, %v2819_v12  ;;  %v3308_v58 = vshll.u32 %v3176_v1, 16  ;;  %v2122_v12 = vpop.f32.mrf.mxu1  ;;  %v2822_v63 = vadd.f32 %v2799_v36, %v2368_v53 }
 0x295   : > { %3438 = vst [vmem:[#allocation2 + $0x50] sm:$0x1] %v3437_v4  ;;  %v2144_v4 = vadd.f32 %v2122_v12, %v9141_v49  ;;  %v2347_v41 = vpop.f32.mrf.mxu2 }
 0x296   : > { %v3307_v57 = vrot.slane %v3305_v22, 7  ;;  %v3137_v28 = vadd.f32 %v9151_v5, %v3113_v10 }
 0x298   : > { %v3310_v11 = vor.u32 %v3308_v58, %v3307_v57  ;;  %v3157_v44 = vmax.f32 %v3137_v28, 0.0  ;;  %v3311_v21 = vrot.slane %v3307_v57, 4  ;;  %v2369_v58 = vadd.f32 %v2347_v41, %v2144_v4 }
 0x29a   : > { %v3440_v39 = vsel %vm9172_vm8, %v3310_v11, %v3439_v46  ;;  %v3177_v26 = vpack.c.bf16 %v3157_v44, %v3157_v44  ;;  %v2801_v49 = vpop.f32.mrf.mxu3  ;;  %v3450_v11 = vld [vmem:[#allocation2 + $0x68] sm:$0x1] }
 0x29b   : > { %3441 = vst [vmem:[#allocation2 + $0x54] sm:$0xf] %v3440_v39  ;;  %v3088_v13 = vpop.f32.mrf.mxu0 }
 0x29c   : > { %v3509_v8 = vld [vmem:[#allocation2 + $0x50] sm:$0x1]  ;;  %v3313_v33 = vshrl.u32 %v3177_v26, 16  ;;  %v3114_v6 = vadd.f32 %v3088_v13, %v2820_v19  ;;  %v3316_v61 = vshll.u32 %v3177_v26, 16  ;;  %v2823_v26 = vadd.f32 %v2801_v49, %v2369_v58 }
 0x29d   : > { %v3510_v47 = vsel %vm9221_vm14, 0, %v3509_v8 }
 0x29e   : > { %3511 = vst [vmem:[#allocation2 + $0x50] sm:$0x1] %v3510_v47  ;;  %v3315_v38 = vrot.slane %v3313_v33, 7  ;;  %v3138_v50 = vadd.f32 %v9151_v5, %v3114_v6 }
 0x2a0   : > { %v3318_v55 = vor.u32 %v3316_v61, %v3315_v38  ;;  %v3320_v27 = vrot.slane %v3315_v38, 4  ;;  %v3158_v31 = vmax.f32 %v3138_v50, 0.0 }
 0x2a2   : > { %v3481_v48 = vld [vmem:[#allocation2 + $0x54] sm:$0x1]  ;;  %v3319_v45 = vsel %vm9195_vm13, %v3311_v21, %v3318_v55  ;;  %v3444_v62 = vsel %vm9187_vm12, %v3320_v27, %v3443_v35  ;;  %v3178_v42 = vpack.c.bf16 %v3158_v31, %v3158_v31  ;;  %v3453_v35 = vld [vmem:[#allocation2 + $0x6c] sm:$0xf] }
 0x2a3   : > { %v3482_v2 = vsel %vm9187_vm12, 0, %v3481_v48  ;;  %3442 = vst [vmem:[#allocation2 + $0x58] sm:$0xf] %v3319_v45  ;;  %v3090_v24 = vpop.f32.mrf.mxu0 }
 0x2a4   : > { %3483 = vst [vmem:[#allocation2 + $0x54] sm:$0x1] %v3482_v2  ;;  %v3322_v0 = vshrl.u32 %v3178_v42, 16  ;;  %v3115_v60 = vadd.f32 %v3090_v24, %v2821_v51  ;;  %v3325_v9 = vshll.u32 %v3178_v42, 16 }
 0x2a5   : > { %3445 = vst [vmem:[#allocation2 + $0x5c] sm:$0x1] %v3444_v62  ;;  %v3457_v62 = vld [vmem:[#allocation2 + $0x74] sm:$0x1] }
 0x2a6   : > { %v3324_v20 = vrot.slane %v3322_v0, 7  ;;  %v3139_v30 = vadd.f32 %v9151_v5, %v3115_v60 }
 0x2a8   : > { %v3327_v25 = vor.u32 %v3325_v9, %v3324_v20  ;;  %v3159_v3 = vmax.f32 %v3139_v30, 0.0  ;;  %v3328_v44 = vrot.slane %v3324_v20, 4 }
 0x2aa   : > { %v3447_v1 = vsel %vm9172_vm8, %v3327_v25, %v3446_v52  ;;  %v3179_v29 = vpack.c.bf16 %v3159_v3, %v3159_v3 }
 0x2ab   : > { %3448 = vst [vmem:[#allocation2 + $0x60] sm:$0xf] %v3447_v1  ;;  %v3093_v34 = vpop.f32.mrf.mxu0 }
 0x2ac   : > { %v3512_v22 = vld [vmem:[#allocation2 + $0x5c] sm:$0x1]  ;;  %v3330_v10 = vshrl.u32 %v3179_v29, 16  ;;  %v3116_v23 = vadd.f32 %v3093_v34, %v2822_v63  ;;  %v3333_v40 = vshll.u32 %v3179_v29, 16 }
 0x2ad   : > { %v3513_v57 = vsel %vm9221_vm14, 0, %v3512_v22 }
 0x2ae   : > { %3514 = vst [vmem:[#allocation2 + $0x5c] sm:$0x1] %v3513_v57  ;;  %v3332_v28 = vrot.slane %v3330_v10, 7  ;;  %v3140_v46 = vadd.f32 %v9151_v5, %v3116_v23 }
 0x2b0   : > { %v3335_v59 = vor.u32 %v3333_v40, %v3332_v28  ;;  %v3337_v19 = vrot.slane %v3332_v28, 4  ;;  %v3160_v39 = vmax.f32 %v3140_v46, 0.0 }
 0x2b2   : > { %v3484_v43 = vld [vmem:[#allocation2 + $0x60] sm:$0x1]  ;;  %v3336_v13 = vsel %vm9195_vm13, %v3328_v44, %v3335_v59  ;;  %v3451_v8 = vsel %vm9187_vm12, %v3337_v19, %v3450_v11  ;;  %v3180_v33 = vpack.c.bf16 %v3160_v39, %v3160_v39 }
 0x2b3   : > { %v3485_v6 = vsel %vm9187_vm12, 0, %v3484_v43  ;;  %3449 = vst [vmem:[#allocation2 + $0x64] sm:$0xf] %v3336_v13  ;;  %v3095_v54 = vpop.f32.mrf.mxu0 }
 0x2b4   : > { %3486 = vst [vmem:[#allocation2 + $0x60] sm:$0x1] %v3485_v6  ;;  %v3339_v37 = vshrl.u32 %v3180_v33, 16  ;;  %v3117_v47 = vadd.f32 %v3095_v54, %v2823_v26  ;;  %v3342_v61 = vshll.u32 %v3180_v33, 16 }
 0x2b5   : > { %3452 = vst [vmem:[#allocation2 + $0x68] sm:$0x1] %v3451_v8 }
 0x2b6   : > { %v3341_v38 = vrot.slane %v3339_v37, 7  ;;  %v3141_v50 = vadd.f32 %v9151_v5, %v3117_v47 }
 0x2b8   : > { %v3344_v21 = vor.u32 %v3342_v61, %v3341_v38  ;;  %v3161_v55 = vmax.f32 %v3141_v50, 0.0  ;;  %v3345_v42 = vrot.slane %v3341_v38, 4 }
 0x2ba   : > { %v3454_v27 = vsel %vm9172_vm8, %v3344_v21, %v3453_v35  ;;  %v3181_v31 = vpack.c.bf16 %v3161_v55, %v3161_v55 }
 0x2bb   : > { %3455 = vst [vmem:[#allocation2 + $0x6c] sm:$0xf] %v3454_v27 }
 0x2bc   : > { %v3515_v51 = vld [vmem:[#allocation2 + $0x68] sm:$0x1]  ;;  %v3347_v56 = vshrl.u32 %v3181_v31, 16  ;;  %v3350_v45 = vshll.u32 %v3181_v31, 16 }
 0x2bd   : > { %v3516_v17 = vsel %vm9221_vm14, 0, %v3515_v51 }
 0x2be   : > { %3517 = vst [vmem:[#allocation2 + $0x68] sm:$0x1] %v3516_v17  ;;  %v3349_v48 = vrot.slane %v3347_v56, 7 }
 0x2c0   : > { %v3352_v2 = vor.u32 %v3350_v45, %v3349_v48  ;;  %v3354_v5 = vrot.slane %v3349_v48, 4 }
 0x2c2   : > { %v3487_v24 = vld [vmem:[#allocation2 + $0x6c] sm:$0x1]  ;;  %v3353_v0 = vsel %vm9195_vm13, %v3345_v42, %v3352_v2  ;;  %v3458_v16 = vsel %vm9187_vm12, %v3354_v5, %v3457_v62 }
 0x2c3   : > { %v3488_v60 = vsel %vm9187_vm12, 0, %v3487_v24  ;;  %3456 = vst [vmem:[#allocation2 + $0x70] sm:$0xf] %v3353_v0 }
 0x2c4   : > { %3489 = vst [vmem:[#allocation2 + $0x6c] sm:$0x1] %v3488_v60 }
 0x2c5   : > { %3459 = vst [vmem:[#allocation2 + $0x74] sm:$0x1] %v3458_v16 }
 0x2ca   : > { %3524 = sbr.rel (%p7042_p8) target bundleno = 723 (0x2d3), region = 44 }
 0x2cc   : > { %v3518_v36 = vld [vmem:[#allocation2 + $0x74] sm:$0x1] }
 0x2cd   : > { %v3519_v53 = vsel %vm9221_vm14, 0, %v3518_v36 }
 0x2ce   : > { %3520 = vst [vmem:[#allocation2 + $0x74] sm:$0x1] %v3519_v53 }
 0x2cf   : > { %v7914_v20 = vmov 0  }
 0x2d0   : > { %3525 = vst [vmem:[#allocation2] sm:$0xf] %v7914_v20 }
 0x2d1   : > { %3526 = vst [vmem:[#allocation2 + $0x4] sm:$0xf] %v7914_v20 }
 0x2d2   : > { %3527 = vst [vmem:[#allocation2 + $0x8] sm:$0x1] %v7914_v20 }
 0x2d3 PF: > { %p7043_p9 = scmp.ne.s32.totalorder %s7896_s18, 1 }
 0x2d5   : > { %3531 = sbr.rel (%p7043_p9) target bundleno = 734 (0x2de), region = 48 }
 0x2da   : > { %v7915_v7 = vmov 0  }
 0x2db   : > { %3533 = vst [vmem:[#allocation2 + $0x6c] sm:$0xf] %v7915_v7 }
 0x2dc   : > { %3534 = vst [vmem:[#allocation2 + $0x70] sm:$0xf] %v7915_v7 }
 0x2dd   : > { %3535 = vst [vmem:[#allocation2 + $0x74] sm:$0x1] %v7915_v7 }
 0x2de PF: > { %v7731_v15 = vld [vmem:[%s10042_s3 + $0x78] sm:$0xff]  ;;  %v7730_v30 = vld [vmem:[%s10042_s3 + $0x70] sm:$0xff]  ;;  %v7729_v25 = vld [vmem:[%s10042_s3 + $0x68] sm:$0xff] }
 0x2df   : > { %v7723_v18 = vld [vmem:[%s10042_s3 + $0x38] sm:$0xff]  ;;  %3865 = vmatpush.bf16.msra.mxu1 %v7731_v15  ;;  %v7722_v12 = vld [vmem:[%s10042_s3 + $0x30] sm:$0xff]  ;;  %v7721_v3 = vld [vmem:[%s10042_s3 + $0x28] sm:$0xff] }
 0x2e0   : > { %v7739_v9 = vld [vmem:[%s10042_s3 + $0xb8] sm:$0xff]  ;;  %4010 = vmatpush.bf16.msra.mxu2 %v7723_v18  ;;  %v7738_v52 = vld [vmem:[%s10042_s3 + $0xb0] sm:$0xff]  ;;  %v7737_v63 = vld [vmem:[%s10042_s3 + $0xa8] sm:$0xff] }
 0x2e1   : > { %4236 = vmatpush.bf16.msrb.mxu3 %v7739_v9  ;;  %v3536_v4 = vld [vmem:[#allocation2] sm:$0xf]  ;;  %v3537_v1 = vld [vmem:[#allocation2 + $0x4] sm:$0xf]  ;;  %v3568_v58 = vld [vmem:[#allocation2 + $0x8] sm:$0x1] }
 0x2e2   : > { %v3577_v29 = vshrl.u32 %v3536_v4, 16  ;;  %v3580_v41 = vshll.u32 %v3536_v4, 16  ;;  %v3586_v34 = vshll.u32 %v3537_v1, 16  ;;  %v3590_v22 = vshrl.u32 %v3537_v1, 16  ;;  %v7728_v10 = vld [vmem:[%s10042_s3 + $0x60] sm:$0xff]  ;;  %v7727_v11 = vld [vmem:[%s10042_s3 + $0x58] sm:$0xff] }
 0x2e3   : > { %3866 = vmatpush.bf16.msra.mxu1 %v7730_v30  ;;  %v7720_v23 = vld [vmem:[%s10042_s3 + $0x20] sm:$0xff]  ;;  %v7719_v44 = vld [vmem:[%s10042_s3 + $0x18] sm:$0xff]  ;;  %v3596_v39 = vshll.u32 %v3568_v58, 16  ;;  %v4085_v13 = vrot.slane %v3537_v1, 5  ;;  %v7726_v8 = vld [vmem:[%s10042_s3 + $0x50] sm:$0xff]  ;;  %v4088_v21 = vrot.slane %v3568_v58, 5 }
 0x2e4   : > { %4011 = vmatpush.bf16.msra.mxu2 %v7722_v12  ;;  %v7736_v57 = vld [vmem:[%s10042_s3 + $0xa0] sm:$0xff]  ;;  %v3579_v28 = vrot.slane %v3577_v29, 4  ;;  %v3582_v40 = vrot.slane %v3580_v41, 5  ;;  %v3588_v46 = vrot.slane %v3586_v34, 5  ;;  %v3592_v49 = vrot.slane %v3590_v22, 4  ;;  %v7735_v26 = vld [vmem:[%s10042_s3 + $0x98] sm:$0xff] }
 0x2e5   : > { %4237 = vmatpush.bf16.msrb.mxu3 %v7738_v52  ;;  %v4059_v43 = vld [vmem:[#allocation2] sm:$0xe]  ;;  %v7718_v33 = vld [vmem:[%s10042_s3 + $0x10] sm:$0xff]  ;;  %v3538_v6 = vld [vmem:[#allocation2 + $0xc] sm:$0xf]  ;;  %v3598_v47 = vrot.slane %v3596_v39, 5 }
 0x2e6   : > { %v3583_v59 = vor.u32 %v3582_v40, %v3579_v28  ;;  %v3593_v19 = vor.u32 %v3592_v49, %v3588_v46  ;;  %v7156_v38 = vrot.slane %v4059_v43, 9  ;;  %v9418_v61 = vld [vmem:[#allocation2 + $0x10] sm:$0xf]  ;;  %v4087_v35 = vrot.slane %v4085_v13, 4  ;;  %v7725_v51 = vld [vmem:[%s10042_s3 + $0x48] sm:$0xff]  ;;  %v7724_v60 = vld [vmem:[%s10042_s3 + $0x40] sm:$0xff] }
 0x2e7   : > { %3867 = vmatpush.bf16.msra.mxu1 %v7729_v25  ;;  %v7734_v50 = vld [vmem:[%s10042_s3 + $0x90] sm:$0xff]  ;;  %v3601_v55 = vshrl.u32 %v3538_v6, 16  ;;  %v3604_v27 = vshll.u32 %v3538_v6, 16  ;;  %v3610_v31 = vshll.u32 %v9418_v61, 16  ;;  %v7717_v56 = vld [vmem:[%s10042_s3 + $0x8] sm:$0xff]  ;;  %v3614_v62 = vshrl.u32 %v9418_v61, 16 }
 0x2e8   : > { %4012 = vmatpush.bf16.msra.mxu2 %v7721_v3  ;;  %v3584_v54 = vrot.slane %v3583_v59, 4  ;;  %v3594_v37 = vrot.slane %v3593_v19, 4  ;;  %v4086_v45 = vsel %vm8134_vm5, %v7156_v38, %v4085_v13  ;;  %v7733_v42 = vld [vmem:[%s10042_s3 + $0x88] sm:$0xff]  ;;  %v4089_v2 = vsel %vm8134_vm5, %v4087_v35, %v4088_v21  ;;  %v7716_v36 = vld [vmem:[%s10042_s3] sm:$0xff]  ;;  %v7763_v9 = vld [vmem:[%s10042_s3 + $0x138] sm:$0xff] }
 0x2e9   : > { %4238 = vmatpush.bf16.msrb.mxu3 %v7737_v63  ;;  %v4156_v0 = vunpack.c.l.b16 %v4086_v45  ;;  %v3603_v16 = vrot.slane %v3601_v55, 4  ;;  %v4157_v53 = vunpack.c.l.b16 %v4089_v2  ;;  %v3606_v20 = vrot.slane %v3604_v27, 5  ;;  %v7732_v18 = vld [vmem:[%s10042_s3 + $0x80] sm:$0xff]  ;;  %v3569_v30 = vld [vmem:[#allocation2 + $0x14] sm:$0x1]  ;;  %v7755_v12 = vld [vmem:[%s10042_s3 + $0xf8] sm:$0xff] }
 0x2ea   : > { %v3589_v17 = vsel %vm8049_vm2, %v3584_v54, %v3588_v46  ;;  %v3599_v48 = vsel %vm8049_vm2, %v3594_v37, %v3598_v47  ;;  %v3612_v7 = vrot.slane %v3610_v31, 5  ;;  %v3616_v15 = vrot.slane %v3614_v62, 4  ;;  %v7708_v25 = vld [vmem:[#allocation2] sm:$0xff]  ;;  %v7762_v29 = vld [vmem:[%s10042_s3 + $0x130] sm:$0xff]  ;;  %v4060_v34 = vld [vmem:[#allocation2 + $0xc] sm:$0xe] }
 0x2eb   : > { %3868 = vmatpush.bf16.msra.mxu1 %v7728_v10  ;;  %v3785_v5 = vunpack.c.l.b16 %v3589_v17  ;;  %v3786_v24 = vunpack.c.l.b16 %v3599_v48  ;;  %v4172_v3 = vpack.c.b16 %v4157_v53, %v4156_v0  ;;  %v3607_v63 = vor.u32 %v3606_v20, %v3603_v16  ;;  %v7754_v22 = vld [vmem:[%s10042_s3 + $0xf0] sm:$0xff]  ;;  %v3540_v10 = vld [vmem:[#allocation2 + $0x18] sm:$0xf]  ;;  %v3541_v28 = vld [vmem:[#allocation2 + $0x1c] sm:$0xf] }
 0x2ec   : > { %4013 = vmatpush.bf16.msra.mxu2 %v7720_v23  ;;  %v3617_v4 = vor.u32 %v3616_v15, %v3612_v7  ;;  %v3620_v1 = vshll.u32 %v3569_v30, 16  ;;  %v4092_v41 = vrot.slane %v9418_v61, 5  ;;  %v7157_v40 = vrot.slane %v4060_v34, 9  ;;  %v7753_v19 = vld [vmem:[%s10042_s3 + $0xe8] sm:$0xff]  ;;  %v3570_v38 = vld [vmem:[#allocation2 + $0x20] sm:$0x1] }
 0x2ed   : > { %4239 = vmatpush.bf16.msrb.mxu3 %v7736_v57  ;;  %v3801_v52 = vpack.c.b16 %v3786_v24, %v3785_v5  ;;  %v3608_v23 = vrot.slane %v3607_v63, 4  ;;  %v4095_v49 = vrot.slane %v3569_v30, 5  ;;  %v3628_v59 = vshll.u32 %v3540_v10, 16  ;;  %v4061_v45 = vld [vmem:[#allocation2 + $0x18] sm:$0xe]  ;;  %v7760_v16 = vld [vmem:[%s10042_s3 + $0x120] sm:$0xff] }
 0x2ee   : > { %v3618_v57 = vrot.slane %v3617_v4, 4  ;;  %v3622_v58 = vrot.slane %v3620_v1, 5  ;;  %v4094_v46 = vrot.slane %v4092_v41, 4  ;;  %v3634_v39 = vshll.u32 %v3541_v28, 16  ;;  %v3543_v53 = vld [vmem:[#allocation2 + $0x28] sm:$0xf] }
 0x2ef   : > { %3869 = vmatpush.bf16.msra.mxu1 %v7727_v11  ;;  %v7761_v11 = vld [vmem:[%s10042_s3 + $0x128] sm:$0xff]  ;;  %v3613_v43 = vsel %vm8049_vm2, %v3608_v23, %v3612_v7  ;;  %v3630_v54 = vrot.slane %v3628_v59, 5  ;;  %v3644_v27 = vshll.u32 %v3570_v38, 16  ;;  %v4099_v17 = vrot.slane %v3541_v28, 5  ;;  %v7710_v23 = vld [vmem:[#allocation2 + $0x18] sm:$0xff] }
 0x2f0   : > { %4014 = vmatpush.bf16.msra.mxu2 %v7719_v44  ;;  %v3625_v44 = vshrl.u32 %v3540_v10, 16  ;;  %v3623_v13 = vsel %vm8049_vm2, %v3618_v57, %v3622_v58  ;;  %v3787_v37 = vunpack.c.l.b16 %v3613_v43  ;;  %v3636_v61 = vrot.slane %v3634_v39, 5  ;;  %v7751_v43 = vld [vmem:[%s10042_s3 + $0xd8] sm:$0xff] }
 0x2f1   : > { %4240 = vmatpush.bf16.msrb.mxu3 %v7735_v26  ;;  %v3638_v26 = vshrl.u32 %v3541_v28, 16  ;;  %v3788_v47 = vunpack.c.l.b16 %v3623_v13  ;;  %v7158_v5 = vrot.slane %v4061_v45, 9  ;;  %v4101_v24 = vrot.slane %v4099_v17, 4 }
 0x2f2   : > { %v3627_v6 = vrot.slane %v3625_v44, 4  ;;  %v4102_v0 = vrot.slane %v3570_v38, 5  ;;  %v7759_v44 = vld [vmem:[%s10042_s3 + $0x118] sm:$0xff] }
 0x2f3   : > { %3870 = vmatpush.bf16.msra.mxu1 %v7726_v8  ;;  %v4093_v8 = vsel %vm8134_vm5, %v7157_v40, %v4092_v41  ;;  %v3802_v31 = vpack.c.b16 %v3788_v47, %v3787_v37  ;;  %v4100_v15 = vsel %vm8134_vm5, %v7158_v5, %v4099_v17  ;;  %v7711_v5 = vld [vmem:[#allocation2 + $0x24] sm:$0xff] }
 0x2f4   : > { %4015 = vmatpush.bf16.msra.mxu2 %v7718_v33  ;;  %v4096_v33 = vsel %vm8134_vm5, %v4094_v46, %v4095_v49  ;;  %v4158_v35 = vunpack.c.l.b16 %v4093_v8  ;;  %v3631_v55 = vor.u32 %v3630_v54, %v3627_v6  ;;  %v4160_v63 = vunpack.c.l.b16 %v4100_v15  ;;  %v4062_v49 = vld [vmem:[#allocation2 + $0x24] sm:$0xe] }
 0x2f5   : > { %4241 = vmatpush.bf16.msrb.mxu3 %v7734_v50  ;;  %v3640_v50 = vrot.slane %v3638_v26, 4  ;;  %v4159_v21 = vunpack.c.l.b16 %v4096_v33  ;;  %v4106_v46 = vrot.slane %v3543_v53, 5  ;;  %v3545_v26 = vld [vmem:[#allocation2 + $0x34] sm:$0xf]  ;;  %v7159_v13 = vrot.slane %v4062_v49, 9 }
 0x2f6   : > { %v3632_v62 = vrot.slane %v3631_v55, 4  ;;  %v3682_v37 = vshll.u32 %v3545_v26, 16  ;;  %v3686_v47 = vshrl.u32 %v3545_v26, 16 }
 0x2f7   : > { %3871 = vmatpush.bf16.msra.mxu1 %v7725_v51  ;;  %v7709_v51 = vld [vmem:[#allocation2 + $0xc] sm:$0xff]  ;;  %v4173_v48 = vpack.c.b16 %v4159_v21, %v4158_v35  ;;  %v4108_v8 = vrot.slane %v4106_v46, 4 }
 0x2f8   : > { %4016 = vmatpush.bf16.msra.mxu2 %v7717_v56  ;;  %v3641_v56 = vor.u32 %v3640_v50, %v3636_v61  ;;  %v3637_v20 = vsel %vm8049_vm2, %v3632_v62, %v3636_v61  ;;  %v4107_v50 = vsel %vm8134_vm5, %v7159_v13, %v4106_v46  ;;  %v3688_v17 = vrot.slane %v3686_v47, 4  ;;  %v4064_v13 = vld [vmem:[#allocation2 + $0x3c] sm:$0xe]  ;;  %v9523_v47 = vld [vmem:[#allocation2 + $0x4c] sm:$0xf] }
 0x2f9   : > { %4242 = vmatpush.bf16.msrb.mxu3 %v7733_v42  ;;  %v3646_v42 = vrot.slane %v3644_v27, 5 }
 0x2fa   : > { %v3642_v2 = vrot.slane %v3641_v56, 4  ;;  %v3684_v56 = vrot.slane %v3682_v37, 5 }
 0x2fb   : > { %3872 = vmatpush.bf16.msra.mxu1 %v7724_v60  ;;  %v7752_v60 = vld [vmem:[%s10042_s3 + $0xe0] sm:$0xff] }
 0x2fc   : > { %4017 = vmatpush.bf16.msra.mxu2 %v7716_v36  ;;  %v3542_v36 = vld [vmem:[#allocation2 + $0x24] sm:$0xf]  ;;  %v3647_v7 = vsel %vm8049_vm2, %v3642_v2, %v3646_v42 }
 0x2fd   : > { %4243 = vmatpush.bf16.msrb.mxu3 %v7732_v18  ;;  %v4103_v18 = vsel %vm8134_vm5, %v4101_v24, %v4102_v0  ;;  %v3652_v30 = vshll.u32 %v3542_v36, 16  ;;  %v3689_v24 = vor.u32 %v3688_v17, %v3684_v56  ;;  %v4113_v0 = vrot.slane %v3545_v26, 5 }
 0x2fe   : > { %3873 = vmatmul.bf16.vlgmr.msra.gmra.mxu1 %v3801_v52  ;;  %v3662_v52 = vshrl.u32 %v3543_v53, 16  ;;  %v4161_v4 = vunpack.c.l.b16 %v4103_v18  ;;  %v3734_v17 = vshrl.u32 %v9523_v47, 16 }
 0x2ff   : > { %4431 = vmatpush.bf16.msrb.mxu1 %v7755_v12  ;;  %4018 = vmatmul.bf16.vlgmr.msra.gmra.mxu2 %v7708_v25  ;;  %v3658_v12 = vshll.u32 %v3543_v53, 16  ;;  %v3789_v25 = vunpack.c.l.b16 %v3637_v20  ;;  %v3690_v20 = vrot.slane %v3689_v24, 4  ;;  %v4115_v15 = vrot.slane %v4113_v0, 4 }
 0x300   : > { %4809 = vmatpush.bf16.msrb.mxu2 %v7763_v9  ;;  %4244 = vmatmul.bf16.vlgmr.msrb.gmra.mxu3 %v4172_v3  ;;  %v3649_v9 = vshrl.u32 %v3542_v36, 16  ;;  %v3790_v3 = vunpack.c.l.b16 %v3647_v7  ;;  %v3664_v34 = vrot.slane %v3662_v52, 4  ;;  %v4174_v57 = vpack.c.b16 %v4161_v4, %v4160_v63  ;;  %v3547_v52 = vld [vmem:[#allocation2 + $0x40] sm:$0xf] }
 0x301   : > { %v3660_v41 = vrot.slane %v3658_v12, 5  ;;  %v3546_v12 = vld [vmem:[#allocation2 + $0x3c] sm:$0xf] }
 0x302   : > { %v3651_v1 = vrot.slane %v3649_v9, 4  ;;  %v3803_v10 = vpack.c.b16 %v3790_v3, %v3789_v25  ;;  %v7758_v9 = vld [vmem:[%s10042_s3 + $0x110] sm:$0xff] }
 0x303   : > { %4432 = vmatpush.bf16.msrb.mxu1 %v7754_v22  ;;  %v3571_v22 = vld [vmem:[#allocation2 + $0x2c] sm:$0x1]  ;;  %v3665_v28 = vor.u32 %v3664_v34, %v3660_v41  ;;  %v3710_v34 = vshrl.u32 %v3547_v52, 16 }
 0x304   : > { %4810 = vmatpush.bf16.msrb.mxu2 %v7762_v29  ;;  %v3654_v29 = vrot.slane %v3652_v30, 5  ;;  %v3668_v40 = vshll.u32 %v3571_v22, 16  ;;  %v4109_v33 = vrot.slane %v3571_v22, 5  ;;  %v7750_v30 = vld [vmem:[%s10042_s3 + $0xd0] sm:$0xff] }
 0x305   : > { %v3712_v49 = vrot.slane %v3710_v34, 4 }
 0x306   : > { %v3655_v58 = vor.u32 %v3654_v29, %v3651_v1  ;;  %v3670_v39 = vrot.slane %v3668_v40, 5  ;;  %v4110_v35 = vsel %vm8134_vm5, %v4108_v8, %v4109_v33  ;;  %v3697_v1 = vshrl.u32 %v3546_v12, 16  ;;  %v3548_v33 = vld [vmem:[#allocation2 + $0x48] sm:$0xf] }
 0x307   : > { %4433 = vmatpush.bf16.msrb.mxu1 %v7753_v19  ;;  %v3666_v19 = vrot.slane %v3665_v28, 4  ;;  %v4163_v45 = vunpack.c.l.b16 %v4110_v35  ;;  %v3700_v29 = vshll.u32 %v3546_v12, 16 }
 0x308   : > { %4811 = vmatpush.bf16.msrb.mxu2 %v7761_v11  ;;  %v3544_v11 = vld [vmem:[#allocation2 + $0x30] sm:$0xf]  ;;  %v3656_v59 = vrot.slane %v3655_v58, 4  ;;  %v3573_v58 = vld [vmem:[#allocation2 + $0x44] sm:$0x1]  ;;  %v3699_v28 = vrot.slane %v3697_v1, 4 }
 0x309   : > { %v3673_v6 = vshrl.u32 %v3544_v11, 16  ;;  %v3676_v54 = vshll.u32 %v3544_v11, 16  ;;  %v3671_v61 = vsel %vm8049_vm2, %v3666_v19, %v3670_v39  ;;  %v3702_v40 = vrot.slane %v3700_v29, 5 }
 0x30a   : > { %v3661_v38 = vsel %vm8049_vm2, %v3656_v59, %v3660_v41  ;;  %v3706_v41 = vshll.u32 %v3547_v52, 16  ;;  %v3716_v59 = vshll.u32 %v3573_v58, 16 }
 0x30b   : > { %4434 = vmatpush.bf16.msrb.mxu1 %v7752_v60  ;;  %v3675_v21 = vrot.slane %v3673_v6, 4  ;;  %v3678_v55 = vrot.slane %v3676_v54, 5  ;;  %v3791_v27 = vunpack.c.l.b16 %v3661_v38  ;;  %v4063_v60 = vld [vmem:[#allocation2 + $0x30] sm:$0xe]  ;;  %v3703_v39 = vor.u32 %v3702_v40, %v3699_v28  ;;  %v7757_v6 = vld [vmem:[%s10042_s3 + $0x108] sm:$0xff]  ;;  %v7771_v38 = vld [vmem:[%s10042_s3 + $0x178] sm:$0xff] }
 0x30c   : > { %4812 = vmatpush.bf16.msrb.mxu2 %v7760_v16  ;;  %v7160_v7 = vrot.slane %v4063_v60, 9  ;;  %v3708_v46 = vrot.slane %v3706_v41, 5  ;;  %v3718_v8 = vrot.slane %v3716_v59, 5  ;;  %5059 = vmatpush.bf16.msra.mxu3 %v7771_v38  ;;  %v7748_v28 = vld [vmem:[%s10042_s3 + $0xc0] sm:$0xff]  ;;  %v3550_v40 = vld [vmem:[#allocation2 + $0x54] sm:$0xf] }
 0x30d   : > { %v3679_v62 = vor.u32 %v3678_v55, %v3675_v21  ;;  %v3704_v54 = vrot.slane %v3703_v39, 4  ;;  %v4123_v21 = vrot.slane %v3573_v58, 5  ;;  %v7787_v55 = vld [vmem:[%s10042_s3 + $0x1b8] sm:$0xff]  ;;  %v7785_v58 = vld [vmem:[%s10042_s3 + $0x1a8] sm:$0xff] }
 0x30e   : > { %3878 = vmatmul.bf16.gmra.mxu1 %v3802_v31  ;;  %v3792_v31 = vunpack.c.l.b16 %v3671_v61  ;;  %v4114_v63 = vsel %vm8134_vm5, %v7160_v7, %v4113_v0  ;;  %v3713_v26 = vor.u32 %v3712_v49, %v3708_v46  ;;  %v7749_v61 = vld [vmem:[%s10042_s3 + $0xc8] sm:$0xff]  ;;  %5254 = vmatpush.bf16.msra.mxu0 %v7787_v55  ;;  %v7766_v49 = vld [vmem:[%s10042_s3 + $0x150] sm:$0xff]  ;;  %v3575_v55 = vld [vmem:[#allocation2 + $0x5c] sm:$0x1] }
 0x30f   : > { %4023 = vmatmul.bf16.gmra.mxu2 %v7709_v51  ;;  %4435 = vmatpush.bf16.msrb.mxu1 %v7751_v43  ;;  %v3572_v51 = vld [vmem:[#allocation2 + $0x38] sm:$0x1]  ;;  %v3680_v36 = vrot.slane %v3679_v62, 4  ;;  %v4120_v43 = vrot.slane %v3547_v52, 5  ;;  %v7769_v0 = vld [vmem:[%s10042_s3 + $0x168] sm:$0xff]  ;;  %v7713_v52 = vld [vmem:[#allocation2 + $0x3c] sm:$0xff] }
 0x310   : > { %4249 = vmatmul.bf16.gmra.mxu3 %v4173_v48  ;;  %4813 = vmatpush.bf16.msrb.mxu2 %v7759_v44  ;;  %v4162_v48 = vunpack.c.l.b16 %v4107_v50  ;;  %v3692_v42 = vshll.u32 %v3572_v51, 16  ;;  %v3804_v2 = vpack.c.b16 %v3792_v31, %v3791_v27  ;;  %v4116_v18 = vrot.slane %v3572_v51, 5  ;;  %v7712_v44 = vld [vmem:[#allocation2 + $0x30] sm:$0xff] }
 0x311   : > { %v3685_v25 = vsel %vm8049_vm2, %v3680_v36, %v3684_v56  ;;  %v3714_v37 = vrot.slane %v3713_v26, 4  ;;  %v7161_v50 = vrot.slane %v4064_v13, 9  ;;  %v4122_v35 = vrot.slane %v4120_v43, 4  ;;  %v7770_v51 = vld [vmem:[%s10042_s3 + $0x170] sm:$0xff] }
 0x312   : > { %v4175_v16 = vpack.c.b16 %v4163_v45, %v4162_v48  ;;  %v3694_v53 = vrot.slane %v3692_v42, 5  ;;  %v4117_v4 = vsel %vm8134_vm5, %v4115_v15, %v4116_v18  ;;  %v3793_v22 = vunpack.c.l.b16 %v3685_v25  ;;  %v7786_v48 = vld [vmem:[%s10042_s3 + $0x1b0] sm:$0xff]  ;;  %5060 = vmatpush.bf16.msra.mxu3 %v7770_v51 }
 0x313   : > { %4436 = vmatpush.bf16.msrb.mxu1 %v7750_v30  ;;  %v3721_v27 = vshrl.u32 %v3548_v33, 16  ;;  %v3724_v31 = vshll.u32 %v3548_v33, 16  ;;  %v3730_v56 = vshll.u32 %v9523_v47, 16  ;;  %v3709_v45 = vsel %vm8049_vm2, %v3704_v54, %v3708_v46  ;;  %v3574_v36 = vld [vmem:[#allocation2 + $0x50] sm:$0x1]  ;;  %5255 = vmatpush.bf16.msra.mxu0 %v7786_v48  ;;  %v7768_v30 = vld [vmem:[%s10042_s3 + $0x160] sm:$0xff] }
 0x314   : > { %4814 = vmatpush.bf16.msrb.mxu2 %v7758_v9  ;;  %v3695_v3 = vsel %vm8049_vm2, %v3690_v20, %v3694_v53  ;;  %v3719_v62 = vsel %vm8049_vm2, %v3714_v37, %v3718_v8  ;;  %v4121_v42 = vsel %vm8134_vm5, %v7161_v50, %v4120_v43  ;;  %v3736_v20 = vrot.slane %v3734_v17, 4  ;;  %v9569_v46 = vld [vmem:[#allocation2 + $0x58] sm:$0xf]  ;;  %v7765_v33 = vld [vmem:[%s10042_s3 + $0x148] sm:$0xff] }
 0x315   : > { %v3726_v24 = vrot.slane %v3724_v31, 5  ;;  %v3796_v60 = vunpack.c.l.b16 %v3719_v62  ;;  %v3732_v53 = vrot.slane %v3730_v56, 5  ;;  %v4166_v7 = vunpack.c.l.b16 %v4121_v42  ;;  %v7714_v31 = vld [vmem:[#allocation2 + $0x48] sm:$0xff]  ;;  %v7782_v62 = vld [vmem:[%s10042_s3 + $0x190] sm:$0xff] }
 0x316   : > { %v3740_v9 = vshll.u32 %v3574_v36, 16  ;;  %5061 = vmatpush.bf16.msra.mxu3 %v7769_v0  ;;  %v3745_v26 = vshrl.u32 %v3550_v40, 16  ;;  %v3748_v43 = vshll.u32 %v3550_v40, 16  ;;  %v3754_v13 = vshll.u32 %v9569_v46, 16 }
 0x317   : > { %4437 = vmatpush.bf16.msrb.mxu1 %v7749_v61  ;;  %v3737_v25 = vor.u32 %v3736_v20, %v3732_v53  ;;  %5256 = vmatpush.bf16.msra.mxu0 %v7785_v58  ;;  %v3758_v8 = vshrl.u32 %v9569_v46, 16  ;;  %v3764_v48 = vshll.u32 %v3575_v55, 16  ;;  %v4134_v42 = vrot.slane %v9569_v46, 5 }
 0x318   : > { %4815 = vmatpush.bf16.msrb.mxu2 %v7757_v6  ;;  %v3742_v29 = vrot.slane %v3740_v9, 5  ;;  %v7783_v6 = vld [vmem:[%s10042_s3 + $0x198] sm:$0xff]  ;;  %v3747_v61 = vrot.slane %v3745_v26, 4  ;;  %v3750_v50 = vrot.slane %v3748_v43, 5  ;;  %v4874_v26 = vld [vmem:[#allocation2 + $0xc] sm:$0xe] }
 0x319   : > { %v3738_v41 = vrot.slane %v3737_v25, 4 }
 0x31a   : > { %5062 = vmatpush.bf16.msra.mxu3 %v7768_v30  ;;  %v3751_v56 = vor.u32 %v3750_v50, %v3747_v61 }
 0x31b   : > { %v3743_v59 = vsel %vm8049_vm2, %v3738_v41, %v3742_v29  ;;  %4438 = vmatpush.bf16.msrb.mxu1 %v7748_v28  ;;  %v7772_v29 = vld [vmem:[#allocation2 + $0x18] sm:$0xff] }
 0x31c   : > { %v3798_v37 = vunpack.c.l.b16 %v3743_v59  ;;  %v3752_v0 = vrot.slane %v3751_v56, 4 }
 0x31e   : > { %3883 = vmatmul.bf16.gmra.mxu1 %v3803_v10  ;;  %v3794_v10 = vunpack.c.l.b16 %v3695_v3  ;;  %v4127_v3 = vrot.slane %v9523_v47, 5 }
 0x31f   : > { %4028 = vmatmul.bf16.gmra.mxu2 %v7710_v23  ;;  %v4164_v23 = vunpack.c.l.b16 %v4114_v63 }
 0x320   : > { %4254 = vmatmul.bf16.gmra.mxu3 %v4174_v57  ;;  %v4165_v57 = vunpack.c.l.b16 %v4117_v4  ;;  %v3805_v11 = vpack.c.b16 %v3794_v10, %v3793_v22  ;;  %v4065_v4 = vld [vmem:[#allocation2 + $0x48] sm:$0xe]  ;;  %v4129_v22 = vrot.slane %v4127_v3, 4  ;;  %v4130_v10 = vrot.slane %v3574_v36, 5  ;;  %v4497_v36 = vld [vmem:[#allocation2 + $0x10] sm:$0xf] }
 0x321   : > { %v7162_v34 = vrot.slane %v4065_v4, 9  ;;  %v4530_v30 = vshll.u32 %v4497_v36, 16 }
 0x322   : > { %v4176_v19 = vpack.c.b16 %v4165_v57, %v4164_v23  ;;  %v7756_v23 = vld [vmem:[%s10042_s3 + $0x100] sm:$0xff]  ;;  %v7767_v57 = vld [vmem:[%s10042_s3 + $0x158] sm:$0xff]  ;;  %v4131_v39 = vsel %vm8134_vm5, %v4129_v22, %v4130_v10 }
 0x323   : > { %4816 = vmatpush.bf16.msrb.mxu2 %v7756_v23  ;;  %5063 = vmatpush.bf16.msra.mxu3 %v7767_v57  ;;  %v4169_v38 = vunpack.c.l.b16 %v4131_v39  ;;  %v4498_v23 = vld [vmem:[#allocation2 + $0x14] sm:$0x1]  ;;  %v4532_v57 = vrot.slane %v4530_v30, 5  ;;  %v4875_v30 = vld [vmem:[#allocation2 + $0x18] sm:$0xe] }
 0x327   : > { %5064 = vmatpush.bf16.msra.mxu3 %v7766_v49  ;;  %v4540_v49 = vshll.u32 %v4498_v23, 16 }
 0x32b   : > { %5065 = vmatpush.bf16.msra.mxu3 %v7765_v33  ;;  %v7340_v33 = vrot.slane %v4874_v26, 9 }
 0x32e   : > { %3888 = vmatmul.bf16.gmra.mxu1 %v3804_v2  ;;  %v4124_v2 = vsel %vm8134_vm5, %v4122_v35, %v4123_v21  ;;  %v3756_v35 = vrot.slane %v3754_v13, 5  ;;  %v3760_v21 = vrot.slane %v3758_v8, 4  ;;  %v4542_v13 = vrot.slane %v4540_v49, 5 }
 0x32f   : > { %4033 = vmatmul.bf16.gmra.mxu2 %v7711_v5  ;;  %v3723_v5 = vrot.slane %v3721_v27, 4  ;;  %v4167_v15 = vunpack.c.l.b16 %v4124_v2  ;;  %v4066_v2 = vld [vmem:[#allocation2 + $0x54] sm:$0xe] }
 0x330   : > { %4259 = vmatmul.bf16.gmra.mxu3 %v4175_v16  ;;  %v3795_v16 = vunpack.c.l.b16 %v3709_v45  ;;  %v3761_v17 = vor.u32 %v3760_v21, %v3756_v35  ;;  %v7764_v45 = vld [vmem:[%s10042_s3 + $0x140] sm:$0xff]  ;;  %v7163_v20 = vrot.slane %v4066_v2, 9  ;;  %v3757_v25 = vsel %vm8049_vm2, %v3752_v0, %v3756_v35 }
 0x331   : > { %v3727_v18 = vor.u32 %v3726_v24, %v3723_v5  ;;  %v4177_v63 = vpack.c.b16 %v4167_v15, %v4166_v7  ;;  %5066 = vmatpush.bf16.msra.mxu3 %v7764_v45  ;;  %v4496_v5 = vld [vmem:[#allocation2 + $0xc] sm:$0xf]  ;;  %v7803_v24 = vld [vmem:[%s10042_s3 + $0x238] sm:$0xff]  ;;  %v4136_v7 = vrot.slane %v4134_v42, 4  ;;  %v4137_v15 = vrot.slane %v3575_v55, 5  ;;  %v7794_v55 = vld [vmem:[%s10042_s3 + $0x1f0] sm:$0xff] }
 0x332   : > { %v3806_v12 = vpack.c.b16 %v3796_v60, %v3795_v16  ;;  %v3762_v16 = vrot.slane %v3761_v17, 4  ;;  %v3766_v60 = vrot.slane %v3764_v48, 5  ;;  %5882 = vmatpush.bf16.msra.mxu2 %v7803_v24  ;;  %v4524_v9 = vshll.u32 %v4496_v5, 16  ;;  %v7773_v17 = vld [vmem:[#allocation2 + $0x24] sm:$0xff] }
 0x333   : > { %v3728_v1 = vrot.slane %v3727_v18, 4  ;;  %v4521_v18 = vshrl.u32 %v4496_v5, 16  ;;  %v4135_v4 = vsel %vm8134_vm5, %v7163_v20, %v4134_v42  ;;  %v3799_v22 = vunpack.c.l.b16 %v3757_v25  ;;  %v7801_v25 = vld [vmem:[%s10042_s3 + $0x228] sm:$0xff] }
 0x334   : > { %v4170_v28 = vunpack.c.l.b16 %v4135_v4 }
 0x335   : > { %v4523_v41 = vrot.slane %v4521_v18, 4 }
 0x33e   : > { %3893 = vmatmul.bf16.gmra.mxu1 %v3805_v11  ;;  %v7784_v11 = vld [vmem:[%s10042_s3 + $0x1a0] sm:$0xff] }
 0x33f   : > { %4038 = vmatmul.bf16.gmra.mxu2 %v7712_v44  ;;  %v3733_v44 = vsel %vm8049_vm2, %v3728_v1, %v3732_v53  ;;  %5257 = vmatpush.bf16.msra.mxu0 %v7784_v11  ;;  %v7781_v53 = vld [vmem:[%s10042_s3 + $0x188] sm:$0xff]  ;;  %v4138_v1 = vsel %vm8134_vm5, %v4136_v7, %v4137_v15 }
 0x340   : > { %4264 = vmatmul.bf16.gmra.mxu3 %v4176_v19  ;;  %v4128_v19 = vsel %vm8134_vm5, %v7162_v34, %v4127_v3  ;;  %v3797_v54 = vunpack.c.l.b16 %v3733_v44  ;;  %v3767_v3 = vsel %vm8049_vm2, %v3762_v16, %v3766_v60  ;;  %v4526_v34 = vrot.slane %v4524_v9, 5  ;;  %v7715_v44 = vld [vmem:[#allocation2 + $0x54] sm:$0xff]  ;;  %v4501_v16 = vld [vmem:[#allocation2 + $0x20] sm:$0x1]  ;;  %v7740_v60 = vld [vmem:[#allocation2 + $0xc] sm:$0xff] }
 0x341   : > { %v4168_v47 = vunpack.c.l.b16 %v4128_v19  ;;  %v3800_v10 = vunpack.c.l.b16 %v3767_v3  ;;  %v4171_v40 = vunpack.c.l.b16 %v4138_v1  ;;  %v4908_v19 = vrot.slane %v4497_v36, 5 }
 0x342   : > { %v3807_v27 = vpack.c.b16 %v3798_v37, %v3797_v54  ;;  %v4527_v46 = vor.u32 %v4526_v34, %v4523_v41  ;;  %v4911_v54 = vrot.slane %v4498_v23, 5  ;;  %v7802_v37 = vld [vmem:[%s10042_s3 + $0x230] sm:$0xff]  ;;  %v4564_v18 = vshll.u32 %v4501_v16, 16 }
 0x343   : > { %5258 = vmatpush.bf16.msra.mxu0 %v7783_v6  ;;  %v4178_v51 = vpack.c.b16 %v4169_v38, %v4168_v47  ;;  %v3808_v11 = vpack.c.b16 %v3800_v10, %v3799_v22  ;;  %v4179_v39 = vpack.c.b16 %v4171_v40, %v4170_v28  ;;  %v4910_v6 = vrot.slane %v4908_v19, 4  ;;  %v4499_v47 = vld [vmem:[#allocation2 + $0x18] sm:$0xf]  ;;  %v4500_v38 = vld [vmem:[#allocation2 + $0x1c] sm:$0xf]  ;;  %5883 = vmatpush.bf16.msra.mxu2 %v7802_v37  ;;  %v7793_v40 = vld [vmem:[%s10042_s3 + $0x1e8] sm:$0xff] }
 0x344   : > { %v4528_v43 = vrot.slane %v4527_v46, 4  ;;  %v4909_v35 = vsel %vm8134_vm5, %v7340_v33, %v4908_v19  ;;  %v4558_v56 = vshrl.u32 %v4500_v38, 16  ;;  %v4915_v9 = vrot.slane %v4500_v38, 5 }
 0x345   : > { %v4912_v21 = vsel %vm8134_vm5, %v4910_v6, %v4911_v54  ;;  %v4566_v4 = vrot.slane %v4564_v18, 5  ;;  %v7341_v1 = vrot.slane %v4875_v30, 9  ;;  %v4918_v41 = vrot.slane %v4501_v16, 5  ;;  %v7800_v16 = vld [vmem:[%s10042_s3 + $0x220] sm:$0xff] }
 0x346   : > { %v4533_v61 = vsel %vm8049_vm2, %v4528_v43, %v4532_v57  ;;  %v4980_v42 = vunpack.c.l.b16 %v4912_v21  ;;  %v4560_v0 = vrot.slane %v4558_v56, 4 }
 0x347   : > { %5259 = vmatpush.bf16.msra.mxu0 %v7782_v62  ;;  %v4729_v48 = vunpack.c.l.b16 %v4533_v61  ;;  %v4979_v62 = vunpack.c.l.b16 %v4909_v35  ;;  %5884 = vmatpush.bf16.msra.mxu2 %v7801_v25 }
 0x349   : > { %v4995_v20 = vpack.c.b16 %v4980_v42, %v4979_v62 }
 0x34b   : > { %5260 = vmatpush.bf16.msra.mxu0 %v7781_v53  ;;  %5885 = vmatpush.bf16.msra.mxu2 %v7800_v16 }
 0x34e   : > { %3898 = vmatmul.bf16.gmra.mxu1 %v3806_v12  ;;  %v4534_v12 = vshrl.u32 %v4497_v36, 16 }
 0x34f   : > { %4043 = vmatmul.bf16.gmra.mxu2 %v7713_v52  ;;  %v7795_v52 = vld [vmem:[%s10042_s3 + $0x1f8] sm:$0xff] }
 0x350   : > { %4269 = vmatmul.bf16.gmra.mxu3 %v4177_v63  ;;  %v7780_v63 = vld [vmem:[%s10042_s3 + $0x180] sm:$0xff]  ;;  %5632 = vmatpush.bf16.msra.mxu1 %v7795_v52  ;;  %v4536_v58 = vrot.slane %v4534_v12, 4  ;;  %v9634_v52 = vld [vmem:[#allocation2 + $0x28] sm:$0xf] }
 0x351   : > { %5261 = vmatpush.bf16.msra.mxu0 %v7780_v63  ;;  %v4502_v12 = vld [vmem:[#allocation2 + $0x24] sm:$0xf]  ;;  %v4578_v23 = vshll.u32 %v9634_v52, 16 }
 0x352   : > { %v4537_v59 = vor.u32 %v4536_v58, %v4532_v57  ;;  %v4569_v22 = vshrl.u32 %v4502_v12, 16  ;;  %v4572_v10 = vshll.u32 %v4502_v12, 16  ;;  %v4582_v57 = vshrl.u32 %v9634_v52, 16  ;;  %v7792_v12 = vld [vmem:[%s10042_s3 + $0x1e0] sm:$0xff] }
 0x354   : > { %5262 = vmatmul.bf16.vlgmr.msra.gmra.mxu0 %v7772_v29  ;;  %v4538_v8 = vrot.slane %v4537_v59, 4  ;;  %5633 = vmatpush.bf16.msra.mxu1 %v7794_v55  ;;  %v4917_v29 = vrot.slane %v4915_v9, 4  ;;  %v4916_v59 = vsel %vm8134_vm5, %v7341_v1, %v4915_v9  ;;  %v4571_v26 = vrot.slane %v4569_v22, 4  ;;  %v7741_v55 = vld [vmem:[#allocation2 + $0x18] sm:$0xff] }
 0x355   : > { %v4574_v43 = vrot.slane %v4572_v10, 5  ;;  %v4981_v54 = vunpack.c.l.b16 %v4916_v59  ;;  %v7742_v59 = vld [vmem:[#allocation2 + $0x24] sm:$0xff] }
 0x356   : > { %v4543_v50 = vsel %vm8049_vm2, %v4538_v8, %v4542_v13  ;;  %v4919_v19 = vsel %vm8134_vm5, %v4917_v29, %v4918_v41  ;;  %v4580_v13 = vrot.slane %v4578_v23, 5  ;;  %v4584_v8 = vrot.slane %v4582_v57, 4  ;;  %v7775_v29 = vld [vmem:[#allocation2 + $0x3c] sm:$0xff] }
 0x357   : > { %v4730_v45 = vunpack.c.l.b16 %v4543_v50  ;;  %v4982_v37 = vunpack.c.l.b16 %v4919_v19  ;;  %v4575_v61 = vor.u32 %v4574_v43, %v4571_v26 }
 0x358   : > { %5634 = vmatpush.bf16.msra.mxu1 %v7793_v40  ;;  %v4585_v50 = vor.u32 %v4584_v8, %v4580_v13  ;;  %v4507_v40 = vld [vmem:[#allocation2 + $0x38] sm:$0x1] }
 0x359   : > { %v4745_v36 = vpack.c.b16 %v4730_v45, %v4729_v48  ;;  %v4876_v48 = vld [vmem:[#allocation2 + $0x24] sm:$0xe]  ;;  %v4576_v62 = vrot.slane %v4575_v61, 4  ;;  %v4612_v8 = vshll.u32 %v4507_v40, 16 }
 0x35a   : > { %v4586_v42 = vrot.slane %v4585_v50, 4 }
 0x35c   : > { %5635 = vmatpush.bf16.msra.mxu1 %v7792_v12 }
 0x35e   : > { %3903 = vmatmul.bf16.gmra.mxu1 %v3807_v27  ;;  %v4545_v27 = vshrl.u32 %v4499_v47, 16 }
 0x35f   : > { %4048 = vmatmul.bf16.gmra.mxu2 %v7714_v31  ;;  %v4548_v31 = vshll.u32 %v4499_v47, 16  ;;  %v4504_v47 = vld [vmem:[#allocation2 + $0x2c] sm:$0x1] }
 0x360   : > { %4274 = vmatmul.bf16.gmra.mxu3 %v4178_v51  ;;  %v4554_v51 = vshll.u32 %v4500_v38, 16  ;;  %v4547_v2 = vrot.slane %v4545_v27, 4 }
 0x361   : > { %v4550_v5 = vrot.slane %v4548_v31, 5  ;;  %v4588_v31 = vshll.u32 %v4504_v47, 16 }
 0x362   : > { %v4556_v24 = vrot.slane %v4554_v51, 5  ;;  %v4922_v51 = vrot.slane %v9634_v52, 5 }
 0x363   : > { %v4551_v7 = vor.u32 %v4550_v5, %v4547_v2  ;;  %v4590_v2 = vrot.slane %v4588_v31, 5  ;;  %v7342_v5 = vrot.slane %v4876_v48, 9 }
 0x364   : > { %5267 = vmatmul.bf16.gmra.mxu0 %v7773_v17  ;;  %v4561_v15 = vor.u32 %v4560_v0, %v4556_v24  ;;  %v4996_v17 = vpack.c.b16 %v4982_v37, %v4981_v54  ;;  %v4925_v0 = vrot.slane %v4504_v47, 5  ;;  %v4877_v54 = vld [vmem:[#allocation2 + $0x30] sm:$0xe]  ;;  %v4508_v37 = vld [vmem:[#allocation2 + $0x3c] sm:$0xf] }
 0x365   : > { %v4552_v3 = vrot.slane %v4551_v7, 4  ;;  %v4591_v18 = vsel %vm8049_vm2, %v4586_v42, %v4590_v2  ;;  %v4923_v9 = vsel %vm8134_vm5, %v7342_v5, %v4922_v51  ;;  %v9680_v47 = vld [vmem:[#allocation2 + $0x40] sm:$0xf]  ;;  %v7791_v2 = vld [vmem:[%s10042_s3 + $0x1d8] sm:$0xff] }
 0x366   : > { %v4562_v63 = vrot.slane %v4561_v15, 4  ;;  %v4983_v22 = vunpack.c.l.b16 %v4923_v9  ;;  %v4630_v48 = vshrl.u32 %v9680_v47, 16  ;;  %5636 = vmatpush.bf16.msra.mxu1 %v7791_v2 }
 0x367   : > { %v4557_v49 = vsel %vm8049_vm2, %v4552_v3, %v4556_v24  ;;  %v4924_v24 = vrot.slane %v4922_v51, 4  ;;  %v4617_v51 = vshrl.u32 %v4508_v37, 16 }
 0x368   : > { %v4731_v33 = vunpack.c.l.b16 %v4557_v49 }
 0x369   : > { %v4926_v30 = vsel %vm8134_vm5, %v4924_v24, %v4925_v0 }
 0x36a   : > { %v4984_v10 = vunpack.c.l.b16 %v4926_v30 }
 0x36c   : > { %v4997_v26 = vpack.c.b16 %v4984_v10, %v4983_v22 }
 0x36e   : > { %3908 = vmatmul.bf16.gmra.mxu1 %v3808_v11  ;;  %v4567_v11 = vsel %vm8049_vm2, %v4562_v63, %v4566_v4 }
 0x36f   : > { %4053 = vmatmul.bf16.gmra.mxu2 %v7715_v44  ;;  %v4732_v6 = vunpack.c.l.b16 %v4567_v11 }
 0x370   : > { %4279 = vmatmul.bf16.gmra.mxu3 %v4179_v39  ;;  %v7774_v39 = vld [vmem:[#allocation2 + $0x30] sm:$0xff] }
 0x371   : > { %v4746_v27 = vpack.c.b16 %v4732_v6, %v4731_v33 }
 0x374   : > { %5272 = vmatmul.bf16.gmra.mxu0 %v7774_v39 }
 0x37b   : > { %v3874_v53 = vpop.f32.mrf.mxu1 }
 0x37e   : > { %4439 = vmatmul.bf16.vlgmr.msrb.gmra.mxu1 %v7740_v60  ;;  %v4505_v60 = vld [vmem:[#allocation2 + $0x30] sm:$0xf] }
 0x37f   : > { %4817 = vmatmul.bf16.vlgmr.msrb.gmra.mxu2 %v4745_v36  ;;  %v9660_v36 = vld [vmem:[#allocation2 + $0x34] sm:$0xf]  ;;  %v4593_v25 = vshrl.u32 %v4505_v60, 16  ;;  %v4596_v3 = vshll.u32 %v4505_v60, 16 }
 0x380   : > { %5067 = vmatmul.bf16.vlgmr.msra.gmra.mxu3 %v4995_v20  ;;  %v4581_v20 = vsel %vm8049_vm2, %v4576_v62, %v4580_v13  ;;  %v4602_v63 = vshll.u32 %v9660_v36, 16  ;;  %v4606_v4 = vshrl.u32 %v9660_v36, 16  ;;  %v4929_v6 = vrot.slane %v9660_v36, 5 }
 0x381   : > { %v4733_v41 = vunpack.c.l.b16 %v4581_v20  ;;  %v4595_v23 = vrot.slane %v4593_v25, 4  ;;  %v4598_v57 = vrot.slane %v4596_v3, 5  ;;  %v4619_v20 = vrot.slane %v4617_v51, 4  ;;  %v4510_v25 = vld [vmem:[#allocation2 + $0x44] sm:$0x1] }
 0x382   : > { %v4019_v34 = vpop.f32.mrf.mxu2  ;;  %v4636_v10 = vshll.u32 %v4510_v25, 16 }
 0x383   : > { %v4020_v58 = vadd.f32 %v4019_v34, %v3874_v53  ;;  %v4245_v28 = vpop.f32.mrf.mxu3  ;;  %v3876_v46 = vpop.f32.mrf.mxu1  ;;  %v4734_v34 = vunpack.c.l.b16 %v4591_v18  ;;  %v4599_v43 = vor.u32 %v4598_v57, %v4595_v23  ;;  %v4632_v18 = vrot.slane %v4630_v48, 4 }
 0x384   : > { %5277 = vmatmul.bf16.gmra.mxu0 %v7775_v29  ;;  %v4936_v23 = vrot.slane %v9680_v47, 5 }
 0x385   : > { %v9648_v44 = vadd.f32 %v4245_v28, %v4020_v58  ;;  %v4604_v58 = vrot.slane %v4602_v63, 5  ;;  %v4608_v28 = vrot.slane %v4606_v4, 4  ;;  %v4747_v19 = vpack.c.b16 %v4734_v34, %v4733_v41  ;;  %v7743_v34 = vld [vmem:[#allocation2 + $0x30] sm:$0xff] }
 0x386   : > { %v4600_v61 = vrot.slane %v4599_v43, 4  ;;  %v4511_v43 = vld [vmem:[#allocation2 + $0x48] sm:$0xf] }
 0x387   : > { %v4609_v13 = vor.u32 %v4608_v28, %v4604_v58  ;;  %v4878_v28 = vld [vmem:[#allocation2 + $0x3c] sm:$0xe] }
 0x388   : > { %v4605_v24 = vsel %vm8049_vm2, %v4600_v61, %v4604_v58 }
 0x389   : > { %v4610_v50 = vrot.slane %v4609_v13, 4  ;;  %v4735_v9 = vunpack.c.l.b16 %v4605_v24  ;;  %v9706_v13 = vld [vmem:[#allocation2 + $0x4c] sm:$0xf] }
 0x38a   : > { %v4021_v38 = vpop.f32.mrf.mxu2 }
 0x38b   : > { %v4022_v35 = vadd.f32 %v4021_v38, %v3876_v46  ;;  %v4247_v21 = vpop.f32.mrf.mxu3  ;;  %v3879_v56 = vpop.f32.mrf.mxu1  ;;  %v7799_v38 = vld [vmem:[%s10042_s3 + $0x218] sm:$0xff] }
 0x38c   : > { %5886 = vmatpush.bf16.msra.mxu2 %v7799_v38 }
 0x38d   : > { %v9655_v45 = vadd.f32 %v4247_v21, %v4022_v35  ;;  %v4614_v35 = vrot.slane %v4612_v8, 5  ;;  %v7343_v21 = vrot.slane %v4877_v54, 9 }
 0x38e   : > { %4444 = vmatmul.bf16.gmra.mxu1 %v7741_v55  ;;  %v4931_v55 = vrot.slane %v4929_v6, 4 }
 0x38f   : > { %4822 = vmatmul.bf16.gmra.mxu2 %v4746_v27  ;;  %v4932_v27 = vrot.slane %v4507_v40, 5  ;;  %v4615_v0 = vsel %vm8049_vm2, %v4610_v50, %v4614_v35  ;;  %v4930_v60 = vsel %vm8134_vm5, %v7343_v21, %v4929_v6  ;;  %v7790_v50 = vld [vmem:[%s10042_s3 + $0x1d0] sm:$0xff]  ;;  %v4641_v21 = vshrl.u32 %v4511_v43, 16 }
 0x390   : > { %5072 = vmatmul.bf16.gmra.mxu3 %v4996_v17  ;;  %v4626_v17 = vshll.u32 %v9680_v47, 16  ;;  %v4736_v30 = vunpack.c.l.b16 %v4615_v0  ;;  %v4985_v12 = vunpack.c.l.b16 %v4930_v60  ;;  %5637 = vmatpush.bf16.msra.mxu1 %v7790_v50  ;;  %v4513_v60 = vld [vmem:[#allocation2 + $0x50] sm:$0x1] }
 0x391   : > { %v4933_v36 = vsel %vm8134_vm5, %v4931_v55, %v4932_v27  ;;  %v4644_v55 = vshll.u32 %v4511_v43, 16  ;;  %v4650_v27 = vshll.u32 %v9706_v13, 16  ;;  %v4643_v2 = vrot.slane %v4641_v21, 4 }
 0x392   : > { %v4024_v53 = vpop.f32.mrf.mxu2  ;;  %v4748_v22 = vpack.c.b16 %v4736_v30, %v4735_v9 }
 0x393   : > { %v4025_v7 = vadd.f32 %v4024_v53, %v3879_v56  ;;  %v4250_v15 = vpop.f32.mrf.mxu3  ;;  %v3881_v52 = vpop.f32.mrf.mxu1  ;;  %v4620_v56 = vshll.u32 %v4508_v37, 16  ;;  %v7776_v53 = vld [vmem:[#allocation2 + $0x48] sm:$0xff]  ;;  %v4652_v24 = vrot.slane %v4650_v27, 5  ;;  %v4516_v27 = vld [vmem:[#allocation2 + $0x5c] sm:$0x1] }
 0x394   : > { %5282 = vmatmul.bf16.gmra.mxu0 %v7776_v53 }
 0x395   : > { %v9675_v1 = vadd.f32 %v4250_v15, %v4025_v7  ;;  %v4622_v7 = vrot.slane %v4620_v56, 5  ;;  %v4628_v15 = vrot.slane %v4626_v17, 5  ;;  %v7777_v56 = vld [vmem:[#allocation2 + $0x54] sm:$0xff] }
 0x397   : > { %v4623_v63 = vor.u32 %v4622_v7, %v4619_v20  ;;  %v4633_v4 = vor.u32 %v4632_v18, %v4628_v15  ;;  %v7744_v7 = vld [vmem:[#allocation2 + $0x3c] sm:$0xff] }
 0x39a   : > { %v4026_v46 = vpop.f32.mrf.mxu2 }
 0x39b   : > { %v4027_v49 = vadd.f32 %v4026_v46, %v3881_v52  ;;  %v4252_v11 = vpop.f32.mrf.mxu3  ;;  %v3884_v39 = vpop.f32.mrf.mxu1  ;;  %v4986_v52 = vunpack.c.l.b16 %v4933_v36  ;;  %v4624_v46 = vrot.slane %v4623_v63, 4  ;;  %v4879_v63 = vld [vmem:[#allocation2 + $0x48] sm:$0xe] }
 0x39d   : > { %v9677_v33 = vadd.f32 %v4252_v11, %v4027_v49  ;;  %v4998_v58 = vpack.c.b16 %v4986_v52, %v4985_v12  ;;  %v4634_v49 = vrot.slane %v4633_v4, 4  ;;  %v4638_v11 = vrot.slane %v4636_v10, 5  ;;  %v4514_v4 = vld [vmem:[#allocation2 + $0x54] sm:$0xf] }
 0x39e   : > { %4449 = vmatmul.bf16.gmra.mxu1 %v7742_v59  ;;  %v7344_v59 = vrot.slane %v4878_v28, 9  ;;  %v4629_v6 = vsel %vm8049_vm2, %v4624_v46, %v4628_v15  ;;  %v4660_v52 = vshll.u32 %v4513_v60, 16  ;;  %v4665_v46 = vshrl.u32 %v4514_v4, 16 }
 0x39f   : > { %4827 = vmatmul.bf16.gmra.mxu2 %v4747_v19  ;;  %v4938_v19 = vrot.slane %v4936_v23, 4  ;;  %v4639_v47 = vsel %vm8049_vm2, %v4634_v49, %v4638_v11  ;;  %v4737_v17 = vunpack.c.l.b16 %v4629_v6  ;;  %v4668_v49 = vshll.u32 %v4514_v4, 16 }
 0x3a0   : > { %5077 = vmatmul.bf16.gmra.mxu3 %v4997_v26  ;;  %v7798_v26 = vld [vmem:[%s10042_s3 + $0x210] sm:$0xff]  ;;  %v4937_v38 = vsel %vm8134_vm5, %v7344_v59, %v4936_v23  ;;  %v4738_v48 = vunpack.c.l.b16 %v4639_v47  ;;  %v4662_v10 = vrot.slane %v4660_v52, 5  ;;  %v7345_v23 = vrot.slane %v4879_v63, 9  ;;  %v7778_v47 = vld [vmem:[#allocation2 + $0x60] sm:$0xff] }
 0x3a1   : > { %5887 = vmatpush.bf16.msra.mxu2 %v7798_v26  ;;  %v7789_v26 = vld [vmem:[%s10042_s3 + $0x1c8] sm:$0xff]  ;;  %v9752_v52 = vld [vmem:[#allocation2 + $0x64] sm:$0xf]  ;;  %v4953_v4 = vrot.slane %v4516_v27, 5 }
 0x3a2   : > { %v4029_v31 = vpop.f32.mrf.mxu2  ;;  %v4749_v15 = vpack.c.b16 %v4738_v48, %v4737_v17  ;;  %5638 = vmatpush.bf16.msra.mxu1 %v7789_v26 }
 0x3a3   : > { %v4030_v62 = vadd.f32 %v4029_v31, %v3884_v39  ;;  %v4255_v42 = vpop.f32.mrf.mxu3  ;;  %v3886_v5 = vpop.f32.mrf.mxu1  ;;  %v4939_v39 = vrot.slane %v4510_v25, 5  ;;  %v4654_v31 = vshrl.u32 %v9706_v13, 16 }
 0x3a4   : > { %5287 = vmatmul.bf16.gmra.mxu0 %v7777_v56 }
 0x3a5   : > { %v9694_v16 = vadd.f32 %v4255_v42, %v4030_v62  ;;  %v4940_v61 = vsel %vm8134_vm5, %v4938_v19, %v4939_v39  ;;  %v4987_v62 = vunpack.c.l.b16 %v4937_v38  ;;  %v4656_v0 = vrot.slane %v4654_v31, 4 }
 0x3a6   : > { %v4988_v42 = vunpack.c.l.b16 %v4940_v61  ;;  %v4667_v38 = vrot.slane %v4665_v46, 4  ;;  %v4670_v61 = vrot.slane %v4668_v49, 5  ;;  %v7788_v46 = vld [vmem:[%s10042_s3 + $0x1c0] sm:$0xff] }
 0x3a7   : > { %v4657_v12 = vor.u32 %v4656_v0, %v4652_v24  ;;  %5639 = vmatpush.bf16.msra.mxu1 %v7788_v46 }
 0x3a8   : > { %v4999_v9 = vpack.c.b16 %v4988_v42, %v4987_v62  ;;  %v4671_v48 = vor.u32 %v4670_v61, %v4667_v38  ;;  %v4684_v42 = vshll.u32 %v4516_v27, 16  ;;  %v4519_v61 = vld [vmem:[#allocation2 + $0x68] sm:$0x1]  ;;  %v7746_v27 = vld [vmem:[#allocation2 + $0x54] sm:$0xff] }
 0x3aa   : > { %v4031_v3 = vpop.f32.mrf.mxu2 }
 0x3ab   : > { %v4032_v29 = vadd.f32 %v4031_v3, %v3886_v5  ;;  %v4257_v41 = vpop.f32.mrf.mxu3  ;;  %v3889_v57 = vpop.f32.mrf.mxu1  ;;  %v4646_v5 = vrot.slane %v4644_v55, 5  ;;  %v4943_v3 = vrot.slane %v9706_v13, 5 }
 0x3ad   : > { %v9701_v40 = vadd.f32 %v4257_v41, %v4032_v29  ;;  %v4647_v30 = vor.u32 %v4646_v5, %v4643_v2  ;;  %v9726_v29 = vld [vmem:[#allocation2 + $0x58] sm:$0xf]  ;;  %v7797_v41 = vld [vmem:[%s10042_s3 + $0x208] sm:$0xff] }
 0x3ae   : > { %4454 = vmatmul.bf16.gmra.mxu1 %v7743_v34  ;;  %5888 = vmatpush.bf16.msra.mxu2 %v7797_v41  ;;  %v4674_v11 = vshll.u32 %v9726_v29, 16  ;;  %v4678_v59 = vshrl.u32 %v9726_v29, 16 }
 0x3af   : > { %4832 = vmatmul.bf16.gmra.mxu2 %v4748_v22  ;;  %v4648_v34 = vrot.slane %v4647_v30, 4  ;;  %v4658_v22 = vrot.slane %v4657_v12, 4  ;;  %v4517_v30 = vld [vmem:[#allocation2 + $0x60] sm:$0xf] }
 0x3b0   : > { %5082 = vmatmul.bf16.gmra.mxu3 %v4998_v58  ;;  %v4946_v58 = vrot.slane %v4513_v60, 5  ;;  %v4676_v50 = vrot.slane %v4674_v11, 5  ;;  %v7796_v12 = vld [vmem:[%s10042_s3 + $0x200] sm:$0xff] }
 0x3b1   : > { %v4653_v13 = vsel %vm8049_vm2, %v4648_v34, %v4652_v24  ;;  %v7745_v24 = vld [vmem:[#allocation2 + $0x48] sm:$0xff] }
 0x3b2   : > { %v4034_v8 = vpop.f32.mrf.mxu2  ;;  %v4739_v21 = vunpack.c.l.b16 %v4653_v13  ;;  %5889 = vmatpush.bf16.msra.mxu2 %v7796_v12 }
 0x3b3   : > { %v4035_v54 = vadd.f32 %v4034_v8, %v3889_v57  ;;  %v4260_v37 = vpop.f32.mrf.mxu3  ;;  %v3891_v35 = vpop.f32.mrf.mxu1  ;;  %v4945_v57 = vrot.slane %v4943_v3, 4  ;;  %v4663_v8 = vsel %vm8049_vm2, %v4658_v22, %v4662_v10  ;;  %v4689_v22 = vshrl.u32 %v4517_v30, 16 }
 0x3b4   : > { %v4740_v55 = vunpack.c.l.b16 %v4663_v8  ;;  %5292 = vmatmul.bf16.gmra.mxu0 %v7778_v47 }
 0x3b5   : > { %v9721_v51 = vadd.f32 %v4260_v37, %v4035_v54  ;;  %v4944_v54 = vsel %vm8134_vm5, %v7345_v23, %v4943_v3  ;;  %v4947_v37 = vsel %vm8134_vm5, %v4945_v57, %v4946_v58  ;;  %v4692_v57 = vshll.u32 %v4517_v30, 16 }
 0x3b6   : > { %v4989_v31 = vunpack.c.l.b16 %v4944_v54  ;;  %v4990_v56 = vunpack.c.l.b16 %v4947_v37  ;;  %v4750_v0 = vpack.c.b16 %v4740_v55, %v4739_v21  ;;  %v4698_v58 = vshll.u32 %v9752_v52, 16 }
 0x3b7   : > { %v4691_v13 = vrot.slane %v4689_v22, 4  ;;  %v4694_v8 = vrot.slane %v4692_v57, 5 }
 0x3b8   : > { %v4700_v54 = vrot.slane %v4698_v58, 5 }
 0x3ba   : > { %v4036_v36 = vpop.f32.mrf.mxu2 }
 0x3bb   : > { %v4037_v53 = vadd.f32 %v4036_v36, %v3891_v35  ;;  %v4262_v20 = vpop.f32.mrf.mxu3  ;;  %v3894_v18 = vpop.f32.mrf.mxu1  ;;  %v4680_v35 = vrot.slane %v4678_v59, 4  ;;  %v5000_v36 = vpack.c.b16 %v4990_v56, %v4989_v31  ;;  %v4695_v31 = vor.u32 %v4694_v8, %v4691_v13 }
 0x3bd   : > { %v9723_v25 = vadd.f32 %v4262_v20, %v4037_v53  ;;  %v4681_v62 = vor.u32 %v4680_v35, %v4676_v50  ;;  %v4950_v20 = vrot.slane %v9726_v29, 5 }
 0x3be   : > { %4459 = vmatmul.bf16.gmra.mxu1 %v7744_v7  ;;  %v4672_v7 = vrot.slane %v4671_v48, 4 }
 0x3bf   : > { %4837 = vmatmul.bf16.gmra.mxu2 %v4749_v15  ;;  %v4682_v15 = vrot.slane %v4681_v62, 4  ;;  %v4952_v63 = vrot.slane %v4950_v20, 4 }
 0x3c0   : > { %5087 = vmatmul.bf16.gmra.mxu3 %v4999_v9  ;;  %v4880_v9 = vld [vmem:[#allocation2 + $0x54] sm:$0xe]  ;;  %v4677_v29 = vsel %vm8049_vm2, %v4672_v7, %v4676_v50 }
 0x3c1   : > { %v7346_v3 = vrot.slane %v4880_v9, 9  ;;  %v4741_v26 = vunpack.c.l.b16 %v4677_v29 }
 0x3c2   : > { %v4039_v28 = vpop.f32.mrf.mxu2 }
 0x3c3   : > { %v4040_v19 = vadd.f32 %v4039_v28, %v3894_v18  ;;  %v4265_v39 = vpop.f32.mrf.mxu3  ;;  %v3896_v43 = vpop.f32.mrf.mxu1  ;;  %v4686_v18 = vrot.slane %v4684_v42, 5  ;;  %v4702_v28 = vshrl.u32 %v9752_v52, 16  ;;  %v4951_v59 = vsel %vm8134_vm5, %v7346_v3, %v4950_v20 }
 0x3c4   : > { %v4991_v47 = vunpack.c.l.b16 %v4951_v59  ;;  %v4957_v42 = vrot.slane %v9752_v52, 5 }
 0x3c5   : > { %v9740_v6 = vadd.f32 %v4265_v39, %v4040_v19  ;;  %v4687_v34 = vsel %vm8049_vm2, %v4682_v15, %v4686_v18  ;;  %v4954_v19 = vsel %vm8134_vm5, %v4952_v63, %v4953_v4  ;;  %v7779_v39 = vld [vmem:[#allocation2 + $0x6c] sm:$0xff]  ;;  %v4704_v37 = vrot.slane %v4702_v28, 4 }
 0x3c6   : > { %v4992_v38 = vunpack.c.l.b16 %v4954_v19  ;;  %5297 = vmatmul.bf16.gmra.mxu0 %v7779_v39  ;;  %v4959_v15 = vrot.slane %v4957_v42, 4  ;;  %v4960_v18 = vrot.slane %v4519_v61, 5  ;;  %v5321_v19 = vld [vmem:[#allocation2 + $0x20] sm:$0x1] }
 0x3c7   : > { %v4705_v56 = vor.u32 %v4704_v37, %v4700_v54 }
 0x3c8   : > { %v5001_v62 = vpack.c.b16 %v4992_v38, %v4991_v47 }
 0x3ca   : > { %v4041_v17 = vpop.f32.mrf.mxu2 }
 0x3cb   : > { %v4042_v2 = vadd.f32 %v4041_v17, %v3896_v43  ;;  %v4267_v5 = vpop.f32.mrf.mxu3  ;;  %v3899_v60 = vpop.f32.mrf.mxu1  ;;  %v4742_v43 = vunpack.c.l.b16 %v4687_v34  ;;  %v4708_v17 = vshll.u32 %v4519_v61, 16  ;;  %v7747_v61 = vld [vmem:[#allocation2 + $0x60] sm:$0xff] }
 0x3cd   : > { %v9746_v53 = vadd.f32 %v4267_v5, %v4042_v2  ;;  %v4751_v35 = vpack.c.b16 %v4742_v43, %v4741_v26  ;;  %v4881_v5 = vld [vmem:[#allocation2 + $0x60] sm:$0xe]  ;;  %v4710_v20 = vrot.slane %v4708_v17, 5 }
 0x3ce   : > { %4464 = vmatmul.bf16.gmra.mxu1 %v7745_v24  ;;  %v5319_v24 = vld [vmem:[#allocation2 + $0x18] sm:$0xf]  ;;  %v7347_v7 = vrot.slane %v4881_v5, 9  ;;  %v5322_v5 = vld [vmem:[#allocation2 + $0x24] sm:$0xf] }
 0x3cf   : > { %4842 = vmatmul.bf16.gmra.mxu2 %v4750_v0  ;;  %v5320_v0 = vld [vmem:[#allocation2 + $0x1c] sm:$0xf]  ;;  %v5344_v9 = vshrl.u32 %v5319_v24, 16  ;;  %v5347_v30 = vshll.u32 %v5319_v24, 16  ;;  %v5323_v24 = vld [vmem:[#allocation2 + $0x28] sm:$0xf] }
 0x3d0   : > { %5092 = vmatmul.bf16.gmra.mxu3 %v5000_v36  ;;  %v4706_v36 = vrot.slane %v4705_v56, 4  ;;  %v5353_v12 = vshll.u32 %v5320_v0, 16  ;;  %v5357_v3 = vshrl.u32 %v5320_v0, 16  ;;  %v4958_v22 = vsel %vm8134_vm5, %v7347_v7, %v4957_v42 }
 0x3d1   : > { %v5349_v58 = vrot.slane %v5347_v30, 5  ;;  %v4993_v39 = vunpack.c.l.b16 %v4958_v22  ;;  %v5731_v37 = vrot.slane %v5320_v0, 5  ;;  %v5734_v42 = vrot.slane %v5321_v19, 5 }
 0x3d2   : > { %v4044_v41 = vpop.f32.mrf.mxu2  ;;  %v4711_v34 = vsel %vm8049_vm2, %v4706_v36, %v4710_v20  ;;  %v5355_v28 = vrot.slane %v5353_v12, 5  ;;  %v5359_v46 = vrot.slane %v5357_v3, 4  ;;  %v5371_v30 = vshll.u32 %v5322_v5, 16 }
 0x3d3   : > { %v4045_v10 = vadd.f32 %v4044_v41, %v3899_v60  ;;  %v4270_v23 = vpop.f32.mrf.mxu3  ;;  %v3901_v49 = vpop.f32.mrf.mxu1  ;;  %v4696_v60 = vrot.slane %v4695_v31, 4  ;;  %v4744_v59 = vunpack.c.l.b16 %v4711_v34  ;;  %v5377_v12 = vshll.u32 %v5323_v24, 16 }
 0x3d4   : > { %v5360_v13 = vor.u32 %v5359_v46, %v5355_v28  ;;  %v5381_v3 = vshrl.u32 %v5323_v24, 16 }
 0x3d5   : > { %v9763_v11 = vadd.f32 %v4270_v23, %v4045_v10  ;;  %v4701_v41 = vsel %vm8049_vm2, %v4696_v60, %v4700_v54  ;;  %v4961_v10 = vsel %vm8134_vm5, %v4959_v15, %v4960_v18  ;;  %v5346_v23 = vrot.slane %v5344_v9, 4 }
 0x3d6   : > { %v4994_v26 = vunpack.c.l.b16 %v4961_v10  ;;  %v5363_v54 = vshll.u32 %v5321_v19, 16  ;;  %v5361_v56 = vrot.slane %v5360_v13, 4  ;;  %v5368_v15 = vshrl.u32 %v5322_v5, 16 }
 0x3d7   : > { %v5350_v43 = vor.u32 %v5349_v58, %v5346_v23  ;;  %v5373_v10 = vrot.slane %v5371_v30, 5  ;;  %v5379_v23 = vrot.slane %v5377_v12, 5  ;;  %v5383_v58 = vrot.slane %v5381_v3, 4 }
 0x3d8   : > { %v5365_v17 = vrot.slane %v5363_v54, 5  ;;  %v5370_v22 = vrot.slane %v5368_v15, 4  ;;  %v5738_v54 = vrot.slane %v5323_v24, 5 }
 0x3d9   : > { %v5351_v31 = vrot.slane %v5350_v43, 4  ;;  %v5384_v43 = vor.u32 %v5383_v58, %v5379_v23 }
 0x3da   : > { %v4046_v50 = vpop.f32.mrf.mxu2  ;;  %v5366_v36 = vsel %vm8049_vm2, %v5361_v56, %v5365_v17  ;;  %v5740_v56 = vrot.slane %v5738_v54, 4 }
 0x3db   : > { %v4047_v21 = vadd.f32 %v4046_v50, %v3901_v49  ;;  %v4272_v55 = vpop.f32.mrf.mxu3  ;;  %v3904_v48 = vpop.f32.mrf.mxu1  ;;  %v4743_v49 = vunpack.c.l.b16 %v4701_v41  ;;  %v5356_v0 = vsel %vm8049_vm2, %v5351_v31, %v5355_v28  ;;  %v5553_v41 = vunpack.c.l.b16 %v5366_v36  ;;  %v5324_v28 = vld [vmem:[#allocation2 + $0x2c] sm:$0x1] }
 0x3dc   : > { %v5387_v13 = vshll.u32 %v5324_v28, 16  ;;  %v5741_v17 = vrot.slane %v5324_v28, 5 }
 0x3dd   : > { %v9770_v2 = vadd.f32 %v4272_v55, %v4047_v21  ;;  %v4752_v50 = vpack.c.b16 %v4744_v59, %v4743_v49  ;;  %v5002_v55 = vpack.c.b16 %v4994_v26, %v4993_v39  ;;  %v5374_v26 = vor.u32 %v5373_v10, %v5370_v22 }
 0x3de   : > { %4469 = vmatmul.bf16.gmra.mxu1 %v7746_v27 }
 0x3df   : > { %4847 = vmatmul.bf16.gmra.mxu2 %v4751_v35  ;;  %v5697_v35 = vld [vmem:[#allocation2 + $0x18] sm:$0xe] }
 0x3e0   : > { %5097 = vmatmul.bf16.gmra.mxu3 %v5001_v62  ;;  %v5733_v62 = vrot.slane %v5731_v37, 4 }
 0x3e2   : > { %v4049_v63 = vpop.f32.mrf.mxu2  ;;  %v5735_v7 = vsel %vm8134_vm5, %v5733_v62, %v5734_v42 }
 0x3e3   : > { %v4050_v52 = vadd.f32 %v4049_v63, %v3904_v48  ;;  %v4275_v4 = vpop.f32.mrf.mxu3  ;;  %v3906_v29 = vpop.f32.mrf.mxu1  ;;  %v7524_v48 = vrot.slane %v5697_v35, 9  ;;  %v5803_v34 = vunpack.c.l.b16 %v5735_v7  ;;  %v5375_v35 = vrot.slane %v5374_v26, 4 }
 0x3e4   : > { %v5742_v7 = vsel %vm8134_vm5, %v5740_v56, %v5741_v17 }
 0x3e5   : > { %v9780_v57 = vadd.f32 %v4275_v4, %v4050_v52  ;;  %v5732_v20 = vsel %vm8134_vm5, %v7524_v48, %v5731_v37  ;;  %v5552_v4 = vunpack.c.l.b16 %v5356_v0 }
 0x3e7   : > { %v5568_v49 = vpack.c.b16 %v5553_v41, %v5552_v4  ;;  %v5805_v41 = vunpack.c.l.b16 %v5742_v7 }
 0x3ea   : > { %v4051_v8 = vpop.f32.mrf.mxu2 }
 0x3eb   : > { %v4052_v47 = vadd.f32 %v4051_v8, %v3906_v29  ;;  %v4277_v38 = vpop.f32.mrf.mxu3  ;;  %v3909_v21 = vpop.f32.mrf.mxu1  ;;  %v5802_v29 = vunpack.c.l.b16 %v5732_v20 }
 0x3ed   : > { %v9782_v27 = vadd.f32 %v4277_v38, %v4052_v47  ;;  %v5818_v59 = vpack.c.b16 %v5803_v34, %v5802_v29  ;;  %v5698_v38 = vld [vmem:[#allocation2 + $0x24] sm:$0xe]  ;;  %v5327_v29 = vld [vmem:[#allocation2 + $0x38] sm:$0x1] }
 0x3ee   : > { %4474 = vmatmul.bf16.gmra.mxu1 %v7747_v61  ;;  %v5325_v61 = vld [vmem:[#allocation2 + $0x30] sm:$0xf]  ;;  %v7525_v31 = vrot.slane %v5698_v38, 9  ;;  %v5329_v38 = vld [vmem:[#allocation2 + $0x40] sm:$0xf] }
 0x3ef   : > { %4852 = vmatmul.bf16.gmra.mxu2 %v4752_v50  ;;  %v5326_v50 = vld [vmem:[#allocation2 + $0x34] sm:$0xf]  ;;  %v5392_v48 = vshrl.u32 %v5325_v61, 16  ;;  %v5395_v62 = vshll.u32 %v5325_v61, 16  ;;  %v5425_v17 = vshll.u32 %v5329_v38, 16 }
 0x3f0   : > { %5102 = vmatmul.bf16.gmra.mxu3 %v5002_v55  ;;  %v5389_v55 = vrot.slane %v5387_v13, 5  ;;  %v5401_v42 = vshll.u32 %v5326_v50, 16  ;;  %v5405_v5 = vshrl.u32 %v5326_v50, 16  ;;  %v5739_v20 = vsel %vm8134_vm5, %v7525_v31, %v5738_v54 }
 0x3f1   : > { %v5394_v15 = vrot.slane %v5392_v48, 4  ;;  %v5804_v4 = vunpack.c.l.b16 %v5739_v20  ;;  %v5745_v58 = vrot.slane %v5326_v50, 5  ;;  %v5748_v54 = vrot.slane %v5327_v29, 5 }
 0x3f2   : > { %v4054_v60 = vpop.f32.mrf.mxu2  ;;  %v5403_v30 = vrot.slane %v5401_v42, 5  ;;  %v5407_v12 = vrot.slane %v5405_v5, 4  ;;  %v5429_v48 = vshrl.u32 %v5329_v38, 16  ;;  %v5427_v7 = vrot.slane %v5425_v17, 5 }
 0x3f3   : > { %v4055_v18 = vadd.f32 %v4054_v60, %v3909_v21  ;;  %v4280_v9 = vpop.f32.mrf.mxu3  ;;  %v3911_v63 = vpop.f32.mrf.mxu1  ;;  %v5385_v21 = vrot.slane %v5384_v43, 4 }
 0x3f4   : > { %v5408_v22 = vor.u32 %v5407_v12, %v5403_v30 }
 0x3f5   : > { %v9792_v52 = vadd.f32 %v4280_v9, %v4055_v18  ;;  %v5390_v36 = vsel %vm8049_vm2, %v5385_v21, %v5389_v55  ;;  %v5397_v9 = vrot.slane %v5395_v62, 5 }
 0x3f6   : > { %v5409_v26 = vrot.slane %v5408_v22, 4  ;;  %v5700_v22 = vld [vmem:[#allocation2 + $0x3c] sm:$0xe] }
 0x3f7   : > { %v5398_v34 = vor.u32 %v5397_v9, %v5394_v15  ;;  %v5431_v15 = vrot.slane %v5429_v48, 4 }
 0x3fa   : > { %v4056_v46 = vpop.f32.mrf.mxu2 }
 0x3fb   : > { %v4057_v19 = vadd.f32 %v4056_v46, %v3911_v63  ;;  %v4282_v39 = vpop.f32.mrf.mxu3  ;;  %v4440_v8 = vpop.f32.mrf.mxu1  ;;  %v5555_v63 = vunpack.c.l.b16 %v5390_v36 }
 0x3fc   : > { %v4480_v47 = vadd.f32 %v4440_v8, %v9648_v44  ;;  %v5380_v44 = vsel %vm8049_vm2, %v5375_v35, %v5379_v23  ;;  %v5411_v23 = vshll.u32 %v5327_v29, 16  ;;  %v5747_v8 = vrot.slane %v5745_v58, 4 }
 0x3fd   : > { %v9794_v37 = vadd.f32 %v4282_v39, %v4057_v19  ;;  %v5554_v3 = vunpack.c.l.b16 %v5380_v44  ;;  %v5399_v39 = vrot.slane %v5398_v34, 4  ;;  %v5752_v34 = vrot.slane %v5329_v38, 5 }
 0x3fe   : > { %5640 = vmatmul.bf16.vlgmr.msra.gmra.mxu1 %v5568_v49  ;;  %v5819_v49 = vpack.c.b16 %v5805_v41, %v5804_v4  ;;  %v5413_v43 = vrot.slane %v5411_v23, 5  ;;  %v5749_v21 = vsel %vm8134_vm5, %v5747_v8, %v5748_v54  ;;  %v5432_v4 = vor.u32 %v5431_v15, %v5427_v7  ;;  %v5332_v23 = vld [vmem:[#allocation2 + $0x4c] sm:$0xf] }
 0x3ff   : > { %5890 = vmatmul.bf16.vlgmr.msra.gmra.mxu2 %v5818_v59  ;;  %v5569_v46 = vpack.c.b16 %v5555_v63, %v5554_v3  ;;  %v5699_v59 = vld [vmem:[#allocation2 + $0x30] sm:$0xe]  ;;  %v5404_v61 = vsel %vm8049_vm2, %v5399_v39, %v5403_v30 }
 0x400   : > { %v7526_v13 = vrot.slane %v5699_v59, 9  ;;  %v5414_v35 = vsel %vm8049_vm2, %v5409_v26, %v5413_v43  ;;  %v5556_v5 = vunpack.c.l.b16 %v5404_v61  ;;  %v7527_v59 = vrot.slane %v5700_v22, 9  ;;  %v5335_v22 = vld [vmem:[#allocation2 + $0x58] sm:$0xf] }
 0x401   : > { %v5449_v43 = vshll.u32 %v5332_v23, 16 }
 0x402   : > { %v4818_v24 = vpop.f32.mrf.mxu2  ;;  %v5753_v61 = vsel %vm8134_vm5, %v7527_v59, %v5752_v34 }
 0x403   : > { %v9797_v0 = vadd.f32 %v4818_v24, %v4480_v47  ;;  %v4442_v60 = vpop.f32.mrf.mxu1  ;;  %v5328_v47 = vld [vmem:[#allocation2 + $0x3c] sm:$0xf]  ;;  %v5557_v24 = vunpack.c.l.b16 %v5414_v35 }
 0x404   : > { %v4481_v18 = vadd.f32 %v4442_v60, %v9655_v45  ;;  %v5416_v55 = vshrl.u32 %v5328_v47, 16  ;;  %v5419_v56 = vshll.u32 %v5328_v47, 16  ;;  %v5807_v60 = vunpack.c.l.b16 %v5749_v21 }
 0x405   : > { %v5570_v30 = vpack.c.b16 %v5557_v24, %v5556_v5  ;;  %v5333_v5 = vld [vmem:[#allocation2 + $0x50] sm:$0x1] }
 0x406   : > { %v5418_v36 = vrot.slane %v5416_v55, 4  ;;  %v5421_v20 = vrot.slane %v5419_v56, 5  ;;  %v5451_v55 = vrot.slane %v5449_v43, 5 }
 0x408   : > { %v5422_v63 = vor.u32 %v5421_v20, %v5418_v36  ;;  %v5459_v36 = vshll.u32 %v5333_v5, 16  ;;  %v5759_v20 = vrot.slane %v5332_v23, 5 }
 0x40a   : > { %v4820_v10 = vpop.f32.mrf.mxu2 }
 0x40b   : > { %v9808_v28 = vadd.f32 %v4820_v10, %v4481_v18  ;;  %v4445_v19 = vpop.f32.mrf.mxu1  ;;  %v5330_v18 = vld [vmem:[#allocation2 + $0x44] sm:$0x1]  ;;  %v5331_v10 = vld [vmem:[#allocation2 + $0x48] sm:$0xf] }
 0x40c   : > { %v4482_v45 = vadd.f32 %v4445_v19, %v9675_v1  ;;  %v5746_v1 = vsel %vm8134_vm5, %v7526_v13, %v5745_v58  ;;  %v5435_v41 = vshll.u32 %v5330_v18, 16  ;;  %v5423_v58 = vrot.slane %v5422_v63, 4 }
 0x40d   : > { %v5806_v44 = vunpack.c.l.b16 %v5746_v1  ;;  %v5754_v19 = vrot.slane %v5752_v34, 4  ;;  %v5440_v39 = vshrl.u32 %v5331_v10, 16  ;;  %v5443_v26 = vshll.u32 %v5331_v10, 16 }
 0x40e   : > { %5645 = vmatmul.bf16.gmra.mxu1 %v5569_v46  ;;  %v5433_v46 = vrot.slane %v5432_v4, 4  ;;  %v5453_v13 = vshrl.u32 %v5332_v23, 16  ;;  %v5461_v4 = vrot.slane %v5459_v36, 5  ;;  %v5762_v34 = vrot.slane %v5333_v5, 5  ;;  %v5338_v36 = vld [vmem:[#allocation2 + $0x64] sm:$0xf] }
 0x40f   : > { %5895 = vmatmul.bf16.gmra.mxu2 %v5819_v49  ;;  %v5820_v12 = vpack.c.b16 %v5807_v60, %v5806_v44  ;;  %v5437_v49 = vrot.slane %v5435_v41, 5  ;;  %v5442_v35 = vrot.slane %v5440_v39, 4  ;;  %v5445_v21 = vrot.slane %v5443_v26, 5 }
 0x410   : > { %v5455_v56 = vrot.slane %v5453_v13, 4  ;;  %v5477_v39 = vshrl.u32 %v5335_v22, 16 }
 0x411   : > { %v5438_v38 = vsel %vm8049_vm2, %v5433_v46, %v5437_v49  ;;  %v5446_v24 = vor.u32 %v5445_v21, %v5442_v35 }
 0x412   : > { %v4823_v50 = vpop.f32.mrf.mxu2  ;;  %v5559_v48 = vunpack.c.l.b16 %v5438_v38  ;;  %v5456_v44 = vor.u32 %v5455_v56, %v5451_v55  ;;  %v5479_v35 = vrot.slane %v5477_v39, 4 }
 0x413   : > { %v9819_v31 = vadd.f32 %v4823_v50, %v4482_v45  ;;  %v4447_v62 = vpop.f32.mrf.mxu1  ;;  %v5755_v45 = vrot.slane %v5330_v18, 5 }
 0x414   : > { %v4483_v42 = vadd.f32 %v4447_v62, %v9677_v33  ;;  %v5808_v62 = vunpack.c.l.b16 %v5753_v61  ;;  %v5457_v63 = vrot.slane %v5456_v44, 4  ;;  %v5702_v44 = vld [vmem:[#allocation2 + $0x54] sm:$0xe] }
 0x415   : > { %v5756_v50 = vsel %vm8134_vm5, %v5754_v19, %v5755_v45  ;;  %v5473_v45 = vshll.u32 %v5335_v22, 16 }
 0x41a   : > { %v4825_v9 = vpop.f32.mrf.mxu2 }
 0x41b   : > { %v9822_v3 = vadd.f32 %v4825_v9, %v4483_v42  ;;  %v4450_v29 = vpop.f32.mrf.mxu1  ;;  %v5809_v42 = vunpack.c.l.b16 %v5756_v50  ;;  %v5701_v9 = vld [vmem:[#allocation2 + $0x48] sm:$0xe]  ;;  %v5475_v50 = vrot.slane %v5473_v45, 5 }
 0x41c   : > { %v4484_v33 = vadd.f32 %v4450_v29, %v9694_v16  ;;  %v5428_v16 = vsel %vm8049_vm2, %v5423_v58, %v5427_v7  ;;  %v7528_v41 = vrot.slane %v5701_v9, 9  ;;  %v5761_v29 = vrot.slane %v5759_v20, 4 }
 0x41d   : > { %v5558_v17 = vunpack.c.l.b16 %v5428_v16  ;;  %v5821_v18 = vpack.c.b16 %v5809_v42, %v5808_v62  ;;  %v5462_v58 = vsel %vm8049_vm2, %v5457_v63, %v5461_v4  ;;  %v5480_v62 = vor.u32 %v5479_v35, %v5475_v50 }
 0x41e   : > { %5650 = vmatmul.bf16.gmra.mxu1 %v5570_v30  ;;  %v5763_v46 = vsel %vm8134_vm5, %v5761_v29, %v5762_v34  ;;  %v7529_v9 = vrot.slane %v5702_v44, 9  ;;  %v5497_v4 = vshll.u32 %v5338_v36, 16  ;;  %v5341_v44 = vld [vmem:[#allocation2 + $0x70] sm:$0xf] }
 0x41f   : > { %5900 = vmatmul.bf16.gmra.mxu2 %v5820_v12  ;;  %v5571_v15 = vpack.c.b16 %v5559_v48, %v5558_v17  ;;  %v5447_v12 = vrot.slane %v5446_v24, 4  ;;  %v5766_v24 = vrot.slane %v5335_v22, 5 }
 0x421   : > { %v5452_v10 = vsel %vm8049_vm2, %v5447_v12, %v5451_v55 }
 0x422   : > { %v4828_v8 = vpop.f32.mrf.mxu2  ;;  %v5560_v13 = vunpack.c.l.b16 %v5452_v10  ;;  %v5767_v10 = vsel %vm8134_vm5, %v7529_v9, %v5766_v24 }
 0x423   : > { %v9825_v54 = vadd.f32 %v4828_v8, %v4484_v33  ;;  %v4452_v47 = vpop.f32.mrf.mxu1  ;;  %v5334_v33 = vld [vmem:[#allocation2 + $0x54] sm:$0xf]  ;;  %v5561_v8 = vunpack.c.l.b16 %v5462_v58 }
 0x424   : > { %v4485_v1 = vadd.f32 %v4452_v47, %v9701_v40  ;;  %v5464_v49 = vshrl.u32 %v5334_v33, 16  ;;  %v5467_v19 = vshll.u32 %v5334_v33, 16  ;;  %v5811_v47 = vunpack.c.l.b16 %v5763_v46 }
 0x425   : > { %v5572_v55 = vpack.c.b16 %v5561_v8, %v5560_v13  ;;  %v5339_v13 = vld [vmem:[#allocation2 + $0x68] sm:$0x1] }
 0x426   : > { %v5466_v38 = vrot.slane %v5464_v49, 4  ;;  %v5469_v61 = vrot.slane %v5467_v19, 5  ;;  %v5499_v49 = vrot.slane %v5497_v4, 5 }
 0x428   : > { %v5470_v48 = vor.u32 %v5469_v61, %v5466_v38  ;;  %v5507_v38 = vshll.u32 %v5339_v13, 16  ;;  %v5773_v61 = vrot.slane %v5338_v36, 5 }
 0x42a   : > { %v4830_v60 = vpop.f32.mrf.mxu2 }
 0x42b   : > { %v9836_v7 = vadd.f32 %v4830_v60, %v4485_v1  ;;  %v4455_v30 = vpop.f32.mrf.mxu1  ;;  %v5336_v1 = vld [vmem:[#allocation2 + $0x5c] sm:$0x1]  ;;  %v5337_v60 = vld [vmem:[#allocation2 + $0x60] sm:$0xf] }
 0x42c   : > { %v4486_v40 = vadd.f32 %v4455_v30, %v9721_v51  ;;  %v5760_v51 = vsel %vm8134_vm5, %v7528_v41, %v5759_v20  ;;  %v5483_v42 = vshll.u32 %v5336_v1, 16  ;;  %v5471_v20 = vrot.slane %v5470_v48, 4 }
 0x42d   : > { %v5810_v16 = vunpack.c.l.b16 %v5760_v51  ;;  %v5768_v30 = vrot.slane %v5766_v24, 4  ;;  %v5488_v12 = vshrl.u32 %v5337_v60, 16  ;;  %v5491_v63 = vshll.u32 %v5337_v60, 16 }
 0x42e   : > { %5655 = vmatmul.bf16.gmra.mxu1 %v5571_v15  ;;  %v5481_v15 = vrot.slane %v5480_v62, 4  ;;  %v5501_v41 = vshrl.u32 %v5338_v36, 16  ;;  %v5509_v62 = vrot.slane %v5507_v38, 5  ;;  %v5776_v24 = vrot.slane %v5339_v13, 5  ;;  %v5263_v38 = vpop.f32.mrf.mxu0 }
 0x42f   : > { %5905 = vmatmul.bf16.gmra.mxu2 %v5821_v18  ;;  %v5822_v56 = vpack.c.b16 %v5811_v47, %v5810_v16  ;;  %v5485_v18 = vrot.slane %v5483_v42, 5  ;;  %v5490_v58 = vrot.slane %v5488_v12, 4  ;;  %v5493_v46 = vrot.slane %v5491_v63, 5 }
 0x430   : > { %v5503_v19 = vrot.slane %v5501_v41, 4  ;;  %v5525_v12 = vshrl.u32 %v5341_v44, 16 }
 0x431   : > { %v5486_v22 = vsel %vm8049_vm2, %v5481_v15, %v5485_v18  ;;  %v5494_v8 = vor.u32 %v5493_v46, %v5490_v58  ;;  %v5068_v46 = vpop.f32.mrf.mxu3 }
 0x432   : > { %v4833_v23 = vpop.f32.mrf.mxu2  ;;  %v5563_v39 = vunpack.c.l.b16 %v5486_v22  ;;  %v5504_v16 = vor.u32 %v5503_v19, %v5499_v49  ;;  %v5527_v58 = vrot.slane %v5525_v12, 4 }
 0x433   : > { %v9847_v59 = vadd.f32 %v4833_v23, %v4486_v40  ;;  %v4457_v26 = vpop.f32.mrf.mxu1  ;;  %v5769_v40 = vrot.slane %v5336_v1, 5 }
 0x434   : > { %v4487_v43 = vadd.f32 %v4457_v26, %v9723_v25  ;;  %v5812_v26 = vunpack.c.l.b16 %v5767_v10  ;;  %v5505_v48 = vrot.slane %v5504_v16, 4 }
 0x435   : > { %v5770_v23 = vsel %vm8134_vm5, %v5768_v30, %v5769_v40  ;;  %v5521_v40 = vshll.u32 %v5341_v44, 16 }
 0x43a   : > { %v4835_v21 = vpop.f32.mrf.mxu2 }
 0x43b   : > { %v9850_v17 = vadd.f32 %v4835_v21, %v4487_v43  ;;  %v4460_v5 = vpop.f32.mrf.mxu1  ;;  %v5813_v43 = vunpack.c.l.b16 %v5770_v23  ;;  %v5703_v21 = vld [vmem:[#allocation2 + $0x60] sm:$0xe]  ;;  %v5523_v23 = vrot.slane %v5521_v40, 5 }
 0x43c   : > { %v4488_v25 = vadd.f32 %v4460_v5, %v9740_v6  ;;  %v5476_v6 = vsel %vm8049_vm2, %v5471_v20, %v5475_v50  ;;  %v7530_v42 = vrot.slane %v5703_v21, 9  ;;  %v5775_v5 = vrot.slane %v5773_v61, 4 }
 0x43d   : > { %v5562_v45 = vunpack.c.l.b16 %v5476_v6  ;;  %v5823_v1 = vpack.c.b16 %v5813_v43, %v5812_v26  ;;  %v5510_v20 = vsel %vm8049_vm2, %v5505_v48, %v5509_v62  ;;  %v5528_v43 = vor.u32 %v5527_v58, %v5523_v23  ;;  %v5070_v62 = vpop.f32.mrf.mxu3 }
 0x43e   : > { %5660 = vmatmul.bf16.gmra.mxu1 %v5572_v55  ;;  %v5777_v15 = vsel %vm8134_vm5, %v5775_v5, %v5776_v24 }
 0x43f   : > { %5910 = vmatmul.bf16.gmra.mxu2 %v5822_v56  ;;  %v5573_v35 = vpack.c.b16 %v5563_v39, %v5562_v45  ;;  %v5495_v56 = vrot.slane %v5494_v8, 4 }
 0x441   : > { %v5500_v60 = vsel %vm8049_vm2, %v5495_v56, %v5499_v49 }
 0x442   : > { %v4838_v29 = vpop.f32.mrf.mxu2  ;;  %v5564_v41 = vunpack.c.l.b16 %v5500_v60 }
 0x443   : > { %v9853_v34 = vadd.f32 %v4838_v29, %v4488_v25  ;;  %v4462_v33 = vpop.f32.mrf.mxu1  ;;  %v5340_v25 = vld [vmem:[#allocation2 + $0x6c] sm:$0xf]  ;;  %v5565_v29 = vunpack.c.l.b16 %v5510_v20 }
 0x444   : > { %v4489_v51 = vadd.f32 %v4462_v33, %v9746_v53  ;;  %v5512_v18 = vshrl.u32 %v5340_v25, 16  ;;  %v5515_v30 = vshll.u32 %v5340_v25, 16  ;;  %v5815_v33 = vunpack.c.l.b16 %v5777_v15  ;;  %v5265_v15 = vpop.f32.mrf.mxu0 }
 0x445   : > { %v5574_v19 = vpack.c.b16 %v5565_v29, %v5564_v41  ;;  %v5073_v29 = vpop.f32.mrf.mxu3 }
 0x446   : > { %v5514_v22 = vrot.slane %v5512_v18, 4  ;;  %v5517_v10 = vrot.slane %v5515_v30, 5 }
 0x448   : > { %v5518_v26 = vor.u32 %v5517_v10, %v5514_v22 }
 0x44a   : > { %v4840_v47 = vpop.f32.mrf.mxu2 }
 0x44b   : > { %v9864_v50 = vadd.f32 %v4840_v47, %v4489_v51  ;;  %v4465_v55 = vpop.f32.mrf.mxu1  ;;  %v5342_v51 = vld [vmem:[#allocation2 + $0x74] sm:$0x1]  ;;  %v5704_v47 = vld [vmem:[#allocation2 + $0x6c] sm:$0xe] }
 0x44c   : > { %v4490_v53 = vadd.f32 %v4465_v55, %v9763_v11  ;;  %v5774_v11 = vsel %vm8134_vm5, %v7530_v42, %v5773_v61  ;;  %v5531_v8 = vshll.u32 %v5342_v51, 16  ;;  %v5519_v61 = vrot.slane %v5518_v26, 4 }
 0x44d   : > { %v5814_v6 = vunpack.c.l.b16 %v5774_v11  ;;  %v7531_v21 = vrot.slane %v5704_v47, 9 }
 0x44e   : > { %5665 = vmatmul.bf16.gmra.mxu1 %v5573_v35  ;;  %v5529_v35 = vrot.slane %v5528_v43, 4  ;;  %v5524_v5 = vsel %vm8049_vm2, %v5519_v61, %v5523_v23 }
 0x44f   : > { %5915 = vmatmul.bf16.gmra.mxu2 %v5823_v1  ;;  %v5824_v39 = vpack.c.b16 %v5815_v33, %v5814_v6  ;;  %v5533_v1 = vrot.slane %v5531_v8, 5  ;;  %v5566_v60 = vunpack.c.l.b16 %v5524_v5  ;;  %v9896_v6 = vpop.f32.mrf.mxu0 }
 0x452   : > { %v4843_v36 = vpop.f32.mrf.mxu2 }
 0x453   : > { %v9875_v9 = vadd.f32 %v4843_v36, %v4490_v53  ;;  %v4467_v63 = vpop.f32.mrf.mxu1  ;;  %v5783_v53 = vrot.slane %v5342_v51, 5  ;;  %v7581_v51 = vld [vmem:[%s8011_s8 + $0x1c] sm:$0xf] }
 0x454   : > { %v4491_v4 = vadd.f32 %v4467_v63, %v9770_v2  ;;  %v5780_v2 = vrot.slane %v5341_v44, 5  ;;  %v5985_v26 = vshrl.u32 %v7581_v51, 16 }
 0x456   : > { %v5782_v55 = vrot.slane %v5780_v2, 4  ;;  %v5781_v24 = vsel %vm8134_vm5, %v7531_v21, %v5780_v2  ;;  %v7583_v21 = vld [vmem:[%s8011_s8 + $0x24] sm:$0xf] }
 0x457   : > { %v5816_v20 = vunpack.c.l.b16 %v5781_v24  ;;  %v9907_v47 = vpop.f32.mrf.mxu0  ;;  %v5999_v5 = vshll.u32 %v7583_v21, 16 }
 0x458   : > { %v5784_v25 = vsel %vm8134_vm5, %v5782_v55, %v5783_v53 }
 0x459   : > { %v5817_v11 = vunpack.c.l.b16 %v5784_v25  ;;  %v5109_v25 = vadd.f32 %v5070_v62, %v9808_v28 }
 0x45a   : > { %v4845_v49 = vpop.f32.mrf.mxu2 }
 0x45b   : > { %v9878_v45 = vadd.f32 %v4845_v49, %v4491_v4  ;;  %v4470_v13 = vpop.f32.mrf.mxu1  ;;  %v5825_v12 = vpack.c.b16 %v5817_v11, %v5816_v20  ;;  %v7580_v4 = vld [vmem:[%s8011_s8 + $0x18] sm:$0xf] }
 0x45c   : > { %v4492_v16 = vadd.f32 %v4470_v13, %v9780_v57  ;;  %v5534_v57 = vsel %vm8049_vm2, %v5529_v35, %v5533_v1  ;;  %v5972_v14 = vshrl.u32 %v7580_v4, 16  ;;  %v5108_v13 = vadd.f32 %v5068_v46, %v9797_v0  ;;  %v7582_v1 = vld [vmem:[%s8011_s8 + $0x20] sm:$0x1] }
 0x45d   : > { %v5567_v36 = vunpack.c.l.b16 %v5534_v57  ;;  %v5987_v35 = vrot.slane %v5985_v26, 4  ;;  %v9916_v46 = vld [vmem:[%s10043_s4] ss:$0 sm:$0xff] }
 0x45e   : > { %5670 = vmatmul.bf16.gmra.mxu1 %v5574_v19  ;;  %v5974_v10 = vrot.slane %v5972_v14, 4  ;;  %v5303_v55 = vadd.f32 %v5263_v38, %v5108_v13 }
 0x45f   : > { %5920 = vmatmul.bf16.gmra.mxu2 %v5824_v39  ;;  %v5575_v40 = vpack.c.b16 %v5567_v36, %v5566_v60  ;;  %v9902_v39 = vpop.f32.mrf.mxu3 }
 0x462   : > { %v4848_v56 = vpop.f32.mrf.mxu2 }
 0x463   : > { %v9881_v48 = vadd.f32 %v4848_v56, %v4492_v16  ;;  %v4472_v42 = vpop.f32.mrf.mxu1  ;;  %v5991_v56 = vshll.u32 %v7582_v1, 16 }
 0x464   : > { %v4493_v44 = vadd.f32 %v4472_v42, %v9782_v27  ;;  %v5975_v27 = vshll.u32 %v7580_v4, 16  ;;  %v5996_v42 = vshrl.u32 %v7583_v21, 16  ;;  %v5304_v4 = vadd.f32 %v5265_v15, %v5109_v25 }
 0x465   : > { %v5993_v20 = vrot.slane %v5991_v56, 5 }
 0x466   : > { %v5977_v23 = vrot.slane %v5975_v27, 5  ;;  %v5998_v11 = vrot.slane %v5996_v42, 4 }
 0x467   : > { %v9918_v57 = vpop.f32.mrf.mxu3 }
 0x468   : > { %v5978_v19 = vor.u32 %v5977_v23, %v5974_v10  ;;  %v5110_v23 = vadd.f32 %v5073_v29, %v9819_v31 }
 0x46a   : > { %v4850_v18 = vpop.f32.mrf.mxu2  ;;  %v5979_v2 = vrot.slane %v5978_v19, 4 }
 0x46b   : > { %v9892_v30 = vadd.f32 %v4850_v18, %v4493_v44  ;;  %v4475_v63 = vpop.f32.mrf.mxu1  ;;  %v6001_v18 = vrot.slane %v5999_v5, 5 }
 0x46c   : > { %v4494_v41 = vadd.f32 %v4475_v63, %v9792_v52  ;;  %v5981_v52 = vshll.u32 %v7581_v51, 16  ;;  %v9923_v63 = vpop.f32.mrf.mxu0 }
 0x46d   : > { %v6002_v28 = vor.u32 %v6001_v18, %v5998_v11 }
 0x46e   : > { %5675 = vmatmul.bf16.gmra.mxu1 %v5575_v40  ;;  %v5983_v16 = vrot.slane %v5981_v52, 5 }
 0x46f   : > { %5925 = vmatmul.bf16.gmra.mxu2 %v5825_v12  ;;  %v7584_v12 = vld [vmem:[%s8011_s8 + $0x28] sm:$0xf]  ;;  %v6003_v15 = vrot.slane %v6002_v28, 4 }
 0x470   : > { %v5988_v53 = vor.u32 %v5987_v35, %v5983_v16  ;;  %v6005_v62 = vshll.u32 %v7584_v12, 16  ;;  %v6009_v27 = vshrl.u32 %v7584_v12, 16 }
 0x472   : > { %v4853_v33 = vpop.f32.mrf.mxu2  ;;  %v5989_v36 = vrot.slane %v5988_v53, 4  ;;  %v6007_v52 = vrot.slane %v6005_v62, 5  ;;  %v6011_v26 = vrot.slane %v6009_v27, 4  ;;  %v5111_v53 = vadd.f32 %v9902_v39, %v9822_v3 }
 0x473   : > { %v9898_v22 = vadd.f32 %v4853_v33, %v4494_v41  ;;  %v4477_v58 = vpop.f32.mrf.mxu1 }
 0x474   : > { %v4495_v49 = vadd.f32 %v4477_v58, %v9794_v37  ;;  %v5984_v37 = vsel %vm8049_vm2, %v5979_v2, %v5983_v16  ;;  %v5994_v14 = vsel %vm8049_vm2, %v5989_v36, %v5993_v20  ;;  %v7585_v2 = vld [vmem:[%s8011_s8 + $0x2c] sm:$0x1]  ;;  %v5305_v16 = vadd.f32 %v9896_v6, %v5110_v23  ;;  %v5275_v21 = vpop.f32.mrf.mxu0 }
 0x475   : > { %v6199_v44 = vunpack.c.l.bf16 %v5984_v37  ;;  %v6200_v51 = vunpack.c.l.bf16 %v5994_v14  ;;  %v6008_v31 = vsel %vm8049_vm2, %v6003_v15, %v6007_v52  ;;  %v6012_v29 = vor.u32 %v6011_v26, %v6007_v52 }
 0x476   : > { %v6201_v5 = vunpack.c.l.bf16 %v6008_v31  ;;  %v5306_v20 = vadd.f32 %v9907_v47, %v5111_v53 }
 0x477   : > { %v6013_v25 = vrot.slane %v6012_v29, 4 }
 0x47a   : > { %v4855_v43 = vpop.f32.mrf.mxu2 }
 0x47b   : > { %v9905_v8 = vadd.f32 %v4855_v43, %v4495_v49  ;;  %v5641_v61 = vpop.f32.mrf.mxu1  ;;  %v5080_v49 = vpop.f32.mrf.mxu3  ;;  %v7586_v43 = vld [vmem:[%s8011_s8 + $0x30] sm:$0xf] }
 0x47c   : > { %v5681_v0 = vadd.f32 %v5641_v61, %v5303_v55  ;;  %v6020_v35 = vshrl.u32 %v7586_v43, 16  ;;  %v6023_v1 = vshll.u32 %v7586_v43, 16  ;;  %v6015_v55 = vshll.u32 %v7585_v2, 16 }
 0x47e   : > { %v6022_v6 = vrot.slane %v6020_v35, 4 }
 0x482   : > { %v5891_v24 = vpop.f32.mrf.mxu2 }
 0x483   : > { %v5931_v38 = vadd.f32 %v5891_v24, %v5681_v0  ;;  %v5643_v60 = vpop.f32.mrf.mxu1  ;;  %v6025_v0 = vrot.slane %v6023_v1, 5  ;;  %v5083_v36 = vpop.f32.mrf.mxu3 }
 0x484   : > { %v5682_v33 = vadd.f32 %v5643_v60, %v5304_v4  ;;  %v5112_v4 = vadd.f32 %v9918_v57, %v9825_v54 }
 0x485   : > { %v6183_v40 = vadd.f32 %v9916_v46, %v5931_v38  ;;  %v6017_v38 = vrot.slane %v6015_v55, 5  ;;  %v6026_v18 = vor.u32 %v6025_v0, %v6022_v6 }
 0x487   : > { %v6215_v41 = vadd.f32 %v6199_v44, %v6183_v40  ;;  %v7587_v44 = vld [vmem:[%s8011_s8 + $0x34] sm:$0xf]  ;;  %v6018_v3 = vsel %vm8049_vm2, %v6013_v25, %v6017_v38  ;;  %v6027_v47 = vrot.slane %v6026_v18, 4 }
 0x488   : > { %v6029_v40 = vshll.u32 %v7587_v44, 16  ;;  %v6033_v39 = vshrl.u32 %v7587_v44, 16  ;;  %v6202_v62 = vunpack.c.l.bf16 %v6018_v3 }
 0x489   : > { %6231 = vst [vmem:[%s8023_s15] sm:$0xff] %v6215_v41  ;;  %v5278_v41 = vpop.f32.mrf.mxu0 }
 0x48a   : > { %v5893_v10 = vpop.f32.mrf.mxu2  ;;  %v6031_v27 = vrot.slane %v6029_v40, 5 }
 0x48b   : > { %v5932_v58 = vadd.f32 %v5893_v10, %v5682_v33  ;;  %v5646_v19 = vpop.f32.mrf.mxu1  ;;  %v6035_v10 = vrot.slane %v6033_v39, 4  ;;  %v5085_v54 = vpop.f32.mrf.mxu3  ;;  %v7592_v39 = vld [vmem:[%s8011_s8 + $0x48] sm:$0xf] }
 0x48c   : > { %v5683_v37 = vadd.f32 %v5646_v19, %v5305_v16  ;;  %v5307_v19 = vadd.f32 %v9923_v63, %v5112_v4  ;;  %v6032_v52 = vsel %vm8049_vm2, %v6027_v47, %v6031_v27  ;;  %v7591_v4 = vld [vmem:[%s8011_s8 + $0x44] sm:$0x1]  ;;  %v6068_v47 = vshrl.u32 %v7592_v39, 16 }
 0x48d   : > { %v6184_v13 = vadd.f32 %v9916_v46, %v5932_v58  ;;  %v7588_v58 = vld [vmem:[%s8011_s8 + $0x38] sm:$0x1]  ;;  %v6036_v57 = vor.u32 %v6035_v10, %v6031_v27  ;;  %v6203_v1 = vunpack.c.l.bf16 %v6032_v52  ;;  %v6071_v27 = vshll.u32 %v7592_v39, 16 }
 0x48e   : > { %v6039_v26 = vshll.u32 %v7588_v58, 16 }
 0x48f   : > { %v6216_v61 = vadd.f32 %v6200_v51, %v6184_v13  ;;  %v7589_v51 = vld [vmem:[%s8011_s8 + $0x3c] sm:$0xf]  ;;  %v6037_v29 = vrot.slane %v6036_v57, 4  ;;  %v6073_v52 = vrot.slane %v6071_v27, 5 }
 0x490   : > { %v6044_v43 = vshrl.u32 %v7589_v51, 16  ;;  %v6047_v13 = vshll.u32 %v7589_v51, 16  ;;  %v6041_v55 = vrot.slane %v6039_v26, 5 }
 0x491   : > { %6232 = vst [vmem:[%s8023_s15 + $0x8] sm:$0xff] %v6216_v61  ;;  %v5113_v61 = vadd.f32 %v5080_v49, %v9836_v7  ;;  %v5280_v31 = vpop.f32.mrf.mxu0 }
 0x492   : > { %v5896_v56 = vpop.f32.mrf.mxu2  ;;  %v6049_v53 = vrot.slane %v6047_v13, 5  ;;  %v6042_v0 = vsel %vm8049_vm2, %v6037_v29, %v6041_v55  ;;  %v7593_v13 = vld [vmem:[%s8011_s8 + $0x4c] sm:$0xf] }
 0x493   : > { %v5933_v42 = vadd.f32 %v5896_v56, %v5683_v37  ;;  %v5648_v24 = vpop.f32.mrf.mxu1  ;;  %v6046_v37 = vrot.slane %v6044_v43, 4  ;;  %v5088_v38 = vpop.f32.mrf.mxu3 }
 0x494   : > { %v5684_v12 = vadd.f32 %v5648_v24, %v5306_v20  ;;  %v5116_v55 = vadd.f32 %v5088_v38, %v9853_v34 }
 0x495   : > { %v6185_v60 = vadd.f32 %v9916_v46, %v5933_v42  ;;  %v7590_v42 = vld [vmem:[%s8011_s8 + $0x40] sm:$0xf]  ;;  %v6050_v24 = vor.u32 %v6049_v53, %v6046_v37 }
 0x496   : > { %v6053_v7 = vshll.u32 %v7590_v42, 16  ;;  %v6057_v49 = vshrl.u32 %v7590_v42, 16 }
 0x497   : > { %v6217_v11 = vadd.f32 %v6201_v5, %v6185_v60  ;;  %v5308_v5 = vadd.f32 %v5275_v21, %v5113_v61  ;;  %v5114_v60 = vadd.f32 %v5083_v36, %v9847_v59  ;;  %v6051_v21 = vrot.slane %v6050_v24, 4  ;;  %v7594_v24 = vld [vmem:[%s8011_s8 + $0x50] sm:$0x1] }
 0x498   : > { %v6055_v40 = vrot.slane %v6053_v7, 5  ;;  %v6059_v3 = vrot.slane %v6057_v49, 4  ;;  %v7595_v7 = vld [vmem:[%s8011_s8 + $0x54] sm:$0xf]  ;;  %v6087_v34 = vshll.u32 %v7594_v24, 16 }
 0x499   : > { %6233 = vst [vmem:[%s8023_s15 + $0x10] sm:$0xff] %v6217_v11  ;;  %v6204_v11 = vunpack.c.l.bf16 %v6042_v0  ;;  %v6092_v38 = vshrl.u32 %v7595_v7, 16 }
 0x49a   : > { %v5898_v14 = vpop.f32.mrf.mxu2  ;;  %v6056_v59 = vsel %vm8049_vm2, %v6051_v21, %v6055_v40  ;;  %v6060_v36 = vor.u32 %v6059_v3, %v6055_v40 }
 0x49b   : > { %v5934_v28 = vadd.f32 %v5898_v14, %v5684_v12  ;;  %v5651_v33 = vpop.f32.mrf.mxu1  ;;  %v5283_v14 = vpop.f32.mrf.mxu0 }
 0x49c   : > { %v5685_v2 = vadd.f32 %v5651_v33, %v5307_v19  ;;  %v6063_v33 = vshll.u32 %v7591_v4, 16  ;;  %v6205_v19 = vunpack.c.l.bf16 %v6056_v59  ;;  %v6061_v26 = vrot.slane %v6060_v36, 4  ;;  %v7596_v59 = vld [vmem:[%s8011_s8 + $0x58] sm:$0xf] }
 0x49d   : > { %v6186_v23 = vadd.f32 %v9916_v46, %v5934_v28  ;;  %v5309_v28 = vadd.f32 %v5278_v41, %v5114_v60  ;;  %v5090_v41 = vpop.f32.mrf.mxu3 }
 0x49e   : > { %v6065_v43 = vrot.slane %v6063_v33, 5  ;;  %v5117_v3 = vadd.f32 %v5090_v41, %v9864_v50  ;;  %v6101_v50 = vshll.u32 %v7596_v59, 16 }
 0x49f   : > { %v6218_v15 = vadd.f32 %v6202_v62, %v6186_v23  ;;  %v5115_v23 = vadd.f32 %v5085_v54, %v9850_v17 }
 0x4a0   : > { %v6066_v54 = vsel %vm8049_vm2, %v6061_v26, %v6065_v43 }
 0x4a1   : > { %6234 = vst [vmem:[%s8023_s15 + $0x18] sm:$0xff] %v6218_v15  ;;  %v6070_v15 = vrot.slane %v6068_v47, 4 }
 0x4a2   : > { %v5901_v16 = vpop.f32.mrf.mxu2 }
 0x4a3   : > { %v5935_v35 = vadd.f32 %v5901_v16, %v5685_v2  ;;  %v5653_v63 = vpop.f32.mrf.mxu1  ;;  %v5310_v16 = vadd.f32 %v5280_v31, %v5115_v23  ;;  %v5285_v17 = vpop.f32.mrf.mxu0 }
 0x4a4   : > { %v5686_v25 = vadd.f32 %v5653_v63, %v5308_v5  ;;  %v6081_v63 = vshrl.u32 %v7593_v13, 16  ;;  %v5312_v36 = vadd.f32 %v5285_v17, %v5117_v3 }
 0x4a5   : > { %v6187_v56 = vadd.f32 %v9916_v46, %v5935_v35  ;;  %v6074_v35 = vor.u32 %v6073_v52, %v6070_v15  ;;  %v5093_v49 = vpop.f32.mrf.mxu3 }
 0x4a6   : > { %v5118_v52 = vadd.f32 %v5093_v49, %v9875_v9 }
 0x4a7   : > { %v6219_v6 = vadd.f32 %v6203_v1, %v6187_v56  ;;  %v6077_v1 = vshll.u32 %v7593_v13, 16  ;;  %v6206_v56 = vunpack.c.l.bf16 %v6066_v54  ;;  %v6075_v42 = vrot.slane %v6074_v35, 4 }
 0x4a9   : > { %6235 = vst [vmem:[%s8023_s15 + $0x20] sm:$0xff] %v6219_v6  ;;  %v6079_v31 = vrot.slane %v6077_v1, 5  ;;  %v6083_v6 = vrot.slane %v6081_v63, 4  ;;  %v7597_v1 = vld [vmem:[%s8011_s8 + $0x5c] sm:$0x1] }
 0x4aa   : > { %v5903_v44 = vpop.f32.mrf.mxu2 }
 0x4ab   : > { %v5936_v20 = vadd.f32 %v5903_v44, %v5686_v25  ;;  %v5656_v18 = vpop.f32.mrf.mxu1  ;;  %v5311_v25 = vadd.f32 %v5283_v14, %v5116_v55  ;;  %v6080_v60 = vsel %vm8049_vm2, %v6075_v42, %v6079_v31  ;;  %v5288_v21 = vpop.f32.mrf.mxu0 }
 0x4ac   : > { %v5687_v10 = vadd.f32 %v5656_v18, %v5309_v28  ;;  %v6089_v28 = vrot.slane %v6087_v34, 5  ;;  %v5313_v17 = vadd.f32 %v5288_v21, %v5118_v52 }
 0x4ad   : > { %v6188_v12 = vadd.f32 %v9916_v46, %v5936_v20  ;;  %v6084_v20 = vor.u32 %v6083_v6, %v6079_v31 }
 0x4af   : > { %v6220_v62 = vadd.f32 %v6204_v11, %v6188_v12  ;;  %v6095_v11 = vshll.u32 %v7595_v7, 16  ;;  %v6207_v12 = vunpack.c.l.bf16 %v6080_v60  ;;  %v6085_v14 = vrot.slane %v6084_v20, 4 }
 0x4b1   : > { %6236 = vst [vmem:[%s8023_s15 + $0x28] sm:$0xff] %v6220_v62  ;;  %v6094_v62 = vrot.slane %v6092_v38, 4  ;;  %v6097_v47 = vrot.slane %v6095_v11, 5  ;;  %v6090_v23 = vsel %vm8049_vm2, %v6085_v14, %v6089_v28 }
 0x4b2   : > { %v5906_v58 = vpop.f32.mrf.mxu2 }
 0x4b3   : > { %v5937_v51 = vadd.f32 %v5906_v58, %v5687_v10  ;;  %v5658_v57 = vpop.f32.mrf.mxu1  ;;  %v5095_v10 = vpop.f32.mrf.mxu3  ;;  %v6098_v58 = vor.u32 %v6097_v47, %v6094_v62 }
 0x4b4   : > { %v5688_v29 = vadd.f32 %v5658_v57, %v5310_v16  ;;  %v6208_v57 = vunpack.c.l.bf16 %v6090_v23  ;;  %v5290_v26 = vpop.f32.mrf.mxu0 }
 0x4b5   : > { %v6189_v2 = vadd.f32 %v9916_v46, %v5937_v51  ;;  %v6105_v51 = vshrl.u32 %v7596_v59, 16  ;;  %v6099_v13 = vrot.slane %v6098_v58, 4 }
 0x4b7   : > { %v6221_v61 = vadd.f32 %v6205_v19, %v6189_v2  ;;  %v6103_v2 = vrot.slane %v6101_v50, 5  ;;  %v6107_v16 = vrot.slane %v6105_v51, 4 }
 0x4b9   : > { %6237 = vst [vmem:[%s8023_s15 + $0x30] sm:$0xff] %v6221_v61  ;;  %v7598_v61 = vld [vmem:[%s8011_s8 + $0x60] sm:$0xf]  ;;  %v6104_v9 = vsel %vm8049_vm2, %v6099_v13, %v6103_v2  ;;  %v6108_v55 = vor.u32 %v6107_v16, %v6103_v2 }
 0x4ba   : > { %v5908_v37 = vpop.f32.mrf.mxu2  ;;  %v6116_v63 = vshrl.u32 %v7598_v61, 16  ;;  %v6209_v6 = vunpack.c.l.bf16 %v6104_v9 }
 0x4bb   : > { %v5938_v53 = vadd.f32 %v5908_v37, %v5688_v29  ;;  %v5661_v5 = vpop.f32.mrf.mxu1  ;;  %v6119_v29 = vshll.u32 %v7598_v61, 16  ;;  %v6111_v37 = vshll.u32 %v7597_v1, 16  ;;  %v5098_v42 = vpop.f32.mrf.mxu3  ;;  %v6109_v49 = vrot.slane %v6108_v55, 4 }
 0x4bc   : > { %v5689_v18 = vadd.f32 %v5661_v5, %v5311_v25  ;;  %v5293_v20 = vpop.f32.mrf.mxu0  ;;  %v5120_v3 = vadd.f32 %v5098_v42, %v9881_v48 }
 0x4bd   : > { %v6190_v0 = vadd.f32 %v9916_v46, %v5938_v53  ;;  %v6121_v24 = vrot.slane %v6119_v29, 5  ;;  %v6113_v25 = vrot.slane %v6111_v37, 5 }
 0x4bf   : > { %v6222_v44 = vadd.f32 %v6206_v56, %v6190_v0  ;;  %v5119_v56 = vadd.f32 %v5095_v10, %v9878_v45  ;;  %v6118_v0 = vrot.slane %v6116_v63, 4  ;;  %v6114_v45 = vsel %vm8049_vm2, %v6109_v49, %v6113_v25 }
 0x4c0   : > { %v5315_v10 = vadd.f32 %v5293_v20, %v5120_v3 }
 0x4c1   : > { %6238 = vst [vmem:[%s8023_s15 + $0x38] sm:$0xff] %v6222_v44  ;;  %v7599_v44 = vld [vmem:[%s8011_s8 + $0x64] sm:$0xf]  ;;  %v5314_v34 = vadd.f32 %v5290_v26, %v5119_v56  ;;  %v6122_v11 = vor.u32 %v6121_v24, %v6118_v0 }
 0x4c2   : > { %v5911_v40 = vpop.f32.mrf.mxu2  ;;  %v6129_v21 = vshrl.u32 %v7599_v44, 16 }
 0x4c3   : > { %v5939_v39 = vadd.f32 %v5911_v40, %v5689_v18  ;;  %v5663_v4 = vpop.f32.mrf.mxu1  ;;  %v6125_v18 = vshll.u32 %v7599_v44, 16  ;;  %v6123_v14 = vrot.slane %v6122_v11, 4  ;;  %v5100_v62 = vpop.f32.mrf.mxu3  ;;  %v7603_v44 = vld [vmem:[%s8011_s8 + $0x74] sm:$0x1] }
 0x4c4   : > { %v5690_v19 = vadd.f32 %v5663_v4, %v5312_v36  ;;  %v6210_v4 = vunpack.c.l.bf16 %v6114_v45  ;;  %v7600_v36 = vld [vmem:[%s8011_s8 + $0x68] sm:$0x1]  ;;  %v5295_v50 = vpop.f32.mrf.mxu0 }
 0x4c5   : > { %v6191_v27 = vadd.f32 %v9916_v46, %v5939_v39  ;;  %v6127_v28 = vrot.slane %v6125_v18, 5  ;;  %v6135_v51 = vshll.u32 %v7600_v36, 16  ;;  %v6159_v18 = vshll.u32 %v7603_v44, 16 }
 0x4c7   : > { %v6223_v33 = vadd.f32 %v6207_v12, %v6191_v27  ;;  %v6131_v27 = vrot.slane %v6129_v21, 4  ;;  %v6128_v58 = vsel %vm8049_vm2, %v6123_v14, %v6127_v28  ;;  %v6137_v16 = vrot.slane %v6135_v51, 5 }
 0x4c9   : > { %6239 = vst [vmem:[%s8023_s15 + $0x40] sm:$0xff] %v6223_v33  ;;  %v7601_v33 = vld [vmem:[%s8011_s8 + $0x6c] sm:$0xf]  ;;  %v6132_v48 = vor.u32 %v6131_v27, %v6127_v28 }
 0x4ca   : > { %v5913_v15 = vpop.f32.mrf.mxu2 }
 0x4cb   : > { %v5940_v41 = vadd.f32 %v5913_v15, %v5690_v19  ;;  %v5666_v43 = vpop.f32.mrf.mxu1  ;;  %v6140_v19 = vshrl.u32 %v7601_v33, 16  ;;  %v6143_v15 = vshll.u32 %v7601_v33, 16  ;;  %v6133_v2 = vrot.slane %v6132_v48, 4 }
 0x4cc   : > { %v5691_v53 = vadd.f32 %v5666_v43, %v5313_v17  ;;  %v6211_v43 = vunpack.c.l.bf16 %v6128_v58  ;;  %v7602_v17 = vld [vmem:[%s8011_s8 + $0x70] sm:$0xf]  ;;  %v5298_v56 = vpop.f32.mrf.mxu0 }
 0x4cd   : > { %v6192_v35 = vadd.f32 %v9916_v46, %v5940_v41  ;;  %v6142_v61 = vrot.slane %v6140_v19, 4  ;;  %v6138_v9 = vsel %vm8049_vm2, %v6133_v2, %v6137_v16  ;;  %v6153_v37 = vshrl.u32 %v7602_v17, 16 }
 0x4cf   : > { %v6224_v54 = vadd.f32 %v6208_v57, %v6192_v35  ;;  %v5121_v57 = vadd.f32 %v5100_v62, %v9892_v30  ;;  %v6145_v35 = vrot.slane %v6143_v15, 5  ;;  %v6149_v30 = vshll.u32 %v7602_v17, 16 }
 0x4d0   : > { %v6155_v49 = vrot.slane %v6153_v37, 4 }
 0x4d1   : > { %6240 = vst [vmem:[%s8023_s15 + $0x48] sm:$0xff] %v6224_v54  ;;  %v5103_v54 = vpop.f32.mrf.mxu3  ;;  %v5316_v63 = vadd.f32 %v5295_v50, %v5121_v57  ;;  %v6146_v55 = vor.u32 %v6145_v35, %v6142_v61 }
 0x4d2   : > { %v5916_v31 = vpop.f32.mrf.mxu2 }
 0x4d3   : > { %v5941_v5 = vadd.f32 %v5916_v31, %v5691_v53  ;;  %v5668_v7 = vpop.f32.mrf.mxu1  ;;  %v5122_v31 = vadd.f32 %v5103_v54, %v9898_v22  ;;  %v6147_v24 = vrot.slane %v6146_v55, 4 }
 0x4d4   : > { %v5692_v40 = vadd.f32 %v5668_v7, %v5314_v34  ;;  %v6151_v7 = vrot.slane %v6149_v30, 5 }
 0x4d5   : > { %v6193_v60 = vadd.f32 %v9916_v46, %v5941_v5 }
 0x4d6   : > { %v6156_v11 = vor.u32 %v6155_v49, %v6151_v7 }
 0x4d7   : > { %v6225_v38 = vadd.f32 %v6209_v6, %v6193_v60  ;;  %v6212_v6 = vunpack.c.l.bf16 %v6138_v9  ;;  %v5317_v60 = vadd.f32 %v5298_v56, %v5122_v31 }
 0x4d9   : > { %6241 = vst [vmem:[%s8023_s15 + $0x50] sm:$0xff] %v6225_v38  ;;  %v5105_v34 = vpop.f32.mrf.mxu3  ;;  %v6152_v38 = vsel %vm8049_vm2, %v6147_v24, %v6151_v7 }
 0x4da   : > { %v5918_v39 = vpop.f32.mrf.mxu2  ;;  %v5123_v21 = vadd.f32 %v5105_v34, %v9905_v8  ;;  %v6213_v3 = vunpack.c.l.bf16 %v6152_v38 }
 0x4db   : > { %v5942_v12 = vadd.f32 %v5918_v39, %v5692_v40  ;;  %v5671_v47 = vpop.f32.mrf.mxu1  ;;  %v5300_v39 = vpop.f32.mrf.mxu0 }
 0x4dc   : > { %v5693_v52 = vadd.f32 %v5671_v47, %v5315_v10  ;;  %v5318_v62 = vadd.f32 %v5300_v39, %v5123_v21 }
 0x4dd   : > { %v6194_v59 = vadd.f32 %v9916_v46, %v5942_v12  ;;  %v6157_v12 = vrot.slane %v6156_v11, 4 }
 0x4df   : > { %v6226_v23 = vadd.f32 %v6210_v4, %v6194_v59  ;;  %v6161_v4 = vrot.slane %v6159_v18, 5 }
 0x4e1   : > { %6242 = vst [vmem:[%s8023_s15 + $0x58] sm:$0xff] %v6226_v23  ;;  %v6162_v27 = vsel %vm8049_vm2, %v6157_v12, %v6161_v4 }
 0x4e2   : > { %v5921_v41 = vpop.f32.mrf.mxu2  ;;  %v6214_v10 = vunpack.c.l.bf16 %v6162_v27 }
 0x4e3   : > { %v5943_v26 = vadd.f32 %v5921_v41, %v5693_v52  ;;  %v5673_v13 = vpop.f32.mrf.mxu1 }
 0x4e4   : > { %v5694_v53 = vadd.f32 %v5673_v13, %v5316_v63 }
 0x4e5   : > { %v6195_v1 = vadd.f32 %v9916_v46, %v5943_v26 }
 0x4e7   : > { %v6227_v29 = vadd.f32 %v6211_v43, %v6195_v1 }
 0x4e9   : > { %6243 = vst [vmem:[%s8023_s15 + $0x60] sm:$0xff] %v6227_v29 }
 0x4ea   : > { %v5923_v42 = vpop.f32.mrf.mxu2 }
 0x4eb   : > { %v5944_v5 = vadd.f32 %v5923_v42, %v5694_v53  ;;  %v5676_v0 = vpop.f32.mrf.mxu1 }
 0x4ec   : > { %v5695_v22 = vadd.f32 %v5676_v0, %v5317_v60 }
 0x4ed   : > { %v6196_v25 = vadd.f32 %v9916_v46, %v5944_v5 }
 0x4ef   : > { %v6228_v20 = vadd.f32 %v6212_v6, %v6196_v25 }
 0x4f1   : > { %6244 = vst [vmem:[%s8023_s15 + $0x68] sm:$0xff] %v6228_v20 }
 0x4f2   : > { %v5926_v45 = vpop.f32.mrf.mxu2 }
 0x4f3   : > { %v5945_v40 = vadd.f32 %v5926_v45, %v5695_v22  ;;  %v5678_v28 = vpop.f32.mrf.mxu1 }
 0x4f4   : > { %v5696_v59 = vadd.f32 %v5678_v28, %v5318_v62 }
 0x4f5   : > { %v6197_v14 = vadd.f32 %v9916_v46, %v5945_v40 }
 0x4f7   : > { %v6229_v47 = vadd.f32 %v6213_v3, %v6197_v14 }
 0x4f9   : > { %6245 = vst [vmem:[%s8023_s15 + $0x70] sm:$0xff] %v6229_v47 }
 0x4fa   : > { %v5928_v36 = vpop.f32.mrf.mxu2 }
 0x4fb   : > { %v5946_v33 = vadd.f32 %v5928_v36, %v5696_v59 }
 0x4fd   : > { %v6198_v8 = vadd.f32 %v9916_v46, %v5946_v33 }
 0x4ff   : > { %v6230_v23 = vadd.f32 %v6214_v10, %v6198_v8 }
 0x501   : > { %6246 = vst [vmem:[%s8023_s15 + $0x78] sm:$0xff] %v6230_v23 }
 0x502 PF: > { %s15_s22 = sadd.s32 1, %s7912_s22   ;;  %s10072_s18 = smov %s7904_s20 }
 0x503   : > { %p12_p10 = scmp.ge.s32.totalorder %s15_s22, 6   ;;  %s10073_s19 = smov %s7908_s21 }
 0x504   : > { %s10074_s20 = smov %s10077_s23  ;;  %s10075_s21 = smov %s10081_s24 }
 0x505   :  { %14 = sbr.rel (!%p12_p10) target bundleno = 3 (0x3), region = 99 }

</bundles_post_ra>
